<compile_context>
chip_gen: v6e
topology: v6e:2x2x1
jax: 0.10.0
libtpu: 0.0.40
codegen_flags: <defaults>
</compile_context>

<pallas_src>
import numpy as np
import jax
import jax.numpy as jnp
from jax.experimental import pallas as pl
from jax.experimental.pallas import tpu as pltpu

FEATURE_DIM = 32          # d_model (divisible by num_heads)
ROBERTA_DIM = 64
SENTENCE_DIM = 48
NUM_HEADS = 8
HEAD_DIM = FEATURE_DIM // NUM_HEADS
NUM_LAYERS = 2
FF_DIM = 2048             # nn.TransformerEncoderLayer default dim_feedforward
SEQ = 3                   # [visual, roberta_proj, sentence_proj]
BATCH = 2
LN_EPS = 1e-5             # PyTorch LayerNorm default eps

# ---- packed "vector bank" row layout ([NUM_VEC_ROWS, FEATURE_DIM], f32) -------------
ROW_PE = 0                                   # 3 rows (positional encoding)
ROW_B_ROB = ROW_PE + SEQ                     # roberta_proj bias
ROW_B_SEN = ROW_B_ROB + 1                    # sentence_proj bias
ROW_LAYER0 = ROW_B_SEN + 1
ROWS_PER_LAYER = 6                           # out_b, ln1_g, ln1_b, b2, ln2_g, ln2_b
ROW_TNORM_G = ROW_LAYER0 + NUM_LAYERS * ROWS_PER_LAYER
ROW_TNORM_B = ROW_TNORM_G + 1
ROW_BF1 = ROW_TNORM_B + 1
ROW_LNF_G = ROW_BF1 + 1
ROW_LNF_B = ROW_LNF_G + 1
ROW_BF2 = ROW_LNF_B + 1
ROW_ONORM_G = ROW_BF2 + 1
ROW_ONORM_B = ROW_ONORM_G + 1
NUM_VEC_ROWS = ROW_ONORM_B + 1

# ---- packed "matrix bank" row layout ([NUM_MAT_ROWS, FEATURE_DIM], f32) -------------
MAT_W_ROB = 0                                # [ROBERTA_DIM, F]
MAT_W_SEN = MAT_W_ROB + ROBERTA_DIM          # [SENTENCE_DIM, F]
MAT_WF1 = MAT_W_SEN + SENTENCE_DIM           # [3F, F]  (fusion linear 1, split in 3)
MAT_WF2 = MAT_WF1 + 3 * FEATURE_DIM          # [F, F]   (fusion linear 2)
NUM_MAT_ROWS = MAT_WF2 + FEATURE_DIM


# ---------------------------------------------------------------------------
# kernel-side helpers (traced inside the Pallas kernel)
# ---------------------------------------------------------------------------
def _layer_norm(x, g, b):
    mu = jnp.mean(x, axis=-1, keepdims=True)
    xc = x - mu
    var = jnp.mean(xc * xc, axis=-1, keepdims=True)
    return xc * jax.lax.rsqrt(var + LN_EPS) * g + b


def _gelu(x):
    # exact (erf) GELU -- matches PyTorch's default F.gelu / activation='gelu'
    return 0.5 * x * (1.0 + jax.lax.erf(x * np.float32(0.7071067811865476)))


# ---------------------------------------------------------------------------
# the fused kernel
# ---------------------------------------------------------------------------
def enhanced_attr_kernel(
    visual_ref, roberta_ref, sentence_ref,
    vec_ref, mat_ref, bias_ref,
    wqkv_ref, bqkv_ref, wout_ref,
    w1_ref, b1_ref, w2t_ref,
    out_ref,
):
    F, B, S, H, HD = FEATURE_DIM, BATCH, SEQ, NUM_HEADS, HEAD_DIM
    N = B * S

    def row(r):                                   # [1, F] static slice of the vec bank
        return vec_ref[r:r + 1, :]

    visual = visual_ref[...]                                               # [B, F]
    rob = jnp.dot(roberta_ref[...],
                  mat_ref[MAT_W_ROB:MAT_W_ROB + ROBERTA_DIM, :],
                  preferred_element_type=jnp.float32) + row(ROW_B_ROB)     # [B, F]
    sen = jnp.dot(sentence_ref[...],
                  mat_ref[MAT_W_SEN:MAT_W_SEN + SENTENCE_DIM, :],
                  preferred_element_type=jnp.float32) + row(ROW_B_SEN)     # [B, F]

    # Token sequence in seq-major row order: rows [0:B) = visual tokens,
    # [B:2B) = roberta tokens, [2B:3B) = sentence tokens (+ positional encoding).
    x = jnp.concatenate([visual + row(ROW_PE + 0),
                         rob + row(ROW_PE + 1),
                         sen + row(ROW_PE + 2)], axis=0)                   # [N, F]

    attn_bias = bias_ref[...]                    # [N, N]: 0 same-batch / -1e30 cross
    scale = np.float32(1.0 / np.sqrt(HD))

    for l in range(NUM_LAYERS):
        base = ROW_LAYER0 + l * ROWS_PER_LAYER

        # ---- multi-head self-attention: one batched contraction per step ----
        x_b = jnp.broadcast_to(x, (3 * H, N, F))                           # [3H, N, F]
        qkv = jax.lax.dot_general(                                         # [3H, N, HD]
            x_b, wqkv_ref[l],
            dimension_numbers=(((2,), (2,)), ((0,), (0,))),
            preferred_element_type=jnp.float32) + bqkv_ref[l]
        q = qkv[0:H]
        k = qkv[H:2 * H]
        v = qkv[2 * H:3 * H]                                               # [H, N, HD]

        scores = jax.lax.dot_general(                                      # [H, N, N]
            q, k, dimension_numbers=(((2,), (2,)), ((0,), (0,))),
            preferred_element_type=jnp.float32) * scale
        scores = scores + attn_bias[None, :, :]
        m = jnp.max(scores, axis=-1, keepdims=True)
        e = jnp.exp(scores - m)
        p = e / jnp.sum(e, axis=-1, keepdims=True)

        ctx = jax.lax.dot_general(                                         # [H, N, HD]
            p, v, dimension_numbers=(((2,), (1,)), ((0,), (0,))),
            preferred_element_type=jnp.float32)
        attn = jnp.sum(
            jax.lax.dot_general(                                           # [H, N, F]
                ctx, wout_ref[l],
                dimension_numbers=(((2,), (1,)), ((0,), (0,))),
                preferred_element_type=jnp.float32),
            axis=0) + row(base + 0)                                        # [N, F]

        # dropout is identity in eval mode
        x = _layer_norm(x + attn, row(base + 1), row(base + 2))

        # ---- feed-forward (gelu); bf16 weights upcast right before the dot ----
        w1 = w1_ref[l].astype(jnp.float32)                                 # [F, FF]
        w2t = w2t_ref[l].astype(jnp.float32)                               # [F, FF]
        h1 = _gelu(jnp.dot(x, w1, preferred_element_type=jnp.float32)
                   + b1_ref[l])                                            # [N, FF]
        ff = jax.lax.dot_general(                                          # [N, F]
            h1, w2t, dimension_numbers=(((1,), (1,)), ((), ())),
            preferred_element_type=jnp.float32) + row(base + 3)
        x = _layer_norm(x + ff, row(base + 4), row(base + 5))

    # UnifiedMultiModalTransformer's final LayerNorm
    x = _layer_norm(x, row(ROW_TNORM_G), row(ROW_TNORM_B))

    # mean over the modality (seq) axis: rows b, b+B, b+2B belong to batch b
    aggregated = (x[0:B] + x[B:2 * B] + x[2 * B:3 * B]) / np.float32(S)    # [B, F]

    # fusion MLP; the [3F, F] weight is consumed as three [F, F] blocks so the
    # [visual | rob | sen] concat never materializes (no lane concat).
    f = (jnp.dot(visual, mat_ref[MAT_WF1:MAT_WF1 + F, :],
                 preferred_element_type=jnp.float32)
         + jnp.dot(rob, mat_ref[MAT_WF1 + F:MAT_WF1 + 2 * F, :],
                   preferred_element_type=jnp.float32)
         + jnp.dot(sen, mat_ref[MAT_WF1 + 2 * F:MAT_WF1 + 3 * F, :],
                   preferred_element_type=jnp.float32)
         + row(ROW_BF1))
    f = _gelu(_layer_norm(f, row(ROW_LNF_G), row(ROW_LNF_B)))
    fused = jnp.dot(f, mat_ref[MAT_WF2:MAT_WF2 + F, :],
                    preferred_element_type=jnp.float32) + row(ROW_BF2)

    out_ref[...] = _layer_norm(fused + aggregated,
                               row(ROW_ONORM_G), row(ROW_ONORM_B))


# ---------------------------------------------------------------------------
# host-side packing of the "natural" (PyTorch-layout) params into kernel inputs
# ---------------------------------------------------------------------------
def pack_params(p):
    F, H, HD, L = FEATURE_DIM, NUM_HEADS, HEAD_DIM, NUM_LAYERS

    vec_rows = [p["pe"], p["b_rob"], p["b_sen"]]
    for l in range(L):
        vec_rows += [p["out_b"][l], p["ln1_g"][l], p["ln1_b"][l],
                     p["b2"][l], p["ln2_g"][l], p["ln2_b"][l]]
    vec_rows += [p["tnorm_g"], p["tnorm_b"], p["bf1"], p["lnf_g"], p["lnf_b"],
                 p["bf2"], p["onorm_g"], p["onorm_b"]]
    vec_packed = jnp.concatenate(vec_rows, axis=0).astype(jnp.float32)     # [25, F]

    mat_packed = jnp.concatenate(
        [p["w_rob"], p["w_sen"], p["wf1"], p["wf2"]],
        axis=0).astype(jnp.float32)                                        # [240, F]

    def per_head(w):               # [F, F] -> [H, HD, F]
        return w.reshape(F, H, HD).transpose(1, 2, 0)

    wqkv, bqkv, wout = [], [], []
    for l in range(L):
        in_w = p["in_w"][l]                     # [F, 3F]
        in_b = p["in_b"][l][0]                  # [3F]
        wqkv.append(jnp.concatenate(
            [per_head(in_w[:, 0:F]),
             per_head(in_w[:, F:2 * F]),
             per_head(in_w[:, 2 * F:3 * F])], axis=0))                     # [3H, HD, F]
        bqkv.append(jnp.concatenate(
            [in_b[0:F].reshape(H, 1, HD),
             in_b[F:2 * F].reshape(H, 1, HD),
             in_b[2 * F:3 * F].reshape(H, 1, HD)], axis=0))                # [3H, 1, HD]
        wout.append(p["out_w"][l].reshape(H, HD, F))                       # [H, HD, F]
    wqkv = jnp.stack(wqkv)                                                 # [L, 3H, HD, F]
    bqkv = jnp.stack(bqkv)                                                 # [L, 3H, 1, HD]
    wout = jnp.stack(wout)                                                 # [L, H, HD, F]

    w1 = p["w1"]                                                           # [L, F, FF] bf16
    b1 = p["b1"]                                                           # [L, 1, FF] f32
    w2t = jnp.swapaxes(p["w2"], 1, 2)                                      # [L, F, FF] bf16

    # additive attention mask: seq-major row i belongs to batch (i % BATCH)
    ids = np.arange(BATCH * SEQ) % BATCH
    attn_bias = jnp.asarray(
        np.where(ids[:, None] == ids[None, :], 0.0, -1e30).astype(np.float32))

    return vec_packed, mat_packed, attn_bias, wqkv, bqkv, wout, w1, b1, w2t


def enhanced_attribute_forward(visual, roberta, sentence, params):
    inputs = (visual, roberta, sentence) + pack_params(params)
    vmem = pltpu.MemorySpace.VMEM
    return pl.pallas_call(
        enhanced_attr_kernel,
        out_shape=jax.ShapeDtypeStruct((BATCH, FEATURE_DIM), jnp.float32),
        in_specs=[pl.BlockSpec(memory_space=vmem)] * len(inputs),
        out_specs=pl.BlockSpec(memory_space=vmem),
        compiler_params=pltpu.CompilerParams(vmem_limit_bytes=8 << 20),
    )(*inputs)


# ---------------------------------------------------------------------------
# deterministic parameter construction (weights pre-transposed to [in, out])
# ---------------------------------------------------------------------------
def positional_encoding(d_model, max_len):
    pe = np.zeros((max_len, d_model), dtype=np.float32)
    position = np.arange(0, max_len, dtype=np.float32)[:, None]
    div_term = np.exp(np.arange(0, d_model, 2, dtype=np.float32)
                      * (-np.log(10000.0) / d_model))
    pe[:, 0::2] = np.sin(position * div_term)
    pe[:, 1::2] = np.cos(position * div_term)
    return jnp.asarray(pe)


def make_params(key):
    ks = iter(jax.random.split(key, 32))

    def rnd(shape, scale=0.05):
        return scale * jax.random.normal(next(ks), shape, dtype=jnp.float32)

    ones = lambda s: jnp.ones(s, dtype=jnp.float32)
    zeros = lambda s: jnp.zeros(s, dtype=jnp.float32)
    F, R, Sd, L, FF = FEATURE_DIM, ROBERTA_DIM, SENTENCE_DIM, NUM_LAYERS, FF_DIM
    return {
        "pe": positional_encoding(F, SEQ),
        "w_rob": rnd((R, F)), "b_rob": rnd((1, F)),
        "w_sen": rnd((Sd, F)), "b_sen": rnd((1, F)),
        "in_w": rnd((L, F, 3 * F)), "in_b": rnd((L, 1, 3 * F)),
        "out_w": rnd((L, F, F)), "out_b": rnd((L, 1, F)),
        "ln1_g": ones((L, 1, F)), "ln1_b": zeros((L, 1, F)),
        # FF weights stored in bf16 (both the kernel and the reference consume these
        # exact bf16-rounded values, upcast to f32 for the math).
        "w1": rnd((L, F, FF)).astype(jnp.bfloat16), "b1": rnd((L, 1, FF)),
        "w2": rnd((L, FF, F)).astype(jnp.bfloat16), "b2": rnd((L, 1, F)),
        "ln2_g": ones((L, 1, F)), "ln2_b": zeros((L, 1, F)),
        "tnorm_g": ones((1, F)), "tnorm_b": zeros((1, F)),
        "wf1": rnd((3 * F, F)), "bf1": rnd((1, F)),
        "lnf_g": ones((1, F)), "lnf_b": zeros((1, F)),
        "wf2": rnd((F, F)), "bf2": rnd((1, F)),
        "onorm_g": ones((1, F)), "onorm_b": zeros((1, F)),
    }


# ---------------------------------------------------------------------------
# pure-JAX reference (same math, independent formulation) for validation
# ---------------------------------------------------------------------------
def ref_forward(visual, roberta, sentence, p):
    B, F, S, H, HD = BATCH, FEATURE_DIM, SEQ, NUM_HEADS, HEAD_DIM

    def ln(x, g, b):
        mu = jnp.mean(x, axis=-1, keepdims=True)
        var = jnp.mean((x - mu) ** 2, axis=-1, keepdims=True)
        return (x - mu) * jax.lax.rsqrt(var + LN_EPS) * g + b

    gelu = lambda x: jax.nn.gelu(x, approximate=False)

    rob = roberta @ p["w_rob"] + p["b_rob"]
    sen = sentence @ p["w_sen"] + p["b_sen"]
    x = jnp.stack([visual, rob, sen], axis=1) + p["pe"][None]               # [B, S, F]

    for l in range(NUM_LAYERS):
        qkv = x @ p["in_w"][l] + p["in_b"][l]
        q, k, v = jnp.split(qkv, 3, axis=-1)
        sh = lambda t: t.reshape(B, S, H, HD).transpose(0, 2, 1, 3)
        qh, kh, vh = sh(q), sh(k), sh(v)
        scores = jnp.einsum("bhqd,bhkd->bhqk", qh, kh) / np.sqrt(HD)
        attnw = jax.nn.softmax(scores, axis=-1)
        a = jnp.einsum("bhqk,bhkd->bhqd", attnw, vh).transpose(0, 2, 1, 3).reshape(B, S, F)
        a = a @ p["out_w"][l] + p["out_b"][l]
        x = ln(x + a, p["ln1_g"][l], p["ln1_b"][l])
        ff = gelu(x @ p["w1"][l] + p["b1"][l]) @ p["w2"][l] + p["b2"][l]
        x = ln(x + ff, p["ln2_g"][l], p["ln2_b"][l])

    x = ln(x, p["tnorm_g"], p["tnorm_b"])
    aggregated = jnp.mean(x, axis=1)
    cat = jnp.concatenate([visual, rob, sen], axis=-1)
    f = gelu(ln(cat @ p["wf1"] + p["bf1"], p["lnf_g"], p["lnf_b"]))
    fused = f @ p["wf2"] + p["bf2"]
    return ln(fused + aggregated, p["onorm_g"], p["onorm_b"])


if __name__ == "__main__":
    key = jax.random.PRNGKey(0)
    k_v, k_r, k_s, k_p = jax.random.split(key, 4)
    visual = jax.random.normal(k_v, (BATCH, FEATURE_DIM), dtype=jnp.float32)
    roberta = jax.random.normal(k_r, (BATCH, ROBERTA_DIM), dtype=jnp.float32)
    sentence = jax.random.normal(k_s, (BATCH, SENTENCE_DIM), dtype=jnp.float32)
    params = make_params(k_p)

    out = jax.jit(enhanced_attribute_forward)(visual, roberta, sentence, params)
    out = jax.block_until_ready(out)

    ref = ref_forward(visual, roberta, sentence, params)
    assert out.shape == (BATCH, FEATURE_DIM) and out.dtype == jnp.float32
    np.testing.assert_allclose(np.asarray(out), np.asarray(ref), rtol=1e-4, atol=1e-4)
    print("KERNEL_OK")
</pallas_src>

<mosaic_0001>
module attributes {stable_mosaic.version = 11 : i64} {
  func.func @enhanced_attr_kernel(%arg0: memref<2x32xf32, #tpu.memory_space<vmem>>, %arg1: memref<2x64xf32, #tpu.memory_space<vmem>>, %arg2: memref<2x48xf32, #tpu.memory_space<vmem>>, %arg3: memref<25x32xf32, #tpu.memory_space<vmem>>, %arg4: memref<240x32xf32, #tpu.memory_space<vmem>>, %arg5: memref<6x6xf32, #tpu.memory_space<vmem>>, %arg6: memref<2x24x4x32xf32, #tpu.memory_space<vmem>>, %arg7: memref<2x24x1x4xf32, #tpu.memory_space<vmem>>, %arg8: memref<2x8x4x32xf32, #tpu.memory_space<vmem>>, %arg9: memref<2x32x2048xbf16, #tpu.memory_space<vmem>>, %arg10: memref<2x1x2048xf32, #tpu.memory_space<vmem>>, %arg11: memref<2x32x2048xbf16, #tpu.memory_space<vmem>>, %arg12: memref<2x32xf32, #tpu.memory_space<vmem>>) attributes {dimension_semantics = [], scalar_prefetch = 0 : i64, scratch_operands = 0 : i64, tpu.core_type = #tpu.core_type<tc>} {
    %c0 = arith.constant 0 : index
    %c0_0 = arith.constant 0 : index
    %0 = vector.load %arg0[%c0, %c0_0] : memref<2x32xf32, #tpu.memory_space<vmem>>, vector<2x32xf32>
    %c0_1 = arith.constant 0 : index
    %c0_2 = arith.constant 0 : index
    %1 = vector.load %arg1[%c0_1, %c0_2] : memref<2x64xf32, #tpu.memory_space<vmem>>, vector<2x64xf32>
    %c0_3 = arith.constant 0 : index
    %c0_4 = arith.constant 0 : index
    %2 = vector.load %arg4[%c0_3, %c0_4] : memref<240x32xf32, #tpu.memory_space<vmem>>, vector<64x32xf32>
    %cst = arith.constant dense<0.000000e+00> : vector<2x32xf32>
    %3 = tpu.matmul %1, %2, %cst {dimension_numbers = #tpu.dot_dimension_numbers<[1], [0], [0], [1], [0, 0, 1, 1], [], []>} : vector<2x64xf32>, vector<64x32xf32>, vector<2x32xf32> -> vector<2x32xf32>
    %c3 = arith.constant 3 : index
    %c0_5 = arith.constant 0 : index
    %4 = vector.load %arg3[%c3, %c0_5] : memref<25x32xf32, #tpu.memory_space<vmem>>, vector<1x32xf32>
    %5 = vector.broadcast %4 : vector<1x32xf32> to vector<2x32xf32>
    %6 = arith.addf %3, %5 : vector<2x32xf32>
    %c0_6 = arith.constant 0 : index
    %c0_7 = arith.constant 0 : index
    %7 = vector.load %arg2[%c0_6, %c0_7] : memref<2x48xf32, #tpu.memory_space<vmem>>, vector<2x48xf32>
    %c64 = arith.constant 64 : index
    %c0_8 = arith.constant 0 : index
    %8 = vector.load %arg4[%c64, %c0_8] : memref<240x32xf32, #tpu.memory_space<vmem>>, vector<48x32xf32>
    %cst_9 = arith.constant dense<0.000000e+00> : vector<2x32xf32>
    %9 = tpu.matmul %7, %8, %cst_9 {dimension_numbers = #tpu.dot_dimension_numbers<[1], [0], [0], [1], [0, 0, 1, 1], [], []>} : vector<2x48xf32>, vector<48x32xf32>, vector<2x32xf32> -> vector<2x32xf32>
    %c4 = arith.constant 4 : index
    %c0_10 = arith.constant 0 : index
    %10 = vector.load %arg3[%c4, %c0_10] : memref<25x32xf32, #tpu.memory_space<vmem>>, vector<1x32xf32>
    %11 = vector.broadcast %10 : vector<1x32xf32> to vector<2x32xf32>
    %12 = arith.addf %9, %11 : vector<2x32xf32>
    %c0_11 = arith.constant 0 : index
    %c0_12 = arith.constant 0 : index
    %13 = vector.load %arg3[%c0_11, %c0_12] : memref<25x32xf32, #tpu.memory_space<vmem>>, vector<1x32xf32>
    %14 = vector.broadcast %13 : vector<1x32xf32> to vector<2x32xf32>
    %15 = arith.addf %0, %14 : vector<2x32xf32>
    %c1 = arith.constant 1 : index
    %c0_13 = arith.constant 0 : index
    %16 = vector.load %arg3[%c1, %c0_13] : memref<25x32xf32, #tpu.memory_space<vmem>>, vector<1x32xf32>
    %17 = vector.broadcast %16 : vector<1x32xf32> to vector<2x32xf32>
    %18 = arith.addf %6, %17 : vector<2x32xf32>
    %c2 = arith.constant 2 : index
    %c0_14 = arith.constant 0 : index
    %19 = vector.load %arg3[%c2, %c0_14] : memref<25x32xf32, #tpu.memory_space<vmem>>, vector<1x32xf32>
    %20 = vector.broadcast %19 : vector<1x32xf32> to vector<2x32xf32>
    %21 = arith.addf %12, %20 : vector<2x32xf32>
    %22 = tpu.concatenate %15, %18, %21 in 0 : vector<2x32xf32>, vector<2x32xf32>, vector<2x32xf32> -> vector<6x32xf32>
    %c0_15 = arith.constant 0 : index
    %c0_16 = arith.constant 0 : index
    %23 = vector.load %arg5[%c0_15, %c0_16] : memref<6x6xf32, #tpu.memory_space<vmem>>, vector<6x6xf32>
    %24 = vector.shape_cast %22 : vector<6x32xf32> to vector<1x6x32xf32>
    %25 = vector.broadcast %24 : vector<1x6x32xf32> to vector<24x6x32xf32>
    %c0_17 = arith.constant 0 : index
    %c0_18 = arith.constant 0 : index
    %c0_19 = arith.constant 0 : index
    %c0_20 = arith.constant 0 : index
    %26 = vector.load %arg6[%c0_17, %c0_18, %c0_19, %c0_20] : memref<2x24x4x32xf32, #tpu.memory_space<vmem>>, vector<1x24x4x32xf32>
    %27 = vector.shape_cast %26 : vector<1x24x4x32xf32> to vector<24x4x32xf32>
    %cst_21 = arith.constant dense<0.000000e+00> : vector<24x6x4xf32>
    %28 = tpu.matmul %25, %27, %cst_21 {dimension_numbers = #tpu.dot_dimension_numbers<[2], [2], [1], [1], [0, 0, 0, 1, 1, 1], [0], [0]>} : vector<24x6x32xf32>, vector<24x4x32xf32>, vector<24x6x4xf32> -> vector<24x6x4xf32>
    %c0_22 = arith.constant 0 : index
    %c0_23 = arith.constant 0 : index
    %c0_24 = arith.constant 0 : index
    %c0_25 = arith.constant 0 : index
    %29 = vector.load %arg7[%c0_22, %c0_23, %c0_24, %c0_25] : memref<2x24x1x4xf32, #tpu.memory_space<vmem>>, vector<1x24x1x4xf32>
    %30 = vector.shape_cast %29 : vector<1x24x1x4xf32> to vector<24x1x4xf32>
    %31 = vector.broadcast %30 : vector<24x1x4xf32> to vector<24x6x4xf32>
    %32 = arith.addf %28, %31 : vector<24x6x4xf32>
    %33 = vector.extract_strided_slice %32 {offsets = [0, 0, 0], sizes = [8, 6, 4], strides = [1, 1, 1]} : vector<24x6x4xf32> to vector<8x6x4xf32>
    %34 = vector.extract_strided_slice %32 {offsets = [8, 0, 0], sizes = [8, 6, 4], strides = [1, 1, 1]} : vector<24x6x4xf32> to vector<8x6x4xf32>
    %35 = vector.extract_strided_slice %32 {offsets = [16, 0, 0], sizes = [8, 6, 4], strides = [1, 1, 1]} : vector<24x6x4xf32> to vector<8x6x4xf32>
    %cst_26 = arith.constant dense<0.000000e+00> : vector<8x6x6xf32>
    %36 = tpu.matmul %33, %34, %cst_26 {dimension_numbers = #tpu.dot_dimension_numbers<[2], [2], [1], [1], [0, 0, 0, 1, 1, 1], [0], [0]>} : vector<8x6x4xf32>, vector<8x6x4xf32>, vector<8x6x6xf32> -> vector<8x6x6xf32>
    %cst_27 = arith.constant 5.000000e-01 : f32
    %37 = vector.broadcast %cst_27 : f32 to vector<8x6x6xf32>
    %38 = arith.mulf %36, %37 : vector<8x6x6xf32>
    %39 = vector.shape_cast %23 : vector<6x6xf32> to vector<1x6x6xf32>
    %40 = vector.broadcast %39 : vector<1x6x6xf32> to vector<8x6x6xf32>
    %41 = arith.addf %38, %40 : vector<8x6x6xf32>
    %cst_28 = arith.constant dense<0xFF800000> : vector<8x6xf32>
    %42 = vector.multi_reduction <maximumf>, %41, %cst_28 [2] : vector<8x6x6xf32> to vector<8x6xf32>
    %43 = vector.shape_cast %42 : vector<8x6xf32> to vector<8x6x1xf32>
    %44 = vector.broadcast %43 : vector<8x6x1xf32> to vector<8x6x6xf32>
    %45 = arith.subf %41, %44 : vector<8x6x6xf32>
    %46 = math.exp %45 : vector<8x6x6xf32>
    %cst_29 = arith.constant dense<0.000000e+00> : vector<8x6xf32>
    %47 = vector.multi_reduction <add>, %46, %cst_29 [2] : vector<8x6x6xf32> to vector<8x6xf32>
    %48 = vector.shape_cast %47 : vector<8x6xf32> to vector<8x6x1xf32>
    %49 = vector.broadcast %48 : vector<8x6x1xf32> to vector<8x6x6xf32>
    %50 = arith.divf %46, %49 : vector<8x6x6xf32>
    %cst_30 = arith.constant dense<0.000000e+00> : vector<8x6x4xf32>
    %51 = tpu.matmul %50, %35, %cst_30 {dimension_numbers = #tpu.dot_dimension_numbers<[2], [1], [1], [2], [0, 0, 0, 1, 1, 2], [0], [0]>} : vector<8x6x6xf32>, vector<8x6x4xf32>, vector<8x6x4xf32> -> vector<8x6x4xf32>
    %c0_31 = arith.constant 0 : index
    %c0_32 = arith.constant 0 : index
    %c0_33 = arith.constant 0 : index
    %c0_34 = arith.constant 0 : index
    %52 = vector.load %arg8[%c0_31, %c0_32, %c0_33, %c0_34] : memref<2x8x4x32xf32, #tpu.memory_space<vmem>>, vector<1x8x4x32xf32>
    %53 = vector.shape_cast %52 : vector<1x8x4x32xf32> to vector<8x4x32xf32>
    %cst_35 = arith.constant dense<0.000000e+00> : vector<8x6x32xf32>
    %54 = tpu.matmul %51, %53, %cst_35 {dimension_numbers = #tpu.dot_dimension_numbers<[2], [1], [1], [2], [0, 0, 0, 1, 1, 2], [0], [0]>} : vector<8x6x4xf32>, vector<8x4x32xf32>, vector<8x6x32xf32> -> vector<8x6x32xf32>
    %cst_36 = arith.constant dense<0.000000e+00> : vector<6x32xf32>
    %55 = vector.multi_reduction <add>, %54, %cst_36 [0] : vector<8x6x32xf32> to vector<6x32xf32>
    %c5 = arith.constant 5 : index
    %c0_37 = arith.constant 0 : index
    %56 = vector.load %arg3[%c5, %c0_37] : memref<25x32xf32, #tpu.memory_space<vmem>>, vector<1x32xf32>
    %57 = vector.broadcast %56 : vector<1x32xf32> to vector<6x32xf32>
    %58 = arith.addf %55, %57 : vector<6x32xf32>
    %59 = arith.addf %22, %58 : vector<6x32xf32>
    %c6 = arith.constant 6 : index
    %c0_38 = arith.constant 0 : index
    %60 = vector.load %arg3[%c6, %c0_38] : memref<25x32xf32, #tpu.memory_space<vmem>>, vector<1x32xf32>
    %c7 = arith.constant 7 : index
    %c0_39 = arith.constant 0 : index
    %61 = vector.load %arg3[%c7, %c0_39] : memref<25x32xf32, #tpu.memory_space<vmem>>, vector<1x32xf32>
    %cst_40 = arith.constant dense<0.000000e+00> : vector<6xf32>
    %62 = vector.multi_reduction <add>, %59, %cst_40 [1] : vector<6x32xf32> to vector<6xf32>
    %63 = vector.shape_cast %62 : vector<6xf32> to vector<6x1xf32>
    %cst_41 = arith.constant 3.200000e+01 : f32
    %64 = vector.broadcast %cst_41 : f32 to vector<6x1xf32>
    %65 = arith.divf %63, %64 : vector<6x1xf32>
    %66 = vector.broadcast %65 : vector<6x1xf32> to vector<6x32xf32>
    %67 = arith.subf %59, %66 : vector<6x32xf32>
    %68 = arith.mulf %67, %67 : vector<6x32xf32>
    %cst_42 = arith.constant dense<0.000000e+00> : vector<6xf32>
    %69 = vector.multi_reduction <add>, %68, %cst_42 [1] : vector<6x32xf32> to vector<6xf32>
    %70 = vector.shape_cast %69 : vector<6xf32> to vector<6x1xf32>
    %cst_43 = arith.constant 3.200000e+01 : f32
    %71 = vector.broadcast %cst_43 : f32 to vector<6x1xf32>
    %72 = arith.divf %70, %71 : vector<6x1xf32>
    %cst_44 = arith.constant 9.99999974E-6 : f32
    %73 = vector.broadcast %cst_44 : f32 to vector<6x1xf32>
    %74 = arith.addf %72, %73 : vector<6x1xf32>
    %75 = math.rsqrt %74 : vector<6x1xf32>
    %76 = vector.broadcast %75 : vector<6x1xf32> to vector<6x32xf32>
    %77 = arith.mulf %67, %76 : vector<6x32xf32>
    %78 = vector.broadcast %60 : vector<1x32xf32> to vector<6x32xf32>
    %79 = arith.mulf %77, %78 : vector<6x32xf32>
    %80 = vector.broadcast %61 : vector<1x32xf32> to vector<6x32xf32>
    %81 = arith.addf %79, %80 : vector<6x32xf32>
    %c0_45 = arith.constant 0 : index
    %c0_46 = arith.constant 0 : index
    %c0_47 = arith.constant 0 : index
    %82 = vector.load %arg9[%c0_45, %c0_46, %c0_47] : memref<2x32x2048xbf16, #tpu.memory_space<vmem>>, vector<1x32x2048xbf16>
    %83 = vector.shape_cast %82 : vector<1x32x2048xbf16> to vector<32x2048xbf16>
    %84 = arith.extf %83 : vector<32x2048xbf16> to vector<32x2048xf32>
    %c0_48 = arith.constant 0 : index
    %c0_49 = arith.constant 0 : index
    %c0_50 = arith.constant 0 : index
    %85 = vector.load %arg11[%c0_48, %c0_49, %c0_50] : memref<2x32x2048xbf16, #tpu.memory_space<vmem>>, vector<1x32x2048xbf16>
    %86 = vector.shape_cast %85 : vector<1x32x2048xbf16> to vector<32x2048xbf16>
    %87 = arith.extf %86 : vector<32x2048xbf16> to vector<32x2048xf32>
    %cst_51 = arith.constant dense<0.000000e+00> : vector<6x2048xf32>
    %88 = tpu.matmul %81, %84, %cst_51 {dimension_numbers = #tpu.dot_dimension_numbers<[1], [0], [0], [1], [0, 0, 1, 1], [], []>} : vector<6x32xf32>, vector<32x2048xf32>, vector<6x2048xf32> -> vector<6x2048xf32>
    %c0_52 = arith.constant 0 : index
    %c0_53 = arith.constant 0 : index
    %c0_54 = arith.constant 0 : index
    %89 = vector.load %arg10[%c0_52, %c0_53, %c0_54] : memref<2x1x2048xf32, #tpu.memory_space<vmem>>, vector<1x1x2048xf32>
    %90 = vector.shape_cast %89 : vector<1x1x2048xf32> to vector<1x2048xf32>
    %91 = vector.broadcast %90 : vector<1x2048xf32> to vector<6x2048xf32>
    %92 = arith.addf %88, %91 : vector<6x2048xf32>
    %cst_55 = arith.constant 5.000000e-01 : f32
    %93 = vector.broadcast %cst_55 : f32 to vector<6x2048xf32>
    %94 = arith.mulf %93, %92 : vector<6x2048xf32>
    %cst_56 = arith.constant 0.707106769 : f32
    %95 = vector.broadcast %cst_56 : f32 to vector<6x2048xf32>
    %96 = arith.mulf %92, %95 : vector<6x2048xf32>
    %97 = math.erf %96 : vector<6x2048xf32>
    %cst_57 = arith.constant 1.000000e+00 : f32
    %98 = vector.broadcast %cst_57 : f32 to vector<6x2048xf32>
    %99 = arith.addf %98, %97 : vector<6x2048xf32>
    %100 = arith.mulf %94, %99 : vector<6x2048xf32>
    %cst_58 = arith.constant dense<0.000000e+00> : vector<6x32xf32>
    %101 = tpu.matmul %100, %87, %cst_58 {dimension_numbers = #tpu.dot_dimension_numbers<[1], [1], [0], [0], [0, 0, 1, 0], [], []>} : vector<6x2048xf32>, vector<32x2048xf32>, vector<6x32xf32> -> vector<6x32xf32>
    %c8 = arith.constant 8 : index
    %c0_59 = arith.constant 0 : index
    %102 = vector.load %arg3[%c8, %c0_59] : memref<25x32xf32, #tpu.memory_space<vmem>>, vector<1x32xf32>
    %103 = vector.broadcast %102 : vector<1x32xf32> to vector<6x32xf32>
    %104 = arith.addf %101, %103 : vector<6x32xf32>
    %105 = arith.addf %81, %104 : vector<6x32xf32>
    %c9 = arith.constant 9 : index
    %c0_60 = arith.constant 0 : index
    %106 = vector.load %arg3[%c9, %c0_60] : memref<25x32xf32, #tpu.memory_space<vmem>>, vector<1x32xf32>
    %c10 = arith.constant 10 : index
    %c0_61 = arith.constant 0 : index
    %107 = vector.load %arg3[%c10, %c0_61] : memref<25x32xf32, #tpu.memory_space<vmem>>, vector<1x32xf32>
    %cst_62 = arith.constant dense<0.000000e+00> : vector<6xf32>
    %108 = vector.multi_reduction <add>, %105, %cst_62 [1] : vector<6x32xf32> to vector<6xf32>
    %109 = vector.shape_cast %108 : vector<6xf32> to vector<6x1xf32>
    %cst_63 = arith.constant 3.200000e+01 : f32
    %110 = vector.broadcast %cst_63 : f32 to vector<6x1xf32>
    %111 = arith.divf %109, %110 : vector<6x1xf32>
    %112 = vector.broadcast %111 : vector<6x1xf32> to vector<6x32xf32>
    %113 = arith.subf %105, %112 : vector<6x32xf32>
    %114 = arith.mulf %113, %113 : vector<6x32xf32>
    %cst_64 = arith.constant dense<0.000000e+00> : vector<6xf32>
    %115 = vector.multi_reduction <add>, %114, %cst_64 [1] : vector<6x32xf32> to vector<6xf32>
    %116 = vector.shape_cast %115 : vector<6xf32> to vector<6x1xf32>
    %cst_65 = arith.constant 3.200000e+01 : f32
    %117 = vector.broadcast %cst_65 : f32 to vector<6x1xf32>
    %118 = arith.divf %116, %117 : vector<6x1xf32>
    %cst_66 = arith.constant 9.99999974E-6 : f32
    %119 = vector.broadcast %cst_66 : f32 to vector<6x1xf32>
    %120 = arith.addf %118, %119 : vector<6x1xf32>
    %121 = math.rsqrt %120 : vector<6x1xf32>
    %122 = vector.broadcast %121 : vector<6x1xf32> to vector<6x32xf32>
    %123 = arith.mulf %113, %122 : vector<6x32xf32>
    %124 = vector.broadcast %106 : vector<1x32xf32> to vector<6x32xf32>
    %125 = arith.mulf %123, %124 : vector<6x32xf32>
    %126 = vector.broadcast %107 : vector<1x32xf32> to vector<6x32xf32>
    %127 = arith.addf %125, %126 : vector<6x32xf32>
    %128 = vector.shape_cast %127 : vector<6x32xf32> to vector<1x6x32xf32>
    %129 = vector.broadcast %128 : vector<1x6x32xf32> to vector<24x6x32xf32>
    %c1_67 = arith.constant 1 : index
    %c0_68 = arith.constant 0 : index
    %c0_69 = arith.constant 0 : index
    %c0_70 = arith.constant 0 : index
    %130 = vector.load %arg6[%c1_67, %c0_68, %c0_69, %c0_70] : memref<2x24x4x32xf32, #tpu.memory_space<vmem>>, vector<1x24x4x32xf32>
    %131 = vector.shape_cast %130 : vector<1x24x4x32xf32> to vector<24x4x32xf32>
    %cst_71 = arith.constant dense<0.000000e+00> : vector<24x6x4xf32>
    %132 = tpu.matmul %129, %131, %cst_71 {dimension_numbers = #tpu.dot_dimension_numbers<[2], [2], [1], [1], [0, 0, 0, 1, 1, 1], [0], [0]>} : vector<24x6x32xf32>, vector<24x4x32xf32>, vector<24x6x4xf32> -> vector<24x6x4xf32>
    %c1_72 = arith.constant 1 : index
    %c0_73 = arith.constant 0 : index
    %c0_74 = arith.constant 0 : index
    %c0_75 = arith.constant 0 : index
    %133 = vector.load %arg7[%c1_72, %c0_73, %c0_74, %c0_75] : memref<2x24x1x4xf32, #tpu.memory_space<vmem>>, vector<1x24x1x4xf32>
    %134 = vector.shape_cast %133 : vector<1x24x1x4xf32> to vector<24x1x4xf32>
    %135 = vector.broadcast %134 : vector<24x1x4xf32> to vector<24x6x4xf32>
    %136 = arith.addf %132, %135 : vector<24x6x4xf32>
    %137 = vector.extract_strided_slice %136 {offsets = [0, 0, 0], sizes = [8, 6, 4], strides = [1, 1, 1]} : vector<24x6x4xf32> to vector<8x6x4xf32>
    %138 = vector.extract_strided_slice %136 {offsets = [8, 0, 0], sizes = [8, 6, 4], strides = [1, 1, 1]} : vector<24x6x4xf32> to vector<8x6x4xf32>
    %139 = vector.extract_strided_slice %136 {offsets = [16, 0, 0], sizes = [8, 6, 4], strides = [1, 1, 1]} : vector<24x6x4xf32> to vector<8x6x4xf32>
    %cst_76 = arith.constant dense<0.000000e+00> : vector<8x6x6xf32>
    %140 = tpu.matmul %137, %138, %cst_76 {dimension_numbers = #tpu.dot_dimension_numbers<[2], [2], [1], [1], [0, 0, 0, 1, 1, 1], [0], [0]>} : vector<8x6x4xf32>, vector<8x6x4xf32>, vector<8x6x6xf32> -> vector<8x6x6xf32>
    %cst_77 = arith.constant 5.000000e-01 : f32
    %141 = vector.broadcast %cst_77 : f32 to vector<8x6x6xf32>
    %142 = arith.mulf %140, %141 : vector<8x6x6xf32>
    %143 = vector.shape_cast %23 : vector<6x6xf32> to vector<1x6x6xf32>
    %144 = vector.broadcast %143 : vector<1x6x6xf32> to vector<8x6x6xf32>
    %145 = arith.addf %142, %144 : vector<8x6x6xf32>
    %cst_78 = arith.constant dense<0xFF800000> : vector<8x6xf32>
    %146 = vector.multi_reduction <maximumf>, %145, %cst_78 [2] : vector<8x6x6xf32> to vector<8x6xf32>
    %147 = vector.shape_cast %146 : vector<8x6xf32> to vector<8x6x1xf32>
    %148 = vector.broadcast %147 : vector<8x6x1xf32> to vector<8x6x6xf32>
    %149 = arith.subf %145, %148 : vector<8x6x6xf32>
    %150 = math.exp %149 : vector<8x6x6xf32>
    %cst_79 = arith.constant dense<0.000000e+00> : vector<8x6xf32>
    %151 = vector.multi_reduction <add>, %150, %cst_79 [2] : vector<8x6x6xf32> to vector<8x6xf32>
    %152 = vector.shape_cast %151 : vector<8x6xf32> to vector<8x6x1xf32>
    %153 = vector.broadcast %152 : vector<8x6x1xf32> to vector<8x6x6xf32>
    %154 = arith.divf %150, %153 : vector<8x6x6xf32>
    %cst_80 = arith.constant dense<0.000000e+00> : vector<8x6x4xf32>
    %155 = tpu.matmul %154, %139, %cst_80 {dimension_numbers = #tpu.dot_dimension_numbers<[2], [1], [1], [2], [0, 0, 0, 1, 1, 2], [0], [0]>} : vector<8x6x6xf32>, vector<8x6x4xf32>, vector<8x6x4xf32> -> vector<8x6x4xf32>
    %c1_81 = arith.constant 1 : index
    %c0_82 = arith.constant 0 : index
    %c0_83 = arith.constant 0 : index
    %c0_84 = arith.constant 0 : index
    %156 = vector.load %arg8[%c1_81, %c0_82, %c0_83, %c0_84] : memref<2x8x4x32xf32, #tpu.memory_space<vmem>>, vector<1x8x4x32xf32>
    %157 = vector.shape_cast %156 : vector<1x8x4x32xf32> to vector<8x4x32xf32>
    %cst_85 = arith.constant dense<0.000000e+00> : vector<8x6x32xf32>
    %158 = tpu.matmul %155, %157, %cst_85 {dimension_numbers = #tpu.dot_dimension_numbers<[2], [1], [1], [2], [0, 0, 0, 1, 1, 2], [0], [0]>} : vector<8x6x4xf32>, vector<8x4x32xf32>, vector<8x6x32xf32> -> vector<8x6x32xf32>
    %cst_86 = arith.constant dense<0.000000e+00> : vector<6x32xf32>
    %159 = vector.multi_reduction <add>, %158, %cst_86 [0] : vector<8x6x32xf32> to vector<6x32xf32>
    %c11 = arith.constant 11 : index
    %c0_87 = arith.constant 0 : index
    %160 = vector.load %arg3[%c11, %c0_87] : memref<25x32xf32, #tpu.memory_space<vmem>>, vector<1x32xf32>
    %161 = vector.broadcast %160 : vector<1x32xf32> to vector<6x32xf32>
    %162 = arith.addf %159, %161 : vector<6x32xf32>
    %163 = arith.addf %127, %162 : vector<6x32xf32>
    %c12 = arith.constant 12 : index
    %c0_88 = arith.constant 0 : index
    %164 = vector.load %arg3[%c12, %c0_88] : memref<25x32xf32, #tpu.memory_space<vmem>>, vector<1x32xf32>
    %c13 = arith.constant 13 : index
    %c0_89 = arith.constant 0 : index
    %165 = vector.load %arg3[%c13, %c0_89] : memref<25x32xf32, #tpu.memory_space<vmem>>, vector<1x32xf32>
    %cst_90 = arith.constant dense<0.000000e+00> : vector<6xf32>
    %166 = vector.multi_reduction <add>, %163, %cst_90 [1] : vector<6x32xf32> to vector<6xf32>
    %167 = vector.shape_cast %166 : vector<6xf32> to vector<6x1xf32>
    %cst_91 = arith.constant 3.200000e+01 : f32
    %168 = vector.broadcast %cst_91 : f32 to vector<6x1xf32>
    %169 = arith.divf %167, %168 : vector<6x1xf32>
    %170 = vector.broadcast %169 : vector<6x1xf32> to vector<6x32xf32>
    %171 = arith.subf %163, %170 : vector<6x32xf32>
    %172 = arith.mulf %171, %171 : vector<6x32xf32>
    %cst_92 = arith.constant dense<0.000000e+00> : vector<6xf32>
    %173 = vector.multi_reduction <add>, %172, %cst_92 [1] : vector<6x32xf32> to vector<6xf32>
    %174 = vector.shape_cast %173 : vector<6xf32> to vector<6x1xf32>
    %cst_93 = arith.constant 3.200000e+01 : f32
    %175 = vector.broadcast %cst_93 : f32 to vector<6x1xf32>
    %176 = arith.divf %174, %175 : vector<6x1xf32>
    %cst_94 = arith.constant 9.99999974E-6 : f32
    %177 = vector.broadcast %cst_94 : f32 to vector<6x1xf32>
    %178 = arith.addf %176, %177 : vector<6x1xf32>
    %179 = math.rsqrt %178 : vector<6x1xf32>
    %180 = vector.broadcast %179 : vector<6x1xf32> to vector<6x32xf32>
    %181 = arith.mulf %171, %180 : vector<6x32xf32>
    %182 = vector.broadcast %164 : vector<1x32xf32> to vector<6x32xf32>
    %183 = arith.mulf %181, %182 : vector<6x32xf32>
    %184 = vector.broadcast %165 : vector<1x32xf32> to vector<6x32xf32>
    %185 = arith.addf %183, %184 : vector<6x32xf32>
    %c1_95 = arith.constant 1 : index
    %c0_96 = arith.constant 0 : index
    %c0_97 = arith.constant 0 : index
    %186 = vector.load %arg9[%c1_95, %c0_96, %c0_97] : memref<2x32x2048xbf16, #tpu.memory_space<vmem>>, vector<1x32x2048xbf16>
    %187 = vector.shape_cast %186 : vector<1x32x2048xbf16> to vector<32x2048xbf16>
    %188 = arith.extf %187 : vector<32x2048xbf16> to vector<32x2048xf32>
    %c1_98 = arith.constant 1 : index
    %c0_99 = arith.constant 0 : index
    %c0_100 = arith.constant 0 : index
    %189 = vector.load %arg11[%c1_98, %c0_99, %c0_100] : memref<2x32x2048xbf16, #tpu.memory_space<vmem>>, vector<1x32x2048xbf16>
    %190 = vector.shape_cast %189 : vector<1x32x2048xbf16> to vector<32x2048xbf16>
    %191 = arith.extf %190 : vector<32x2048xbf16> to vector<32x2048xf32>
    %cst_101 = arith.constant dense<0.000000e+00> : vector<6x2048xf32>
    %192 = tpu.matmul %185, %188, %cst_101 {dimension_numbers = #tpu.dot_dimension_numbers<[1], [0], [0], [1], [0, 0, 1, 1], [], []>} : vector<6x32xf32>, vector<32x2048xf32>, vector<6x2048xf32> -> vector<6x2048xf32>
    %c1_102 = arith.constant 1 : index
    %c0_103 = arith.constant 0 : index
    %c0_104 = arith.constant 0 : index
    %193 = vector.load %arg10[%c1_102, %c0_103, %c0_104] : memref<2x1x2048xf32, #tpu.memory_space<vmem>>, vector<1x1x2048xf32>
    %194 = vector.shape_cast %193 : vector<1x1x2048xf32> to vector<1x2048xf32>
    %195 = vector.broadcast %194 : vector<1x2048xf32> to vector<6x2048xf32>
    %196 = arith.addf %192, %195 : vector<6x2048xf32>
    %cst_105 = arith.constant 5.000000e-01 : f32
    %197 = vector.broadcast %cst_105 : f32 to vector<6x2048xf32>
    %198 = arith.mulf %197, %196 : vector<6x2048xf32>
    %cst_106 = arith.constant 0.707106769 : f32
    %199 = vector.broadcast %cst_106 : f32 to vector<6x2048xf32>
    %200 = arith.mulf %196, %199 : vector<6x2048xf32>
    %201 = math.erf %200 : vector<6x2048xf32>
    %cst_107 = arith.constant 1.000000e+00 : f32
    %202 = vector.broadcast %cst_107 : f32 to vector<6x2048xf32>
    %203 = arith.addf %202, %201 : vector<6x2048xf32>
    %204 = arith.mulf %198, %203 : vector<6x2048xf32>
    %cst_108 = arith.constant dense<0.000000e+00> : vector<6x32xf32>
    %205 = tpu.matmul %204, %191, %cst_108 {dimension_numbers = #tpu.dot_dimension_numbers<[1], [1], [0], [0], [0, 0, 1, 0], [], []>} : vector<6x2048xf32>, vector<32x2048xf32>, vector<6x32xf32> -> vector<6x32xf32>
    %c14 = arith.constant 14 : index
    %c0_109 = arith.constant 0 : index
    %206 = vector.load %arg3[%c14, %c0_109] : memref<25x32xf32, #tpu.memory_space<vmem>>, vector<1x32xf32>
    %207 = vector.broadcast %206 : vector<1x32xf32> to vector<6x32xf32>
    %208 = arith.addf %205, %207 : vector<6x32xf32>
    %209 = arith.addf %185, %208 : vector<6x32xf32>
    %c15 = arith.constant 15 : index
    %c0_110 = arith.constant 0 : index
    %210 = vector.load %arg3[%c15, %c0_110] : memref<25x32xf32, #tpu.memory_space<vmem>>, vector<1x32xf32>
    %c16 = arith.constant 16 : index
    %c0_111 = arith.constant 0 : index
    %211 = vector.load %arg3[%c16, %c0_111] : memref<25x32xf32, #tpu.memory_space<vmem>>, vector<1x32xf32>
    %cst_112 = arith.constant dense<0.000000e+00> : vector<6xf32>
    %212 = vector.multi_reduction <add>, %209, %cst_112 [1] : vector<6x32xf32> to vector<6xf32>
    %213 = vector.shape_cast %212 : vector<6xf32> to vector<6x1xf32>
    %cst_113 = arith.constant 3.200000e+01 : f32
    %214 = vector.broadcast %cst_113 : f32 to vector<6x1xf32>
    %215 = arith.divf %213, %214 : vector<6x1xf32>
    %216 = vector.broadcast %215 : vector<6x1xf32> to vector<6x32xf32>
    %217 = arith.subf %209, %216 : vector<6x32xf32>
    %218 = arith.mulf %217, %217 : vector<6x32xf32>
    %cst_114 = arith.constant dense<0.000000e+00> : vector<6xf32>
    %219 = vector.multi_reduction <add>, %218, %cst_114 [1] : vector<6x32xf32> to vector<6xf32>
    %220 = vector.shape_cast %219 : vector<6xf32> to vector<6x1xf32>
    %cst_115 = arith.constant 3.200000e+01 : f32
    %221 = vector.broadcast %cst_115 : f32 to vector<6x1xf32>
    %222 = arith.divf %220, %221 : vector<6x1xf32>
    %cst_116 = arith.constant 9.99999974E-6 : f32
    %223 = vector.broadcast %cst_116 : f32 to vector<6x1xf32>
    %224 = arith.addf %222, %223 : vector<6x1xf32>
    %225 = math.rsqrt %224 : vector<6x1xf32>
    %226 = vector.broadcast %225 : vector<6x1xf32> to vector<6x32xf32>
    %227 = arith.mulf %217, %226 : vector<6x32xf32>
    %228 = vector.broadcast %210 : vector<1x32xf32> to vector<6x32xf32>
    %229 = arith.mulf %227, %228 : vector<6x32xf32>
    %230 = vector.broadcast %211 : vector<1x32xf32> to vector<6x32xf32>
    %231 = arith.addf %229, %230 : vector<6x32xf32>
    %c17 = arith.constant 17 : index
    %c0_117 = arith.constant 0 : index
    %232 = vector.load %arg3[%c17, %c0_117] : memref<25x32xf32, #tpu.memory_space<vmem>>, vector<1x32xf32>
    %c18 = arith.constant 18 : index
    %c0_118 = arith.constant 0 : index
    %233 = vector.load %arg3[%c18, %c0_118] : memref<25x32xf32, #tpu.memory_space<vmem>>, vector<1x32xf32>
    %cst_119 = arith.constant dense<0.000000e+00> : vector<6xf32>
    %234 = vector.multi_reduction <add>, %231, %cst_119 [1] : vector<6x32xf32> to vector<6xf32>
    %235 = vector.shape_cast %234 : vector<6xf32> to vector<6x1xf32>
    %cst_120 = arith.constant 3.200000e+01 : f32
    %236 = vector.broadcast %cst_120 : f32 to vector<6x1xf32>
    %237 = arith.divf %235, %236 : vector<6x1xf32>
    %238 = vector.broadcast %237 : vector<6x1xf32> to vector<6x32xf32>
    %239 = arith.subf %231, %238 : vector<6x32xf32>
    %240 = arith.mulf %239, %239 : vector<6x32xf32>
    %cst_121 = arith.constant dense<0.000000e+00> : vector<6xf32>
    %241 = vector.multi_reduction <add>, %240, %cst_121 [1] : vector<6x32xf32> to vector<6xf32>
    %242 = vector.shape_cast %241 : vector<6xf32> to vector<6x1xf32>
    %cst_122 = arith.constant 3.200000e+01 : f32
    %243 = vector.broadcast %cst_122 : f32 to vector<6x1xf32>
    %244 = arith.divf %242, %243 : vector<6x1xf32>
    %cst_123 = arith.constant 9.99999974E-6 : f32
    %245 = vector.broadcast %cst_123 : f32 to vector<6x1xf32>
    %246 = arith.addf %244, %245 : vector<6x1xf32>
    %247 = math.rsqrt %246 : vector<6x1xf32>
    %248 = vector.broadcast %247 : vector<6x1xf32> to vector<6x32xf32>
    %249 = arith.mulf %239, %248 : vector<6x32xf32>
    %250 = vector.broadcast %232 : vector<1x32xf32> to vector<6x32xf32>
    %251 = arith.mulf %249, %250 : vector<6x32xf32>
    %252 = vector.broadcast %233 : vector<1x32xf32> to vector<6x32xf32>
    %253 = arith.addf %251, %252 : vector<6x32xf32>
    %254 = vector.extract_strided_slice %253 {offsets = [0, 0], sizes = [2, 32], strides = [1, 1]} : vector<6x32xf32> to vector<2x32xf32>
    %255 = vector.extract_strided_slice %253 {offsets = [2, 0], sizes = [2, 32], strides = [1, 1]} : vector<6x32xf32> to vector<2x32xf32>
    %256 = arith.addf %254, %255 : vector<2x32xf32>
    %257 = vector.extract_strided_slice %253 {offsets = [4, 0], sizes = [2, 32], strides = [1, 1]} : vector<6x32xf32> to vector<2x32xf32>
    %258 = arith.addf %256, %257 : vector<2x32xf32>
    %cst_124 = arith.constant 3.000000e+00 : f32
    %259 = vector.broadcast %cst_124 : f32 to vector<2x32xf32>
    %260 = arith.divf %258, %259 : vector<2x32xf32>
    %c112 = arith.constant 112 : index
    %c0_125 = arith.constant 0 : index
    %261 = vector.load %arg4[%c112, %c0_125] : memref<240x32xf32, #tpu.memory_space<vmem>>, vector<32x32xf32>
    %cst_126 = arith.constant dense<0.000000e+00> : vector<2x32xf32>
    %262 = tpu.matmul %0, %261, %cst_126 {dimension_numbers = #tpu.dot_dimension_numbers<[1], [0], [0], [1], [0, 0, 1, 1], [], []>} : vector<2x32xf32>, vector<32x32xf32>, vector<2x32xf32> -> vector<2x32xf32>
    %c144 = arith.constant 144 : index
    %c0_127 = arith.constant 0 : index
    %263 = vector.load %arg4[%c144, %c0_127] : memref<240x32xf32, #tpu.memory_space<vmem>>, vector<32x32xf32>
    %cst_128 = arith.constant dense<0.000000e+00> : vector<2x32xf32>
    %264 = tpu.matmul %6, %263, %cst_128 {dimension_numbers = #tpu.dot_dimension_numbers<[1], [0], [0], [1], [0, 0, 1, 1], [], []>} : vector<2x32xf32>, vector<32x32xf32>, vector<2x32xf32> -> vector<2x32xf32>
    %265 = arith.addf %262, %264 : vector<2x32xf32>
    %c176 = arith.constant 176 : index
    %c0_129 = arith.constant 0 : index
    %266 = vector.load %arg4[%c176, %c0_129] : memref<240x32xf32, #tpu.memory_space<vmem>>, vector<32x32xf32>
    %cst_130 = arith.constant dense<0.000000e+00> : vector<2x32xf32>
    %267 = tpu.matmul %12, %266, %cst_130 {dimension_numbers = #tpu.dot_dimension_numbers<[1], [0], [0], [1], [0, 0, 1, 1], [], []>} : vector<2x32xf32>, vector<32x32xf32>, vector<2x32xf32> -> vector<2x32xf32>
    %268 = arith.addf %265, %267 : vector<2x32xf32>
    %c19 = arith.constant 19 : index
    %c0_131 = arith.constant 0 : index
    %269 = vector.load %arg3[%c19, %c0_131] : memref<25x32xf32, #tpu.memory_space<vmem>>, vector<1x32xf32>
    %270 = vector.broadcast %269 : vector<1x32xf32> to vector<2x32xf32>
    %271 = arith.addf %268, %270 : vector<2x32xf32>
    %c20 = arith.constant 20 : index
    %c0_132 = arith.constant 0 : index
    %272 = vector.load %arg3[%c20, %c0_132] : memref<25x32xf32, #tpu.memory_space<vmem>>, vector<1x32xf32>
    %c21 = arith.constant 21 : index
    %c0_133 = arith.constant 0 : index
    %273 = vector.load %arg3[%c21, %c0_133] : memref<25x32xf32, #tpu.memory_space<vmem>>, vector<1x32xf32>
    %cst_134 = arith.constant dense<0.000000e+00> : vector<2xf32>
    %274 = vector.multi_reduction <add>, %271, %cst_134 [1] : vector<2x32xf32> to vector<2xf32>
    %275 = vector.shape_cast %274 : vector<2xf32> to vector<2x1xf32>
    %cst_135 = arith.constant 3.200000e+01 : f32
    %276 = vector.broadcast %cst_135 : f32 to vector<2x1xf32>
    %277 = arith.divf %275, %276 : vector<2x1xf32>
    %278 = vector.broadcast %277 : vector<2x1xf32> to vector<2x32xf32>
    %279 = arith.subf %271, %278 : vector<2x32xf32>
    %280 = arith.mulf %279, %279 : vector<2x32xf32>
    %cst_136 = arith.constant dense<0.000000e+00> : vector<2xf32>
    %281 = vector.multi_reduction <add>, %280, %cst_136 [1] : vector<2x32xf32> to vector<2xf32>
    %282 = vector.shape_cast %281 : vector<2xf32> to vector<2x1xf32>
    %cst_137 = arith.constant 3.200000e+01 : f32
    %283 = vector.broadcast %cst_137 : f32 to vector<2x1xf32>
    %284 = arith.divf %282, %283 : vector<2x1xf32>
    %cst_138 = arith.constant 9.99999974E-6 : f32
    %285 = vector.broadcast %cst_138 : f32 to vector<2x1xf32>
    %286 = arith.addf %284, %285 : vector<2x1xf32>
    %287 = math.rsqrt %286 : vector<2x1xf32>
    %288 = vector.broadcast %287 : vector<2x1xf32> to vector<2x32xf32>
    %289 = arith.mulf %279, %288 : vector<2x32xf32>
    %290 = vector.broadcast %272 : vector<1x32xf32> to vector<2x32xf32>
    %291 = arith.mulf %289, %290 : vector<2x32xf32>
    %292 = vector.broadcast %273 : vector<1x32xf32> to vector<2x32xf32>
    %293 = arith.addf %291, %292 : vector<2x32xf32>
    %cst_139 = arith.constant 5.000000e-01 : f32
    %294 = vector.broadcast %cst_139 : f32 to vector<2x32xf32>
    %295 = arith.mulf %294, %293 : vector<2x32xf32>
    %cst_140 = arith.constant 0.707106769 : f32
    %296 = vector.broadcast %cst_140 : f32 to vector<2x32xf32>
    %297 = arith.mulf %293, %296 : vector<2x32xf32>
    %298 = math.erf %297 : vector<2x32xf32>
    %cst_141 = arith.constant 1.000000e+00 : f32
    %299 = vector.broadcast %cst_141 : f32 to vector<2x32xf32>
    %300 = arith.addf %299, %298 : vector<2x32xf32>
    %301 = arith.mulf %295, %300 : vector<2x32xf32>
    %c208 = arith.constant 208 : index
    %c0_142 = arith.constant 0 : index
    %302 = vector.load %arg4[%c208, %c0_142] : memref<240x32xf32, #tpu.memory_space<vmem>>, vector<32x32xf32>
    %cst_143 = arith.constant dense<0.000000e+00> : vector<2x32xf32>
    %303 = tpu.matmul %301, %302, %cst_143 {dimension_numbers = #tpu.dot_dimension_numbers<[1], [0], [0], [1], [0, 0, 1, 1], [], []>} : vector<2x32xf32>, vector<32x32xf32>, vector<2x32xf32> -> vector<2x32xf32>
    %c22 = arith.constant 22 : index
    %c0_144 = arith.constant 0 : index
    %304 = vector.load %arg3[%c22, %c0_144] : memref<25x32xf32, #tpu.memory_space<vmem>>, vector<1x32xf32>
    %305 = vector.broadcast %304 : vector<1x32xf32> to vector<2x32xf32>
    %306 = arith.addf %303, %305 : vector<2x32xf32>
    %307 = arith.addf %306, %260 : vector<2x32xf32>
    %c23 = arith.constant 23 : index
    %c0_145 = arith.constant 0 : index
    %308 = vector.load %arg3[%c23, %c0_145] : memref<25x32xf32, #tpu.memory_space<vmem>>, vector<1x32xf32>
    %c24 = arith.constant 24 : index
    %c0_146 = arith.constant 0 : index
    %309 = vector.load %arg3[%c24, %c0_146] : memref<25x32xf32, #tpu.memory_space<vmem>>, vector<1x32xf32>
    %cst_147 = arith.constant dense<0.000000e+00> : vector<2xf32>
    %310 = vector.multi_reduction <add>, %307, %cst_147 [1] : vector<2x32xf32> to vector<2xf32>
    %311 = vector.shape_cast %310 : vector<2xf32> to vector<2x1xf32>
    %cst_148 = arith.constant 3.200000e+01 : f32
    %312 = vector.broadcast %cst_148 : f32 to vector<2x1xf32>
    %313 = arith.divf %311, %312 : vector<2x1xf32>
    %314 = vector.broadcast %313 : vector<2x1xf32> to vector<2x32xf32>
    %315 = arith.subf %307, %314 : vector<2x32xf32>
    %316 = arith.mulf %315, %315 : vector<2x32xf32>
    %cst_149 = arith.constant dense<0.000000e+00> : vector<2xf32>
    %317 = vector.multi_reduction <add>, %316, %cst_149 [1] : vector<2x32xf32> to vector<2xf32>
    %318 = vector.shape_cast %317 : vector<2xf32> to vector<2x1xf32>
    %cst_150 = arith.constant 3.200000e+01 : f32
    %319 = vector.broadcast %cst_150 : f32 to vector<2x1xf32>
    %320 = arith.divf %318, %319 : vector<2x1xf32>
    %cst_151 = arith.constant 9.99999974E-6 : f32
    %321 = vector.broadcast %cst_151 : f32 to vector<2x1xf32>
    %322 = arith.addf %320, %321 : vector<2x1xf32>
    %323 = math.rsqrt %322 : vector<2x1xf32>
    %324 = vector.broadcast %323 : vector<2x1xf32> to vector<2x32xf32>
    %325 = arith.mulf %315, %324 : vector<2x32xf32>
    %326 = vector.broadcast %308 : vector<1x32xf32> to vector<2x32xf32>
    %327 = arith.mulf %325, %326 : vector<2x32xf32>
    %328 = vector.broadcast %309 : vector<1x32xf32> to vector<2x32xf32>
    %329 = arith.addf %327, %328 : vector<2x32xf32>
    %c0_152 = arith.constant 0 : index
    %c0_153 = arith.constant 0 : index
    %330 = vector.load %arg12[%c0_152, %c0_153] : memref<2x32xf32, #tpu.memory_space<vmem>>, vector<2x32xf32>
    tpu.vector_store %arg12[%c0_152, %c0_153], %329 {strides = array<i32>} : memref<2x32xf32, #tpu.memory_space<vmem>>, vector<2x32xf32>,
    return
  }
}

</mosaic_0001>

<bundles_post_ra>
// kernel: enhanced_attribute_forward.1
= control target key start
LH: loop header
LB: loop body
LE: loop exit
PB: predicated region body
PF: predicated region fallthrough
CT: control target
= control target key end

     0   :  { %v12947_v2 = vmov 0.0   ;;  %s14903_s0 = inlined_call_operand.vmem [shape: f32[2,32], index: 0, kind: input, shape index: {}]   ;;  %s14904_s1 = inlined_call_operand.vmem [shape: f32[2,64], index: 1, kind: input, shape index: {}]   ;;  %s14905_s2 = inlined_call_operand.vmem [shape: f32[2,48], index: 2, kind: input, shape index: {}]   ;;  %s14906_s3 = inlined_call_operand.vmem [shape: f32[25,32], index: 3, kind: input, shape index: {}]   ;;  %s14907_s4 = inlined_call_operand.vmem [shape: f32[240,32], index: 4, kind: input, shape index: {}]   ;;  %s14908_s5 = inlined_call_operand.vmem [shape: f32[6,6], index: 5, kind: input, shape index: {}]   ;;  %s14909_s6 = inlined_call_operand.vmem [shape: f32[2,24,4,32], index: 6, kind: input, shape index: {}]   ;;  %s14910_s7 = inlined_call_operand.vmem [shape: f32[2,24,1,4], index: 7, kind: input, shape index: {}]   ;;  %s14911_s8 = inlined_call_operand.vmem [shape: f32[2,8,4,32], index: 8, kind: input, shape index: {}]   ;;  %s14912_s9 = inlined_call_operand.vmem [shape: bf16[2,32,2048], index: 9, kind: input, shape index: {}]   ;;  %s14913_s10 = inlined_call_operand.vmem [shape: f32[2,1,2048], index: 10, kind: input, shape index: {}]   ;;  %s14914_s11 = inlined_call_operand.vmem [shape: bf16[2,32,2048], index: 11, kind: input, shape index: {}]   ;;  %s14915_s12 = inlined_call_operand.hbm [shape: f32[2,32], index: 12, kind: output, shape index: {}]  }
   0x1   :  { %v51_v0 = vld [vmem:[%s14907_s4 + $0x38] sm:$0xff]  ;;  %v137_v1 = vld [vmem:[%s14907_s4 + $0x68] sm:$0xff]  ;;  %12218 = vmatprep.subr.mxu0 %v12947_v2  ;;  %v50_v3 = vld [vmem:[%s14907_s4 + $0x30] sm:$0xff]  ;;  %12237 = vmatprep.subr.mxu1 %v12947_v2 }
   0x2   :  { %v136_v4 = vld [vmem:[%s14907_s4 + $0x60] sm:$0xff]  ;;  %12219 = vmatpush3.msra.mxu0 %v51_v0  ;;  %12238 = vmatpush3.msra.mxu1 %v137_v1  ;;  %v49_v5 = vld [vmem:[%s14907_s4 + $0x28] sm:$0xff]  ;;  %v135_v6 = vld [vmem:[%s14907_s4 + $0x58] sm:$0xff] }
   0x3   :  { %12220 = vmatprep.subr.mxu0 %v12947_v2  ;;  %12239 = vmatprep.subr.mxu1 %v12947_v2  ;;  %v48_v7 = vld [vmem:[%s14907_s4 + $0x20] sm:$0xff]  ;;  %v134_v8 = vld [vmem:[%s14907_s4 + $0x50] sm:$0xff] }
   0x4   :  { %12221 = vmatpush3.msra.mxu0 %v50_v3  ;;  %12240 = vmatpush3.msra.mxu1 %v136_v4 }
   0x5   :  { %12222 = vmatprep.subr.mxu0 %v12947_v2  ;;  %12241 = vmatprep.subr.mxu1 %v12947_v2 }
   0x6   :  { %17 = vsyncpa [#allocation3], 0  ;;  %12223 = vmatpush3.msra.mxu0 %v49_v5  ;;  %12242 = vmatpush3.msra.mxu1 %v135_v6  ;;  %v47_v9 = vld [vmem:[%s14907_s4 + $0x18] sm:$0xff]  ;;  %v133_v10 = vld [vmem:[%s14907_s4 + $0x48] sm:$0xff]  ;;  %vm143_vm0 = vcmask 392192   ;;  %vm12948_vm1 = vmmov 0  }
   0x7   :  { %12224 = vmatprep.subr.mxu0 %v12947_v2  ;;  %12243 = vmatprep.subr.mxu1 %v12947_v2  ;;  %v46_v11 = vld [vmem:[%s14907_s4 + $0x10] sm:$0xff]  ;;  %v132_v12 = vld [vmem:[%s14907_s4 + $0x40] sm:$0xff]  ;;  %v45_v13 = vld [vmem:[%s14907_s4 + $0x8] sm:$0xff]  ;;  %vm57_vm2 = vcmask 523264   ;;  %vm438_vm3 = vcmask 261120   ;;  %vm241_vm4 = vcmask 1041408  }
   0x8   :  { %12225 = vmatpush3.msra.mxu0 %v48_v7  ;;  %12244 = vmatpush3.msra.mxu1 %v134_v8  ;;  %v131_v14 = vld [vmem:[%s14905_s2] sm:$0x3]  ;;  %v247_v18 = vld [vmem:[%s14909_s6 + $0x4] sm:$0xf]  ;;  %v11587_v21 = vld [vmem:[%s14906_s3 + $0x2] ss:$0 sm:$0xff] }
   0x9   :  { %12226 = vmatprep.subr.mxu0 %v12947_v2  ;;  %12245 = vmatprep.subr.mxu1 %v12947_v2  ;;  %v44_v15 = vld [vmem:[%s14907_s4] sm:$0xff]  ;;  %vm243_vm5 = vcmask 1043456   ;;  %v248_v37 = vld [vmem:[%s14909_s6 + $0x8] sm:$0xf]  ;;  %v249_v38 = vld [vmem:[%s14909_s6 + $0xc] sm:$0xf] }
   0xa   :  { %12227 = vmatpush3.msra.mxu0 %v47_v9  ;;  %12246 = vmatpush3.msra.mxu1 %v133_v10  ;;  %v43_v16 = vld [vmem:[%s14904_s1] sm:$0x3]  ;;  %v11583_v19 = vld [vmem:[%s14906_s3 + $0x4] ss:$0 sm:$0xff]  ;;  %v11581_v22 = vld [vmem:[%s14906_s3 + $0x3] ss:$0 sm:$0xff] }
   0xb   :  { %12228 = vmatprep.subr.mxu0 %v12947_v2  ;;  %12247 = vmatprep.subr.mxu1 %v12947_v2  ;;  %v246_v17 = vld [vmem:[%s14909_s6] sm:$0xf]  ;;  %v250_v40 = vld [vmem:[%s14909_s6 + $0x10] sm:$0xf]  ;;  %v251_v41 = vld [vmem:[%s14909_s6 + $0x14] sm:$0xf] }
   0xc   :  { %12229 = vmatpush3.msra.mxu0 %v46_v11  ;;  %12248 = vmatpush3.msra.mxu1 %v132_v12  ;;  %v42_v24 = vld [vmem:[%s14903_s0] sm:$0x3]  ;;  %v252_v42 = vld [vmem:[%s14909_s6 + $0x18] sm:$0xf]  ;;  %v253_v43 = vld [vmem:[%s14909_s6 + $0x1c] sm:$0xf] }
   0xd   :  { %12230 = vmatprep.subr.mxu0 %v12947_v2  ;;  %12249 = vmatprep.mubr.msk.f32.mxu1 %vm12948_vm1, %v12947_v2  ;;  %v11585_v26 = vld [vmem:[%s14906_s3] ss:$0 sm:$0xff]  ;;  %v11586_v27 = vld [vmem:[%s14906_s3 + $0x1] ss:$0 sm:$0xff]  ;;  %v255_v45 = vld [vmem:[%s14909_s6 + $0x24] sm:$0xf] }
   0xe   :  { %12231 = vmatpush3.msra.mxu0 %v45_v13  ;;  %12234 = vmatprep.mubr.msk.f32.mxu0 %vm12948_vm1, %v12947_v2  ;;  %v222_v32 = vadd.f32 %v11585_v26, %v42_v24  ;;  %v254_v44 = vld [vmem:[%s14909_s6 + $0x20] sm:$0xf]  ;;  %v256_v46 = vld [vmem:[%s14909_s6 + $0x28] sm:$0xf]  ;;  %v257_v47 = vld [vmem:[%s14909_s6 + $0x2c] sm:$0xf] }
   0xf   :  { %12232 = vmatprep.subr.mxu0 %v12947_v2  ;;  %12250 = vmatmul.mubr.msk.f32.vlgmr.msra.gmra.mxu1 %vm143_vm0, %v131_v14  ;;  %v258_v48 = vld [vmem:[%s14909_s6 + $0x30] sm:$0xf]  ;;  %v259_v49 = vld [vmem:[%s14909_s6 + $0x34] sm:$0xf]  ;;  %v260_v50 = vld [vmem:[%s14909_s6 + $0x38] sm:$0xf] }
  0x10   :  { %12233 = vmatpush3.msra.mxu0 %v44_v15  ;;  %12252 = vmatprep.subr.mxu1 %v12947_v2  ;;  %v261_v51 = vld [vmem:[%s14909_s6 + $0x3c] sm:$0xf]  ;;  %v262_v52 = vld [vmem:[%s14909_s6 + $0x40] sm:$0xf]  ;;  %v263_v53 = vld [vmem:[%s14909_s6 + $0x44] sm:$0xf] }
  0x11   :  { %12235 = vmatmul.mubr.msk.f32.vlgmr.msra.gmra.mxu0 %vm57_vm2, %v43_v16  ;;  %12257 = vmatprep.subr.mxu0 %v12947_v2  ;;  %v264_v54 = vld [vmem:[%s14909_s6 + $0x48] sm:$0xf]  ;;  %v265_v55 = vld [vmem:[%s14909_s6 + $0x4c] sm:$0xf]  ;;  %v266_v56 = vld [vmem:[%s14909_s6 + $0x50] sm:$0xf] }
  0x12   :  { %12254 = vmatprep.mubr.msk.f32.mxu1 %vm12948_vm1, %v12947_v2  ;;  %12259 = vmatprep.mubr.msk.f32.mxu0 %vm12948_vm1, %v12947_v2  ;;  %v267_v57 = vld [vmem:[%s14909_s6 + $0x54] sm:$0xf]  ;;  %v268_v58 = vld [vmem:[%s14909_s6 + $0x58] sm:$0xf]  ;;  %v269_v59 = vld [vmem:[%s14909_s6 + $0x5c] sm:$0xf] }
  0x13   :  { %12253 = vmatpush3.xpose.msk.msra.mxu1 %vm438_vm3, %v246_v17  ;;  %12258 = vmatpush3.xpose.msk.msra.mxu0 %vm438_vm3, %v247_v18  ;;  %v11596_v13 = vld [vmem:[%s14910_s7 + $0x8] ss:$0 sm:$0xff]  ;;  %v11597_v14 = vld [vmem:[%s14910_s7 + $0x9] ss:$0 sm:$0xff]  ;;  %vm2194_vm6 = vcmask 31744   ;;  %vm2912_vm7 = vcmask 1045504  }
  0x14   :  { %12262 = vmatprep.subr.mxu1 %v12947_v2  ;;  %12267 = vmatprep.subr.mxu0 %v12947_v2  ;;  %v11588_v17 = vld [vmem:[%s14910_s7] ss:$0 sm:$0xff]  ;;  %v11589_v18 = vld [vmem:[%s14910_s7 + $0x1] ss:$0 sm:$0xff]  ;;  %v11598_v24 = vld [vmem:[%s14910_s7 + $0xa] ss:$0 sm:$0xff] }
  0x15   :  { %vm2819_vm8 = vcmask 46080   ;;  %vm2908_vm9 = vcmask 48128   ;;  %vm4134_vm10 = vcmask 259072   ;;  %vm11429_vm11 = vcmask 254976   ;;  %s12949_s22 = smov [#allocation2]  }
  0xcf   :  { %v213_v20 = vpop.f32.mrf.mxu1 }
  0xd0   :  { %v13106_v23 = vadd.f32 %v11583_v19, %v213_v20 }
  0xd1   :  { %v127_v25 = vpop.f32.mrf.mxu0  ;;  %v12251_v28 = vpop.f32.mrf.mxu1 }
  0xd2   :  { %v234_v29 = vadd.f32 %v11587_v21, %v13106_v23  ;;  %v13118_v30 = vadd.f32 %v11581_v22, %v127_v25  ;;  %v11599_v25 = vld [vmem:[%s14910_s7 + $0xb] ss:$0 sm:$0xff] }
  0xd3   :  { %v12236_v31 = vpop.f32.mrf.mxu0 }
  0xd4   :  { %v228_v33 = vadd.f32 %v11586_v27, %v13118_v30  ;;  %v239_v34 = vrot.slane %v234_v29, 4  ;;  %v11590_v31 = vld [vmem:[%s14910_s7 + $0x2] ss:$0 sm:$0xff] }
  0xd6   :  { %v236_v35 = vrot.slane %v228_v33, 6 }
  0xd8   :  { %v242_v36 = vsel %vm241_vm4, %v222_v32, %v236_v35  ;;  %v11591_v32 = vld [vmem:[%s14910_s7 + $0x3] ss:$0 sm:$0xff] }
  0xd9   :  { %v13128_v39 = vsel %vm243_vm5, %v242_v36, %v239_v34 }
  0xda   :  { %12255 = vmatmul.mubr.msk.f32.vlgmr.msra.gmra.mxu1 %vm438_vm3, %v13128_v39  ;;  %12260 = vmatmul.mubr.msk.f32.vlgmr.msra.gmra.mxu0 %vm438_vm3, %v13128_v39 }
  0xdb   :  { %12263 = vmatpush3.xpose.msk.msra.mxu1 %vm438_vm3, %v248_v37  ;;  %12268 = vmatpush3.xpose.msk.msra.mxu0 %vm438_vm3, %v249_v38  ;;  %v11600_v37 = vld [vmem:[%s14910_s7 + $0xc] ss:$0 sm:$0xff]  ;;  %v11601_v38 = vld [vmem:[%s14910_s7 + $0xd] ss:$0 sm:$0xff] }
  0xdc   :  { %12264 = vmatprep.mubr.msk.f32.mxu1 %vm12948_vm1, %v12947_v2  ;;  %12269 = vmatprep.mubr.msk.f32.mxu0 %vm12948_vm1, %v12947_v2 }
  0xdd   :  { %12272 = vmatprep.subr.mxu1 %v12947_v2  ;;  %12277 = vmatprep.subr.mxu0 %v12947_v2 }
  0xde   :  { %12265 = vmatmul.mubr.msk.f32.vlgmr.msra.gmra.mxu1 %vm438_vm3, %v13128_v39  ;;  %12270 = vmatmul.mubr.msk.f32.vlgmr.msra.gmra.mxu0 %vm438_vm3, %v13128_v39 }
  0xdf   :  { %12273 = vmatpush3.xpose.msk.msra.mxu1 %vm438_vm3, %v250_v40  ;;  %12278 = vmatpush3.xpose.msk.msra.mxu0 %vm438_vm3, %v251_v41 }
  0xe0   :  { %12274 = vmatprep.mubr.msk.f32.mxu1 %vm12948_vm1, %v12947_v2  ;;  %12279 = vmatprep.mubr.msk.f32.mxu0 %vm12948_vm1, %v12947_v2 }
  0xe1   :  { %12282 = vmatprep.subr.mxu1 %v12947_v2  ;;  %12287 = vmatprep.subr.mxu0 %v12947_v2 }
  0xe2   :  { %12275 = vmatmul.mubr.msk.f32.vlgmr.msra.gmra.mxu1 %vm438_vm3, %v13128_v39  ;;  %12280 = vmatmul.mubr.msk.f32.vlgmr.msra.gmra.mxu0 %vm438_vm3, %v13128_v39 }
  0xe3   :  { %12283 = vmatpush3.xpose.msk.msra.mxu1 %vm438_vm3, %v252_v42  ;;  %12288 = vmatpush3.xpose.msk.msra.mxu0 %vm438_vm3, %v253_v43 }
  0xe4   :  { %12284 = vmatprep.mubr.msk.f32.mxu1 %vm12948_vm1, %v12947_v2  ;;  %12289 = vmatprep.mubr.msk.f32.mxu0 %vm12948_vm1, %v12947_v2 }
  0xe5   :  { %12292 = vmatprep.subr.mxu1 %v12947_v2  ;;  %12297 = vmatprep.subr.mxu0 %v12947_v2 }
  0xe6   :  { %12285 = vmatmul.mubr.msk.f32.vlgmr.msra.gmra.mxu1 %vm438_vm3, %v13128_v39  ;;  %12290 = vmatmul.mubr.msk.f32.vlgmr.msra.gmra.mxu0 %vm438_vm3, %v13128_v39 }
  0xe7   :  { %12293 = vmatpush3.xpose.msk.msra.mxu1 %vm438_vm3, %v254_v44  ;;  %12298 = vmatpush3.xpose.msk.msra.mxu0 %vm438_vm3, %v255_v45  ;;  %v11592_v44 = vld [vmem:[%s14910_s7 + $0x4] ss:$0 sm:$0xff]  ;;  %v11593_v45 = vld [vmem:[%s14910_s7 + $0x5] ss:$0 sm:$0xff] }
  0xe8   :  { %12294 = vmatprep.mubr.msk.f32.mxu1 %vm12948_vm1, %v12947_v2  ;;  %12299 = vmatprep.mubr.msk.f32.mxu0 %vm12948_vm1, %v12947_v2 }
  0xe9   :  { %12302 = vmatprep.subr.mxu1 %v12947_v2  ;;  %12307 = vmatprep.subr.mxu0 %v12947_v2 }
  0xea   :  { %12295 = vmatmul.mubr.msk.f32.vlgmr.msra.gmra.mxu1 %vm438_vm3, %v13128_v39  ;;  %12300 = vmatmul.mubr.msk.f32.vlgmr.msra.gmra.mxu0 %vm438_vm3, %v13128_v39 }
  0xeb   :  { %12303 = vmatpush3.xpose.msk.msra.mxu1 %vm438_vm3, %v256_v46  ;;  %12308 = vmatpush3.xpose.msk.msra.mxu0 %vm438_vm3, %v257_v47 }
  0xec   :  { %12304 = vmatprep.mubr.msk.f32.mxu1 %vm12948_vm1, %v12947_v2  ;;  %12309 = vmatprep.mubr.msk.f32.mxu0 %vm12948_vm1, %v12947_v2 }
  0xed   :  { %12312 = vmatprep.subr.mxu1 %v12947_v2  ;;  %12317 = vmatprep.subr.mxu0 %v12947_v2 }
  0xee   :  { %12305 = vmatmul.mubr.msk.f32.vlgmr.msra.gmra.mxu1 %vm438_vm3, %v13128_v39  ;;  %12310 = vmatmul.mubr.msk.f32.vlgmr.msra.gmra.mxu0 %vm438_vm3, %v13128_v39 }
  0xef   :  { %12313 = vmatpush3.xpose.msk.msra.mxu1 %vm438_vm3, %v258_v48  ;;  %12318 = vmatpush3.xpose.msk.msra.mxu0 %vm438_vm3, %v259_v49 }
  0xf0   :  { %12314 = vmatprep.mubr.msk.f32.mxu1 %vm12948_vm1, %v12947_v2  ;;  %12319 = vmatprep.mubr.msk.f32.mxu0 %vm12948_vm1, %v12947_v2 }
  0xf1   :  { %12322 = vmatprep.subr.mxu1 %v12947_v2  ;;  %12327 = vmatprep.subr.mxu0 %v12947_v2 }
  0xf2   :  { %12315 = vmatmul.mubr.msk.f32.vlgmr.msra.gmra.mxu1 %vm438_vm3, %v13128_v39  ;;  %12320 = vmatmul.mubr.msk.f32.vlgmr.msra.gmra.mxu0 %vm438_vm3, %v13128_v39 }
  0xf3   :  { %12323 = vmatpush3.xpose.msk.msra.mxu1 %vm438_vm3, %v260_v50  ;;  %12328 = vmatpush3.xpose.msk.msra.mxu0 %vm438_vm3, %v261_v51  ;;  %v11602_v50 = vld [vmem:[%s14910_s7 + $0xe] ss:$0 sm:$0xff]  ;;  %v11603_v51 = vld [vmem:[%s14910_s7 + $0xf] ss:$0 sm:$0xff] }
  0xf4   :  { %12324 = vmatprep.mubr.msk.f32.mxu1 %vm12948_vm1, %v12947_v2  ;;  %12329 = vmatprep.mubr.msk.f32.mxu0 %vm12948_vm1, %v12947_v2 }
  0xf5   :  { %12332 = vmatprep.subr.mxu1 %v12947_v2  ;;  %12337 = vmatprep.subr.mxu0 %v12947_v2 }
  0xf6   :  { %12325 = vmatmul.mubr.msk.f32.vlgmr.msra.gmra.mxu1 %vm438_vm3, %v13128_v39  ;;  %12330 = vmatmul.mubr.msk.f32.vlgmr.msra.gmra.mxu0 %vm438_vm3, %v13128_v39 }
  0xf7   :  { %12333 = vmatpush3.xpose.msk.msra.mxu1 %vm438_vm3, %v262_v52  ;;  %12338 = vmatpush3.xpose.msk.msra.mxu0 %vm438_vm3, %v263_v53 }
  0xf8   :  { %12334 = vmatprep.mubr.msk.f32.mxu1 %vm12948_vm1, %v12947_v2  ;;  %12339 = vmatprep.mubr.msk.f32.mxu0 %vm12948_vm1, %v12947_v2 }
  0xf9   :  { %12342 = vmatprep.subr.mxu1 %v12947_v2  ;;  %12347 = vmatprep.subr.mxu0 %v12947_v2 }
  0xfa   :  { %12335 = vmatmul.mubr.msk.f32.vlgmr.msra.gmra.mxu1 %vm438_vm3, %v13128_v39  ;;  %12340 = vmatmul.mubr.msk.f32.vlgmr.msra.gmra.mxu0 %vm438_vm3, %v13128_v39 }
  0xfb   :  { %12343 = vmatpush3.xpose.msk.msra.mxu1 %vm438_vm3, %v264_v54  ;;  %12348 = vmatpush3.xpose.msk.msra.mxu0 %vm438_vm3, %v265_v55 }
  0xfc   :  { %12344 = vmatprep.mubr.msk.f32.mxu1 %vm12948_vm1, %v12947_v2  ;;  %12349 = vmatprep.mubr.msk.f32.mxu0 %vm12948_vm1, %v12947_v2 }
  0xfd   :  { %12352 = vmatprep.subr.mxu1 %v12947_v2  ;;  %12357 = vmatprep.subr.mxu0 %v12947_v2 }
  0xfe   :  { %12345 = vmatmul.mubr.msk.f32.vlgmr.msra.gmra.mxu1 %vm438_vm3, %v13128_v39  ;;  %12350 = vmatmul.mubr.msk.f32.vlgmr.msra.gmra.mxu0 %vm438_vm3, %v13128_v39 }
  0xff   :  { %12353 = vmatpush3.xpose.msk.msra.mxu1 %vm438_vm3, %v266_v56  ;;  %12358 = vmatpush3.xpose.msk.msra.mxu0 %vm438_vm3, %v267_v57  ;;  %v11594_v56 = vld [vmem:[%s14910_s7 + $0x6] ss:$0 sm:$0xff]  ;;  %v11595_v57 = vld [vmem:[%s14910_s7 + $0x7] ss:$0 sm:$0xff] }
 0x100   :  { %12354 = vmatprep.mubr.msk.f32.mxu1 %vm12948_vm1, %v12947_v2  ;;  %12359 = vmatprep.mubr.msk.f32.mxu0 %vm12948_vm1, %v12947_v2 }
 0x101   :  { %12362 = vmatprep.subr.mxu1 %v12947_v2  ;;  %12367 = vmatprep.subr.mxu0 %v12947_v2 }
 0x102   :  { %12355 = vmatmul.mubr.msk.f32.vlgmr.msra.gmra.mxu1 %vm438_vm3, %v13128_v39  ;;  %12360 = vmatmul.mubr.msk.f32.vlgmr.msra.gmra.mxu0 %vm438_vm3, %v13128_v39 }
 0x103   :  { %12363 = vmatpush3.xpose.msk.msra.mxu1 %vm438_vm3, %v268_v58  ;;  %12368 = vmatpush3.xpose.msk.msra.mxu0 %vm438_vm3, %v269_v59 }
 0x104   :  { %12364 = vmatprep.mubr.msk.f32.mxu1 %vm12948_vm1, %v12947_v2  ;;  %12369 = vmatprep.mubr.msk.f32.mxu0 %vm12948_vm1, %v12947_v2 }
 0x105   :  { %12372 = vmatprep.subr.mxu1 %v12947_v2  ;;  %12377 = vmatprep.subr.mxu0 %v12947_v2 }
 0x106   :  { %12365 = vmatmul.mubr.msk.f32.vlgmr.msra.gmra.mxu1 %vm438_vm3, %v13128_v39  ;;  %12370 = vmatmul.mubr.msk.f32.vlgmr.msra.gmra.mxu0 %vm438_vm3, %v13128_v39 }
 0x107   :  { %12374 = vmatprep.mubr.msk.f32.mxu1 %vm12948_vm1, %v12947_v2  ;;  %12379 = vmatprep.mubr.msk.f32.mxu0 %vm12948_vm1, %v12947_v2 }
 0x19a   :  { %v511_v60 = vpop.f32.mrf.mxu1  ;;  %v584_v61 = vpop.f32.mrf.mxu0 }
 0x19b   :  { %v512_v26 = vadd.f32 %v11588_v17, %v511_v60  ;;  %v585_v27 = vadd.f32 %v11589_v18, %v584_v61 }
 0x19c   :  { %v12256_v62 = vpop.f32.mrf.mxu1  ;;  %v12261_v63 = vpop.f32.mrf.mxu0 }
 0x19d   :  { %v11604_v62 = vld [vmem:[%s14910_s7 + $0x10] ss:$0 sm:$0xff]  ;;  %v11605_v63 = vld [vmem:[%s14910_s7 + $0x11] ss:$0 sm:$0xff] }
 0x19e   :  { %v657_v0 = vpop.f32.mrf.mxu1  ;;  %v730_v1 = vpop.f32.mrf.mxu0 }
 0x19f   :  { %v658_v40 = vadd.f32 %v11590_v31, %v657_v0  ;;  %v731_v41 = vadd.f32 %v11591_v32, %v730_v1 }
 0x1a0   :  { %v12266_v3 = vpop.f32.mrf.mxu1  ;;  %v12271_v4 = vpop.f32.mrf.mxu0 }
 0x1a2   :  { %v803_v5 = vpop.f32.mrf.mxu1  ;;  %v876_v6 = vpop.f32.mrf.mxu0 }
 0x1a3   :  { %v804_v52 = vadd.f32 %v11592_v44, %v803_v5  ;;  %v877_v53 = vadd.f32 %v11593_v45, %v876_v6 }
 0x1a4   :  { %v12276_v7 = vpop.f32.mrf.mxu1  ;;  %v12281_v8 = vpop.f32.mrf.mxu0 }
 0x1a6   :  { %v13330_v9 = vpop.f32.mrf.mxu1  ;;  %v13332_v10 = vpop.f32.mrf.mxu0 }
 0x1a7   :  { %v950_v0 = vadd.f32 %v11594_v56, %v13330_v9  ;;  %v1023_v1 = vadd.f32 %v11595_v57, %v13332_v10 }
 0x1a8   :  { %v12286_v11 = vpop.f32.mrf.mxu1  ;;  %v12291_v12 = vpop.f32.mrf.mxu0 }
 0x1aa   :  { %v1095_v15 = vpop.f32.mrf.mxu1  ;;  %v1168_v16 = vpop.f32.mrf.mxu0 }
 0x1ab   :  { %v1096_v19 = vadd.f32 %v11596_v13, %v1095_v15  ;;  %v1169_v20 = vadd.f32 %v11597_v14, %v1168_v16 }
 0x1ac   :  { %v12296_v21 = vpop.f32.mrf.mxu1  ;;  %v12301_v22 = vpop.f32.mrf.mxu0 }
 0x1ad   :  { %12373 = vmatpush3.xpose.msk.msra.mxu1 %vm2194_vm6, %v1096_v19  ;;  %12378 = vmatpush3.xpose.msk.msra.mxu0 %vm2194_vm6, %v1169_v20 }
 0x1ae   :  { %v1241_v28 = vpop.f32.mrf.mxu1  ;;  %v1314_v29 = vpop.f32.mrf.mxu0  ;;  %12382 = vmatprep.subr.mxu1 %v12947_v2  ;;  %12387 = vmatprep.subr.mxu0 %v12947_v2 }
 0x1af   :  { %v1242_v33 = vadd.f32 %v11598_v24, %v1241_v28  ;;  %v1315_v34 = vadd.f32 %v11599_v25, %v1314_v29  ;;  %v245_v24 = vld [vmem:[%s14908_s5] sm:$0x3f] }
 0x1b0   :  { %v12306_v35 = vpop.f32.mrf.mxu1  ;;  %v12311_v36 = vpop.f32.mrf.mxu0  ;;  %12375 = vmatmul.mubr.msk.f32.vlgmr.msra.gmra.mxu1 %vm2194_vm6, %v512_v26  ;;  %12380 = vmatmul.mubr.msk.f32.vlgmr.msra.gmra.mxu0 %vm2194_vm6, %v585_v27 }
 0x1b1   :  { %12383 = vmatpush3.xpose.msk.msra.mxu1 %vm2194_vm6, %v1242_v33  ;;  %12388 = vmatpush3.xpose.msk.msra.mxu0 %vm2194_vm6, %v1315_v34 }
 0x1b2   :  { %v1387_v42 = vpop.f32.mrf.mxu1  ;;  %v1460_v43 = vpop.f32.mrf.mxu0  ;;  %12384 = vmatprep.mubr.msk.f32.mxu1 %vm12948_vm1, %v12947_v2  ;;  %12389 = vmatprep.mubr.msk.f32.mxu0 %vm12948_vm1, %v12947_v2 }
 0x1b3   :  { %v1388_v46 = vadd.f32 %v11600_v37, %v1387_v42  ;;  %v1461_v47 = vadd.f32 %v11601_v38, %v1460_v43  ;;  %12392 = vmatprep.subr.mxu1 %v12947_v2  ;;  %12397 = vmatprep.subr.mxu0 %v12947_v2 }
 0x1b4   :  { %v12316_v48 = vpop.f32.mrf.mxu1  ;;  %v12321_v49 = vpop.f32.mrf.mxu0  ;;  %12385 = vmatmul.mubr.msk.f32.vlgmr.msra.gmra.mxu1 %vm2194_vm6, %v658_v40  ;;  %12390 = vmatmul.mubr.msk.f32.vlgmr.msra.gmra.mxu0 %vm2194_vm6, %v731_v41 }
 0x1b5   :  { %12393 = vmatpush3.xpose.msk.msra.mxu1 %vm2194_vm6, %v1388_v46  ;;  %12398 = vmatpush3.xpose.msk.msra.mxu0 %vm2194_vm6, %v1461_v47 }
 0x1b6   :  { %v1533_v54 = vpop.f32.mrf.mxu1  ;;  %v1606_v55 = vpop.f32.mrf.mxu0  ;;  %12394 = vmatprep.mubr.msk.f32.mxu1 %vm12948_vm1, %v12947_v2  ;;  %12399 = vmatprep.mubr.msk.f32.mxu0 %vm12948_vm1, %v12947_v2 }
 0x1b7   :  { %v1534_v58 = vadd.f32 %v11602_v50, %v1533_v54  ;;  %v1607_v59 = vadd.f32 %v11603_v51, %v1606_v55  ;;  %12402 = vmatprep.subr.mxu1 %v12947_v2  ;;  %12407 = vmatprep.subr.mxu0 %v12947_v2 }
 0x1b8   :  { %v12326_v60 = vpop.f32.mrf.mxu1  ;;  %v12331_v61 = vpop.f32.mrf.mxu0  ;;  %12395 = vmatmul.mubr.msk.f32.vlgmr.msra.gmra.mxu1 %vm2194_vm6, %v804_v52  ;;  %12400 = vmatmul.mubr.msk.f32.vlgmr.msra.gmra.mxu0 %vm2194_vm6, %v877_v53 }
 0x1b9   :  { %12403 = vmatpush3.xpose.msk.msra.mxu1 %vm2194_vm6, %v1534_v58  ;;  %12408 = vmatpush3.xpose.msk.msra.mxu0 %vm2194_vm6, %v1607_v59 }
 0x1ba   :  { %v1679_v3 = vpop.f32.mrf.mxu1  ;;  %v1752_v4 = vpop.f32.mrf.mxu0  ;;  %12404 = vmatprep.mubr.msk.f32.mxu1 %vm12948_vm1, %v12947_v2  ;;  %12409 = vmatprep.mubr.msk.f32.mxu0 %vm12948_vm1, %v12947_v2 }
 0x1bb   :  { %v1680_v5 = vadd.f32 %v11604_v62, %v1679_v3  ;;  %v1753_v6 = vadd.f32 %v11605_v63, %v1752_v4  ;;  %12412 = vmatprep.subr.mxu1 %v12947_v2  ;;  %12417 = vmatprep.subr.mxu0 %v12947_v2 }
 0x1bc   :  { %v12336_v7 = vpop.f32.mrf.mxu1  ;;  %v12341_v8 = vpop.f32.mrf.mxu0  ;;  %12405 = vmatmul.mubr.msk.f32.vlgmr.msra.gmra.mxu1 %vm2194_vm6, %v950_v0  ;;  %12410 = vmatmul.mubr.msk.f32.vlgmr.msra.gmra.mxu0 %vm2194_vm6, %v1023_v1 }
 0x1bd   :  { %12413 = vmatpush3.msk.msra.mxu1 %vm2912_vm7, %v1680_v5  ;;  %12418 = vmatpush3.msk.msra.mxu0 %vm2912_vm7, %v1753_v6 }
 0x1be   :  { %v13428_v9 = vpop.f32.mrf.mxu1  ;;  %v13430_v10 = vpop.f32.mrf.mxu0  ;;  %12414 = vmatprep.mubr.msk.f32.mxu1 %vm12948_vm1, %v12947_v2  ;;  %12422 = vmatprep.subr.mxu1 %v12947_v2 }
 0x1bf   :  { %12419 = vmatprep.mubr.msk.f32.mxu0 %vm12948_vm1, %v12947_v2  ;;  %12427 = vmatprep.subr.mxu0 %v12947_v2 }
 0x1c0   :  { %v12346_v11 = vpop.f32.mrf.mxu1  ;;  %v12351_v12 = vpop.f32.mrf.mxu0 }
 0x1c2   :  { %v13438_v13 = vpop.f32.mrf.mxu1  ;;  %v13440_v14 = vpop.f32.mrf.mxu0 }
 0x1c4   :  { %v12356_v15 = vpop.f32.mrf.mxu1  ;;  %v12361_v16 = vpop.f32.mrf.mxu0 }
 0x1c6   :  { %v13442_v17 = vpop.f32.mrf.mxu1  ;;  %v13444_v18 = vpop.f32.mrf.mxu0 }
 0x1c8   :  { %v12366_v19 = vpop.f32.mrf.mxu1  ;;  %v12371_v20 = vpop.f32.mrf.mxu0 }
 0x270   :  { %v2267_v21 = vpop.f32.mrf.mxu1  ;;  %v2343_v22 = vpop.f32.mrf.mxu0 }
 0x271   :  { %v2803_v25 = vmul.f32 0.5, %v2267_v21  ;;  %v2804_v26 = vmul.f32 0.5, %v2343_v22 }
 0x272   :  { %v12376_v27 = vpop.f32.mrf.mxu1  ;;  %v12381_v28 = vpop.f32.mrf.mxu0 }
 0x273   :  { %v2811_v29 = vadd.f32 %v2803_v25, %v245_v24  ;;  %v2812_v36 = vadd.f32 %v2804_v26, %v245_v24 }
 0x274   :  { %v2419_v31 = vpop.f32.mrf.mxu1  ;;  %v2495_v32 = vpop.f32.mrf.mxu0 }
 0x275   :  { %v2805_v33 = vmul.f32 0.5, %v2419_v31  ;;  %v2806_v34 = vmul.f32 0.5, %v2495_v32  ;;  %v2820_v35 = vsel %vm2819_vm8, %v2811_v29, -inf  ;;  %v2823_v46 = vsel %vm2819_vm8, %v2812_v36, -inf }
 0x276   :  { %v12391_v37 = vpop.f32.mrf.mxu0  ;;  %2821 = vmax.xlane.f32.xlu0 %v2820_v35  ;;  %v12386_v38 = vpop.f32.mrf.mxu1 }
 0x277   :  { %v2813_v40 = vadd.f32 %v2805_v33, %v245_v24  ;;  %v2814_v43 = vadd.f32 %v2806_v34, %v245_v24 }
 0x278   :  { %v2571_v41 = vpop.f32.mrf.mxu1  ;;  %v2647_v42 = vpop.f32.mrf.mxu0 }
 0x279   :  { %v2807_v44 = vmul.f32 0.5, %v2571_v41  ;;  %v2808_v45 = vmul.f32 0.5, %v2647_v42  ;;  %v2826_v47 = vsel %vm2819_vm8, %v2813_v40, -inf  ;;  %v2829_v53 = vsel %vm2819_vm8, %v2814_v43, -inf }
 0x27a   :  { %v12401_v48 = vpop.f32.mrf.mxu0  ;;  %2824 = vmax.xlane.f32.xlu0 %v2823_v46  ;;  %2827 = vmax.xlane.f32.xlu1 %v2826_v47  ;;  %v12396_v49 = vpop.f32.mrf.mxu1 }
 0x27b   :  { %v2815_v50 = vadd.f32 %v2807_v44, %v245_v24  ;;  %v2816_v57 = vadd.f32 %v2808_v45, %v245_v24 }
 0x27c   :  { %v2723_v51 = vpop.f32.mrf.mxu1  ;;  %v2799_v52 = vpop.f32.mrf.mxu0 }
 0x27d   :  { %v2809_v54 = vmul.f32 0.5, %v2723_v51  ;;  %v2810_v55 = vmul.f32 0.5, %v2799_v52  ;;  %v2832_v56 = vsel %vm2819_vm8, %v2815_v50, -inf  ;;  %v2835_v61 = vsel %vm2819_vm8, %v2816_v57, -inf }
 0x27e   :  { %v12411_v58 = vpop.f32.mrf.mxu0  ;;  %2830 = vmax.xlane.f32.xlu1 %v2829_v53  ;;  %2833 = vmax.xlane.f32.xlu0 %v2832_v56  ;;  %v12406_v59 = vpop.f32.mrf.mxu1 }
 0x27f   :  { %v2817_v60 = vadd.f32 %v2809_v54, %v245_v24  ;;  %v2818_v63 = vadd.f32 %v2810_v55, %v245_v24 }
 0x281   :  { %v2838_v62 = vsel %vm2819_vm8, %v2817_v60, -inf  ;;  %v2841_v0 = vsel %vm2819_vm8, %v2818_v63, -inf }
 0x282   :  { %2836 = vmax.xlane.f32.xlu1 %v2835_v61  ;;  %2839 = vmax.xlane.f32.xlu0 %v2838_v62 }
 0x286   :  { %2842 = vmax.xlane.f32.xlu1 %v2841_v0 }
 0x2ff   :  { %v2822_v1 = vpop.xlane.xlu0 %2821 }
 0x300   :  { %v2844_v3 = vsub.f32 %v2811_v29, %v2822_v1  ;;  %v11608_v1 = vld [vmem:[%s14910_s7 + $0x14] ss:$0 sm:$0xff] }
 0x302   :  { %v2852_v4 = vmul.f32 1.442695, %v2844_v3 }
 0x303   :  { %v2825_v5 = vpop.xlane.xlu0 %2824  ;;  %v2828_v6 = vpop.xlane.xlu1 %2827 }
 0x304   :  { %12779 = vpow2.f32 %v2852_v4  ;;  %v2845_v7 = vsub.f32 %v2812_v36, %v2825_v5  ;;  %v2846_v8 = vsub.f32 %v2813_v40, %v2828_v6  ;;  %v1972_v6 = vadd.f32 %v11608_v1, %v13438_v13 }
 0x306   :  { %v2854_v11 = vmul.f32 1.442695, %v2845_v7  ;;  %v2856_v12 = vmul.f32 1.442695, %v2846_v8  ;;  %v11609_v7 = vld [vmem:[%s14910_s7 + $0x15] ss:$0 sm:$0xff] }
 0x307   :  { %v2831_v15 = vpop.xlane.xlu1 %2830  ;;  %v2834_v16 = vpop.xlane.xlu0 %2833  ;;  %v2045_v13 = vadd.f32 %v11609_v7, %v13440_v14 }
 0x308   :  { %12781 = vpow2.f32 %v2854_v11  ;;  %v2847_v19 = vsub.f32 %v2814_v43, %v2831_v15  ;;  %v2848_v20 = vsub.f32 %v2815_v50, %v2834_v16  ;;  %v11610_v11 = vld [vmem:[%s14910_s7 + $0x16] ss:$0 sm:$0xff] }
 0x309   :  { %12783 = vpow2.f32 %v2856_v12  ;;  %v2118_v16 = vadd.f32 %v11610_v11, %v13442_v17 }
 0x30a   :  { %v2858_v21 = vmul.f32 1.442695, %v2847_v19  ;;  %v2860_v22 = vmul.f32 1.442695, %v2848_v20  ;;  %v11611_v19 = vld [vmem:[%s14910_s7 + $0x17] ss:$0 sm:$0xff] }
 0x30b   :  { %v2837_v24 = vpop.xlane.xlu1 %2836  ;;  %v2840_v25 = vpop.xlane.xlu0 %2839 }
 0x30c   :  { %12785 = vpow2.f32 %v2858_v21  ;;  %v2849_v26 = vsub.f32 %v2816_v57, %v2837_v24  ;;  %v2850_v27 = vsub.f32 %v2817_v60, %v2840_v25  ;;  %v11606_v57 = vld [vmem:[%s14910_s7 + $0x12] ss:$0 sm:$0xff]  ;;  %v2191_v21 = vadd.f32 %v11611_v19, %v13444_v18  ;;  %v3518_v25 = vld [vmem:[%s14911_s8] sm:$0xf] }
 0x30d   :  { %12787 = vpow2.f32 %v2860_v22  ;;  %v1826_v61 = vadd.f32 %v11606_v57, %v13428_v9 }
 0x30e   :  { %v2862_v28 = vmul.f32 1.442695, %v2849_v26  ;;  %v2864_v29 = vmul.f32 1.442695, %v2850_v27  ;;  %v3519_v26 = vld [vmem:[%s14911_s8 + $0x4] sm:$0xf] }
 0x30f   :  { %v2843_v31 = vpop.xlane.xlu1 %2842  ;;  %v3520_v27 = vld [vmem:[%s14911_s8 + $0x8] sm:$0xf] }
 0x310   :  { %12789 = vpow2.f32 %v2862_v28  ;;  %v2851_v32 = vsub.f32 %v2818_v63, %v2843_v31  ;;  %v11607_v63 = vld [vmem:[%s14910_s7 + $0x13] ss:$0 sm:$0xff]  ;;  %v3521_v31 = vld [vmem:[%s14911_s8 + $0xc] sm:$0xf] }
 0x311   :  { %v12780_v33 = vpop.eup %12779  ;;  %12791 = vpow2.f32 %v2864_v29  ;;  %v1899_v4 = vadd.f32 %v11607_v63, %v13430_v10 }
 0x312   :  { %v2866_v34 = vmul.f32 1.442695, %v2851_v32  ;;  %v2868_v35 = vsel %vm2819_vm8, %v12780_v33, 0.0 }
 0x313   :  { %2869 = vadd.xlane.f32.xlu0 %v2868_v35 }
 0x314   :  { %12793 = vpow2.f32 %v2866_v34 }
 0x315   :  { %v12782_v36 = vpop.eup %12781 }
 0x316   :  { %v12784_v37 = vpop.eup %12783  ;;  %v2871_v38 = vsel %vm2819_vm8, %v12782_v36, 0.0 }
 0x317   :  { %2872 = vadd.xlane.f32.xlu1 %v2871_v38  ;;  %v2874_v40 = vsel %vm2819_vm8, %v12784_v37, 0.0 }
 0x318   :  { %2875 = vadd.xlane.f32.xlu0 %v2874_v40  ;;  %v3524_v40 = vld [vmem:[%s14911_s8 + $0x18] sm:$0xf] }
 0x319   :  { %v12786_v41 = vpop.eup %12785 }
 0x31a   :  { %v12788_v42 = vpop.eup %12787  ;;  %v2877_v43 = vsel %vm2819_vm8, %v12786_v41, 0.0 }
 0x31b   :  { %2878 = vadd.xlane.f32.xlu1 %v2877_v43  ;;  %v2880_v44 = vsel %vm2819_vm8, %v12788_v42, 0.0 }
 0x31c   :  { %2881 = vadd.xlane.f32.xlu0 %v2880_v44  ;;  %v3525_v44 = vld [vmem:[%s14911_s8 + $0x1c] sm:$0xf] }
 0x31d   :  { %v13462_v45 = vpop.eup %12789 }
 0x31e   :  { %v13464_v46 = vpop.eup %12791  ;;  %v2883_v47 = vsel %vm2819_vm8, %v13462_v45, 0.0 }
 0x31f   :  { %2884 = vadd.xlane.f32.xlu1 %v2883_v47  ;;  %v2886_v48 = vsel %vm2819_vm8, %v13464_v46, 0.0 }
 0x320   :  { %2887 = vadd.xlane.f32.xlu0 %v2886_v48 }
 0x321   :  { %v13470_v49 = vpop.eup %12793 }
 0x322   :  { %v2889_v50 = vsel %vm2819_vm8, %v13470_v49, 0.0 }
 0x323   :  { %2890 = vadd.xlane.f32.xlu1 %v2889_v50 }
 0x39c   :  { %v2870_v51 = vpop.xlane.xlu0 %2869 }
 0x39d   :  { %12795 = vrcp.f32 %v2870_v51 }
 0x3a0   :  { %v2873_v52 = vpop.xlane.xlu1 %2872 }
 0x3a1   :  { %12797 = vrcp.f32 %v2873_v52  ;;  %v2876_v53 = vpop.xlane.xlu0 %2875 }
 0x3a2   :  { %12799 = vrcp.f32 %v2876_v53 }
 0x3a4   :  { %v2879_v54 = vpop.xlane.xlu1 %2878 }
 0x3a5   :  { %12801 = vrcp.f32 %v2879_v54  ;;  %v2882_v55 = vpop.xlane.xlu0 %2881 }
 0x3a6   :  { %12803 = vrcp.f32 %v2882_v55 }
 0x3a8   :  { %v2885_v56 = vpop.xlane.xlu1 %2884 }
 0x3a9   :  { %12805 = vrcp.f32 %v2885_v56  ;;  %v2888_v58 = vpop.xlane.xlu0 %2887 }
 0x3aa   :  { %v12796_v59 = vpop.eup %12795  ;;  %12807 = vrcp.f32 %v2888_v58 }
 0x3ab   :  { %v2893_v60 = vmul.f32 %v12796_v59, %v12780_v33  ;;  %v3522_v33 = vld [vmem:[%s14911_s8 + $0x10] sm:$0xf] }
 0x3ac   :  { %v2891_v62 = vpop.xlane.xlu1 %2890 }
 0x3ad   :  { %12809 = vrcp.f32 %v2891_v62  ;;  %12415 = vmatmul.mubr.msk.f32.vlgmr.msra.gmra.mxu1 %vm2908_vm9, %v2893_v60 }
 0x3ae   :  { %v12798_v0 = vpop.eup %12797  ;;  %12423 = vmatpush3.msk.msra.mxu1 %vm2912_vm7, %v1826_v61  ;;  %12424 = vmatprep.mubr.msk.f32.mxu1 %vm12948_vm1, %v12947_v2 }
 0x3af   :  { %v12800_v3 = vpop.eup %12799  ;;  %12432 = vmatprep.subr.mxu1 %v12947_v2  ;;  %v2895_v9 = vmul.f32 %v12798_v0, %v12782_v36 }
 0x3b0   :  { %v2897_v5 = vmul.f32 %v12800_v3, %v12784_v37  ;;  %v3523_v37 = vld [vmem:[%s14911_s8 + $0x14] sm:$0xf] }
 0x3b1   :  { %12420 = vmatmul.mubr.msk.f32.vlgmr.msra.gmra.mxu0 %vm2908_vm9, %v2895_v9 }
 0x3b2   :  { %v12802_v8 = vpop.eup %12801  ;;  %12425 = vmatmul.mubr.msk.f32.vlgmr.msra.gmra.mxu1 %vm2908_vm9, %v2897_v5  ;;  %12428 = vmatpush3.msk.msra.mxu0 %vm2912_vm7, %v1899_v4 }
 0x3b3   :  { %v12804_v12 = vpop.eup %12803  ;;  %12433 = vmatpush3.msk.msra.mxu1 %vm2912_vm7, %v1972_v6  ;;  %12429 = vmatprep.mubr.msk.f32.mxu0 %vm12948_vm1, %v12947_v2  ;;  %v2899_v10 = vmul.f32 %v12802_v8, %v12786_v41 }
 0x3b4   :  { %12434 = vmatprep.mubr.msk.f32.mxu1 %vm12948_vm1, %v12947_v2  ;;  %12437 = vmatprep.subr.mxu0 %v12947_v2  ;;  %v2901_v15 = vmul.f32 %v12804_v12, %v12788_v42 }
 0x3b5   :  { %12442 = vmatprep.subr.mxu1 %v12947_v2  ;;  %12430 = vmatmul.mubr.msk.f32.vlgmr.msra.gmra.mxu0 %vm2908_vm9, %v2899_v10 }
 0x3b6   :  { %v12806_v20 = vpop.eup %12805  ;;  %12435 = vmatmul.mubr.msk.f32.vlgmr.msra.gmra.mxu1 %vm2908_vm9, %v2901_v15  ;;  %12438 = vmatpush3.msk.msra.mxu0 %vm2912_vm7, %v2045_v13 }
 0x3b7   :  { %v12808_v14 = vpop.eup %12807  ;;  %12443 = vmatpush3.msk.msra.mxu1 %vm2912_vm7, %v2118_v16  ;;  %12439 = vmatprep.mubr.msk.f32.mxu0 %vm12948_vm1, %v12947_v2  ;;  %v2903_v17 = vmul.f32 %v12806_v20, %v13462_v45  ;;  %v11708_v20 = vld [vmem:[%s14906_s3 + $0x5] ss:$0 sm:$0xff] }
 0x3b8   :  { %12444 = vmatprep.mubr.msk.f32.mxu1 %vm12948_vm1, %v12947_v2  ;;  %12447 = vmatprep.subr.mxu0 %v12947_v2  ;;  %v2905_v22 = vmul.f32 %v12808_v14, %v13464_v46 }
 0x3b9   :  { %12440 = vmatmul.mubr.msk.f32.vlgmr.msra.gmra.mxu0 %vm2908_vm9, %v2903_v17  ;;  %12452 = vmatprep.subr.mxu1 %v12947_v2 }
 0x3ba   :  { %v12810_v24 = vpop.eup %12809  ;;  %12445 = vmatmul.mubr.msk.f32.vlgmr.msra.gmra.mxu1 %vm2908_vm9, %v2905_v22  ;;  %12448 = vmatpush3.msk.msra.mxu0 %vm2912_vm7, %v2191_v21 }
 0x3bb   :  { %12449 = vmatprep.mubr.msk.f32.mxu0 %vm12948_vm1, %v12947_v2  ;;  %v2907_v18 = vmul.f32 %v12810_v24, %v13470_v49  ;;  %12454 = vmatprep.mubr.msk.f32.mxu1 %vm12948_vm1, %v12947_v2 }
 0x3bc   :  { %12457 = vmatprep.subr.mxu0 %v12947_v2  ;;  %12453 = vmatpush3.msk.msra.mxu1 %vm243_vm5, %v3518_v25 }
 0x3bd   :  { %12450 = vmatmul.mubr.msk.f32.vlgmr.msra.gmra.mxu0 %vm2908_vm9, %v2907_v18  ;;  %12462 = vmatprep.subr.mxu1 %v12947_v2 }
 0x3be   :  { %12459 = vmatprep.mubr.msk.f32.mxu0 %vm12948_vm1, %v12947_v2  ;;  %12458 = vmatpush3.msk.msra.mxu0 %vm243_vm5, %v3519_v26 }
 0x3bf   :  { %12467 = vmatprep.subr.mxu0 %v12947_v2 }
 0x46d   :  { %v2982_v28 = vpop.f32.mrf.mxu1 }
 0x46e   :  { %12455 = vmatmul.mubr.msk.f32.vlgmr.msra.gmra.mxu1 %vm2194_vm6, %v2982_v28 }
 0x46f   :  { %v12416_v29 = vpop.f32.mrf.mxu1  ;;  %12463 = vmatpush3.msk.msra.mxu1 %vm243_vm5, %v3520_v27  ;;  %12464 = vmatprep.mubr.msk.f32.mxu1 %vm12948_vm1, %v12947_v2 }
 0x470   :  { %12472 = vmatprep.subr.mxu1 %v12947_v2  ;;  %v4207_v29 = vld [vmem:[%s14912_s9 + $0xc0] sm:$0xff] }
 0x471   :  { %v3058_v32 = vpop.f32.mrf.mxu0 }
 0x472   :  { %v3134_v34 = vpop.f32.mrf.mxu1  ;;  %12460 = vmatmul.mubr.msk.f32.vlgmr.msra.gmra.mxu0 %vm2194_vm6, %v3058_v32  ;;  %v4264_v32 = vunpack.c.h.bf16 %v4207_v29 }
 0x473   :  { %12465 = vmatmul.mubr.msk.f32.vlgmr.msra.gmra.mxu1 %vm2194_vm6, %v3134_v34  ;;  %v12421_v35 = vpop.f32.mrf.mxu0  ;;  %12468 = vmatpush3.msk.msra.mxu0 %vm243_vm5, %v3521_v31  ;;  %v4208_v31 = vld [vmem:[%s14912_s9 + $0xc8] sm:$0xff] }
 0x474   :  { %v12426_v36 = vpop.f32.mrf.mxu1  ;;  %12469 = vmatprep.mubr.msk.f32.mxu0 %vm12948_vm1, %v12947_v2  ;;  %12473 = vmatpush3.msk.msra.mxu1 %vm243_vm5, %v3522_v33  ;;  %v4263_v33 = vunpack.c.l.bf16 %v4207_v29  ;;  %v4265_v34 = vunpack.c.l.bf16 %v4208_v31  ;;  %v4199_v35 = vld [vmem:[%s14912_s9 + $0x80] sm:$0xff] }
 0x475   :  { %v3210_v38 = vpop.f32.mrf.mxu0  ;;  %12474 = vmatprep.mubr.msk.f32.mxu1 %vm12948_vm1, %v12947_v2  ;;  %12477 = vmatprep.subr.mxu0 %v12947_v2  ;;  %v4200_v36 = vld [vmem:[%s14912_s9 + $0x88] sm:$0xff] }
 0x476   :  { %v3286_v41 = vpop.f32.mrf.mxu1  ;;  %12470 = vmatmul.mubr.msk.f32.vlgmr.msra.gmra.mxu0 %vm2194_vm6, %v3210_v38  ;;  %12482 = vmatprep.subr.mxu1 %v12947_v2  ;;  %v4250_v38 = vunpack.c.h.bf16 %v4200_v36 }
 0x477   :  { %12475 = vmatmul.mubr.msk.f32.vlgmr.msra.gmra.mxu1 %vm2194_vm6, %v3286_v41  ;;  %v12431_v42 = vpop.f32.mrf.mxu0  ;;  %12478 = vmatpush3.msk.msra.mxu0 %vm243_vm5, %v3523_v37  ;;  %v4248_v37 = vunpack.c.h.bf16 %v4199_v35  ;;  %v4249_v41 = vunpack.c.l.bf16 %v4200_v36 }
 0x478   :  { %v12436_v43 = vpop.f32.mrf.mxu1  ;;  %12479 = vmatprep.mubr.msk.f32.mxu0 %vm12948_vm1, %v12947_v2  ;;  %12483 = vmatpush3.msk.msra.mxu1 %vm243_vm5, %v3524_v40  ;;  %v4247_v40 = vunpack.c.l.bf16 %v4199_v35  ;;  %v4191_v42 = vld [vmem:[%s14912_s9 + $0x40] sm:$0xff] }
 0x479   :  { %v3362_v45 = vpop.f32.mrf.mxu0  ;;  %12484 = vmatprep.mubr.msk.f32.mxu1 %vm12948_vm1, %v12947_v2  ;;  %12487 = vmatprep.subr.mxu0 %v12947_v2  ;;  %v4192_v43 = vld [vmem:[%s14912_s9 + $0x48] sm:$0xff] }
 0x47a   :  { %v3438_v46 = vpop.f32.mrf.mxu1  ;;  %12480 = vmatmul.mubr.msk.f32.vlgmr.msra.gmra.mxu0 %vm2194_vm6, %v3362_v45  ;;  %4486 = vmatprep.subr.mxu1 %v4264_v32  ;;  %v4234_v45 = vunpack.c.h.bf16 %v4192_v43 }
 0x47b   :  { %12485 = vmatmul.mubr.msk.f32.vlgmr.msra.gmra.mxu1 %vm2194_vm6, %v3438_v46  ;;  %v12441_v47 = vpop.f32.mrf.mxu0  ;;  %12488 = vmatpush3.msk.msra.mxu0 %vm243_vm5, %v3525_v44  ;;  %v4232_v44 = vunpack.c.h.bf16 %v4191_v42  ;;  %v4231_v46 = vunpack.c.l.bf16 %v4191_v42 }
 0x47c   :  { %v12446_v48 = vpop.f32.mrf.mxu1  ;;  %12489 = vmatprep.mubr.msk.f32.mxu0 %vm12948_vm1, %v12947_v2  ;;  %4526 = vmatprep.mubr.f32.mxu1 %v12947_v2  ;;  %v4233_v47 = vunpack.c.l.bf16 %v4192_v43 }
 0x47d   :  { %v3514_v49 = vpop.f32.mrf.mxu0  ;;  %4487 = vmatpush1.msra.mxu1 %v4263_v33  ;;  %v4183_v48 = vld [vmem:[%s14912_s9] sm:$0xff] }
 0x47e   :  { %12490 = vmatmul.mubr.msk.f32.vlgmr.msra.gmra.mxu0 %vm2194_vm6, %v3514_v49  ;;  %4488 = vmatprep.subr.mxu1 %v4248_v37  ;;  %v4184_v49 = vld [vmem:[%s14912_s9 + $0x8] sm:$0xff]  ;;  %v4195_v33 = vld [vmem:[%s14912_s9 + $0x60] sm:$0xff] }
 0x47f   :  { %v12451_v50 = vpop.f32.mrf.mxu0  ;;  %4597 = vmatprep.mubr.f32.mxu0 %v12947_v2  ;;  %4489 = vmatpush1.msra.mxu1 %v4247_v40  ;;  %v4187_v40 = vld [vmem:[%s14912_s9 + $0x20] sm:$0xff]  ;;  %v4240_v42 = vunpack.c.h.bf16 %v4195_v33 }
 0x480   :  { %4490 = vmatprep.subr.mxu1 %v4232_v44  ;;  %v4216_v50 = vunpack.c.h.bf16 %v4183_v48  ;;  %v4239_v44 = vunpack.c.l.bf16 %v4195_v33 }
 0x481   :  { %4491 = vmatpush1.msra.mxu1 %v4231_v46  ;;  %v4224_v46 = vunpack.c.h.bf16 %v4187_v40 }
 0x482   :  { %4492 = vmatprep.subr.mxu1 %v4216_v50  ;;  %v4214_v50 = vld [vmem:[%s14912_s9 + $0xf8] sm:$0xff] }
 0x52e   :  { %v3598_v51 = vpop.f32.mrf.mxu1 }
 0x52f   :  { %v4135_v54 = vsel %vm4134_vm10, %v3598_v51, 0.0  ;;  %v4218_v51 = vunpack.c.h.bf16 %v4184_v49 }
 0x530   :  { %v12456_v52 = vpop.f32.mrf.mxu1 }
 0x531   :  { %v4215_v52 = vunpack.c.l.bf16 %v4183_v48  ;;  %v4223_v48 = vunpack.c.l.bf16 %v4187_v40 }
 0x532   :  { %v3674_v53 = vpop.f32.mrf.mxu0 }
 0x533   :  { %v4136_v55 = vsel %vm4134_vm10, %v3674_v53, 0.0  ;;  %v3750_v56 = vpop.f32.mrf.mxu1  ;;  %v4217_v53 = vunpack.c.l.bf16 %v4184_v49  ;;  %4493 = vmatpush1.msra.mxu1 %v4215_v52  ;;  %v4213_v49 = vld [vmem:[%s14912_s9 + $0xf0] sm:$0xff] }
 0x534   :  { %v4137_v57 = vadd.f32 %v4136_v55, %v4135_v54  ;;  %v12461_v58 = vpop.f32.mrf.mxu0  ;;  %v4138_v59 = vsel %vm4134_vm10, %v3750_v56, 0.0  ;;  %v4209_v54 = vld [vmem:[%s14912_s9 + $0xd0] sm:$0xff]  ;;  %v4210_v55 = vld [vmem:[%s14912_s9 + $0xd8] sm:$0xff] }
 0x535   :  { %v12466_v60 = vpop.f32.mrf.mxu1  ;;  %v4268_v56 = vunpack.c.h.bf16 %v4209_v54  ;;  %v4205_v52 = vld [vmem:[%s14912_s9 + $0xb0] sm:$0xff] }
 0x536   :  { %v4139_v61 = vadd.f32 %v4138_v59, %v4137_v57  ;;  %v3826_v62 = vpop.f32.mrf.mxu0  ;;  %v4270_v57 = vunpack.c.h.bf16 %v4210_v55 }
 0x537   :  { %v4140_v63 = vsel %vm4134_vm10, %v3826_v62, 0.0  ;;  %v3902_v0 = vpop.f32.mrf.mxu1  ;;  %4628 = vmatprep.subr.mxu1 %v4268_v56  ;;  %v11709_v62 = vld [vmem:[%s14906_s3 + $0x6] ss:$0 sm:$0xff]  ;;  %v4275_v56 = vunpack.c.l.bf16 %v4213_v49 }
 0x538   :  { %v4141_v1 = vadd.f32 %v4140_v63, %v4139_v61  ;;  %v12471_v3 = vpop.f32.mrf.mxu0  ;;  %v4142_v9 = vsel %vm4134_vm10, %v3902_v0, 0.0  ;;  %v11710_v0 = vld [vmem:[%s14906_s3 + $0x7] ss:$0 sm:$0xff] }
 0x539   :  { %v12476_v4 = vpop.f32.mrf.mxu1  ;;  %v4202_v3 = vld [vmem:[%s14912_s9 + $0x98] sm:$0xff] }
 0x53a   :  { %v4143_v5 = vadd.f32 %v4142_v9, %v4141_v1  ;;  %v3978_v6 = vpop.f32.mrf.mxu0  ;;  %v4201_v1 = vld [vmem:[%s14912_s9 + $0x90] sm:$0xff]  ;;  %v4267_v4 = vunpack.c.l.bf16 %v4209_v54  ;;  %v4276_v54 = vunpack.c.h.bf16 %v4213_v49 }
 0x53b   :  { %v4144_v7 = vsel %vm4134_vm10, %v3978_v6, 0.0  ;;  %v4054_v8 = vpop.f32.mrf.mxu1  ;;  %v4193_v6 = vld [vmem:[%s14912_s9 + $0x50] sm:$0xff] }
 0x53c   :  { %v4145_v11 = vadd.f32 %v4144_v7, %v4143_v5  ;;  %v12481_v12 = vpop.f32.mrf.mxu0  ;;  %v4146_v10 = vsel %vm4134_vm10, %v4054_v8, 0.0  ;;  %v4269_v5 = vunpack.c.l.bf16 %v4210_v55  ;;  %v4194_v7 = vld [vmem:[%s14912_s9 + $0x58] sm:$0xff]  ;;  %v4278_v55 = vunpack.c.h.bf16 %v4214_v50 }
 0x53d   :  { %v12486_v13 = vpop.f32.mrf.mxu1  ;;  %v4254_v12 = vunpack.c.h.bf16 %v4202_v3 }
 0x53e   :  { %v4147_v15 = vadd.f32 %v4146_v10, %v4145_v11  ;;  %v4130_v16 = vpop.f32.mrf.mxu0  ;;  %v4252_v11 = vunpack.c.h.bf16 %v4201_v1  ;;  %v4251_v10 = vunpack.c.l.bf16 %v4201_v1  ;;  %v4253_v13 = vunpack.c.l.bf16 %v4202_v3  ;;  %v4190_v1 = vld [vmem:[%s14912_s9 + $0x38] sm:$0xff] }
 0x53f   :  { %v4148_v19 = vsel %vm4134_vm10, %v4130_v16, 0.0  ;;  %v4186_v16 = vld [vmem:[%s14912_s9 + $0x18] sm:$0xff] }
 0x540   :  { %v4149_v14 = vadd.f32 %v4148_v19, %v4147_v15  ;;  %v12491_v17 = vpop.f32.mrf.mxu0  ;;  %v4185_v15 = vld [vmem:[%s14912_s9 + $0x10] sm:$0xff]  ;;  %v4236_v19 = vunpack.c.h.bf16 %v4193_v6 }
 0x541   :  { %v4237_v17 = vunpack.c.l.bf16 %v4194_v7 }
 0x542   :  { %v4155_v21 = vadd.f32 %v11708_v20, %v4149_v14  ;;  %v4238_v20 = vunpack.c.h.bf16 %v4194_v7  ;;  %v4235_v14 = vunpack.c.l.bf16 %v4193_v6  ;;  %v4230_v7 = vunpack.c.h.bf16 %v4190_v1 }
 0x544   :  { %v4156_v22 = vadd.f32 %v4155_v21, %v13128_v39  ;;  %v4266_v39 = vunpack.c.h.bf16 %v4208_v31  ;;  %v4220_v21 = vunpack.c.h.bf16 %v4185_v15 }
 0x546   :  { %v4159_v24 = vsel %vm4134_vm10, %v4156_v22, 0.0  ;;  %4557 = vmatprep.subr.mxu0 %v4266_v39 }
 0x547   :  { %4160 = vadd.xlane.f32.xlu0 %v4159_v24  ;;  %4558 = vmatpush1.msra.mxu0 %v4265_v34  ;;  %v4219_v24 = vunpack.c.l.bf16 %v4185_v15  ;;  %v4196_v34 = vld [vmem:[%s14912_s9 + $0x68] sm:$0xff] }
 0x548   :  { %4559 = vmatprep.subr.mxu0 %v4250_v38  ;;  %v4242_v43 = vunpack.c.h.bf16 %v4196_v34 }
 0x549   :  { %4560 = vmatpush1.msra.mxu0 %v4249_v41  ;;  %v4188_v41 = vld [vmem:[%s14912_s9 + $0x28] sm:$0xff] }
 0x54a   :  { %4561 = vmatprep.subr.mxu0 %v4234_v45  ;;  %v4241_v45 = vunpack.c.l.bf16 %v4196_v34 }
 0x54b   :  { %4562 = vmatpush1.msra.mxu0 %v4233_v47  ;;  %v4226_v47 = vunpack.c.h.bf16 %v4188_v41 }
 0x54c   :  { %4563 = vmatprep.subr.mxu0 %v4218_v51  ;;  %v4225_v51 = vunpack.c.l.bf16 %v4188_v41 }
 0x54d   :  { %4564 = vmatpush1.msra.mxu0 %v4217_v53  ;;  %v4206_v53 = vld [vmem:[%s14912_s9 + $0xb8] sm:$0xff] }
 0x54e   :  { %4699 = vmatprep.subr.mxu0 %v4270_v57  ;;  %v4277_v57 = vunpack.c.l.bf16 %v4214_v50 }
 0x5d0   :  { %v4161_v18 = vpop.xlane.xlu0 %4160 }
 0x5d1   :  { %v4163_v25 = vmul.f32 0.03125, %v4161_v18  ;;  %v4211_v18 = vld [vmem:[%s14912_s9 + $0xe0] sm:$0xff] }
 0x5d2   :  { %v4272_v29 = vunpack.c.h.bf16 %v4211_v18  ;;  %v4271_v32 = vunpack.c.l.bf16 %v4211_v18 }
 0x5d3   :  { %v4164_v26 = vsub.f32 %v4156_v22, %v4163_v25  ;;  %v4222_v22 = vunpack.c.h.bf16 %v4186_v16  ;;  %v4212_v25 = vld [vmem:[%s14912_s9 + $0xe8] sm:$0xff] }
 0x5d4   :  { %v4274_v31 = vunpack.c.h.bf16 %v4212_v25  ;;  %v4273_v39 = vunpack.c.l.bf16 %v4212_v25  ;;  %v4287_v25 = vld [vmem:[%s14914_s11 + $0x40] sm:$0xff] }
 0x5d5   :  { %v4165_v27 = vmul.f32 %v4164_v26, %v4164_v26 }
 0x5d7   :  { %v4166_v28 = vsel %vm4134_vm10, %v4165_v27, 0.0  ;;  %v4203_v27 = vld [vmem:[%s14912_s9 + $0xa0] sm:$0xff] }
 0x5d8   :  { %4167 = vadd.xlane.f32.xlu1 %v4166_v28  ;;  %v4204_v28 = vld [vmem:[%s14912_s9 + $0xa8] sm:$0xff]  ;;  %v4256_v35 = vunpack.c.h.bf16 %v4203_v27  ;;  %v4255_v37 = vunpack.c.l.bf16 %v4203_v27  ;;  %v4328_v27 = vunpack.c.h.bf16 %v4287_v25 }
 0x5d9   :  { %v4258_v36 = vunpack.c.h.bf16 %v4204_v28  ;;  %v4257_v38 = vunpack.c.l.bf16 %v4204_v28 }
 0x661   :  { %v4168_v58 = vpop.xlane.xlu1 %4167 }
 0x662   :  { %v4169_v59 = vmul.f32 0.03125, %v4168_v58  ;;  %v4197_v58 = vld [vmem:[%s14912_s9 + $0x70] sm:$0xff] }
 0x663   :  { %v4244_v3 = vunpack.c.h.bf16 %v4197_v58 }
 0x664   :  { %v4170_v60 = vadd.f32 1e-05, %v4169_v59  ;;  %v4198_v59 = vld [vmem:[%s14912_s9 + $0x78] sm:$0xff] }
 0x666   :  { %12811 = vrsqrt.f32 %v4170_v60  ;;  %v4260_v60 = vunpack.c.h.bf16 %v4205_v52 }
 0x673   :  { %v12812_v61 = vpop.eup %12811 }
 0x674   :  { %v4172_v63 = vmul.f32 %v12812_v61, %v4164_v26  ;;  %v4221_v26 = vunpack.c.l.bf16 %v4186_v16  ;;  %v4262_v61 = vunpack.c.h.bf16 %v4206_v53 }
 0x676   :  { %v4177_v9 = vmul.f32 %v11709_v62, %v4172_v63  ;;  %v4259_v62 = vunpack.c.l.bf16 %v4205_v52  ;;  %v4261_v63 = vunpack.c.l.bf16 %v4206_v53 }
 0x678   :  { %v13659_v8 = vadd.f32 %v11710_v0, %v4177_v9  ;;  %v4189_v0 = vld [vmem:[%s14912_s9 + $0x30] sm:$0xff]  ;;  %v4246_v9 = vunpack.c.h.bf16 %v4198_v59 }
 0x679   :  { %v4228_v6 = vunpack.c.h.bf16 %v4189_v0 }
 0x67a   :  { %11711 = vmatmul.mubr.msk.f32.vlgmr.msra.gmra.mxu1 %vm438_vm3, %v13659_v8  ;;  %11712 = vmatmul.mubr.msk.f32.vlgmr.msra.gmra.mxu0 %vm438_vm3, %v13659_v8 }
 0x67b   :  { %4629 = vmatpush1.msra.mxu1 %v4267_v4  ;;  %4700 = vmatpush1.msra.mxu0 %v4269_v5  ;;  %v4243_v4 = vunpack.c.l.bf16 %v4197_v58  ;;  %v4245_v5 = vunpack.c.l.bf16 %v4198_v59 }
 0x67c   :  { %4630 = vmatprep.subr.mxu1 %v4252_v11  ;;  %4701 = vmatprep.subr.mxu0 %v4254_v12  ;;  %v4227_v11 = vunpack.c.l.bf16 %v4189_v0  ;;  %v4229_v12 = vunpack.c.l.bf16 %v4190_v1 }
 0x67d   :  { %4631 = vmatpush1.msra.mxu1 %v4251_v10  ;;  %4702 = vmatpush1.msra.mxu0 %v4253_v13  ;;  %v4303_v10 = vld [vmem:[%s14914_s11 + $0xc0] sm:$0xff]  ;;  %v4304_v13 = vld [vmem:[%s14914_s11 + $0xc8] sm:$0xff] }
 0x67e   :  { %4632 = vmatprep.subr.mxu1 %v4236_v19  ;;  %4703 = vmatprep.subr.mxu0 %v4238_v20  ;;  %v4360_v15 = vunpack.c.h.bf16 %v4303_v10  ;;  %v4362_v16 = vunpack.c.h.bf16 %v4304_v13  ;;  %v4359_v19 = vunpack.c.l.bf16 %v4303_v10  ;;  %v4361_v20 = vunpack.c.l.bf16 %v4304_v13 }
 0x67f   :  { %4633 = vmatpush1.msra.mxu1 %v4235_v14  ;;  %4704 = vmatpush1.msra.mxu0 %v4237_v17  ;;  %v4295_v14 = vld [vmem:[%s14914_s11 + $0x80] sm:$0xff]  ;;  %v4296_v17 = vld [vmem:[%s14914_s11 + $0x88] sm:$0xff] }
 0x680   :  { %4634 = vmatprep.subr.mxu1 %v4220_v21  ;;  %4705 = vmatprep.subr.mxu0 %v4222_v22  ;;  %v4344_v21 = vunpack.c.h.bf16 %v4295_v14  ;;  %v4346_v22 = vunpack.c.h.bf16 %v4296_v17  ;;  %v4345_v18 = vunpack.c.l.bf16 %v4296_v17 }
 0x681   :  { %4635 = vmatpush1.msra.mxu1 %v4219_v24  ;;  %4668 = vmatprep.mubr.f32.mxu1 %v12947_v2  ;;  %v4343_v24 = vunpack.c.l.bf16 %v4295_v14 }
 0x682   :  { %4706 = vmatpush1.msra.mxu0 %v4221_v26  ;;  %4739 = vmatprep.mubr.f32.mxu0 %v12947_v2  ;;  %v4288_v26 = vld [vmem:[%s14914_s11 + $0x48] sm:$0xff] }
 0x683   :  { %11713 = vmatmul.mubr.msk.f32.vlgmr.msra.gmra.mxu1 %vm438_vm3, %v13659_v8  ;;  %11714 = vmatmul.mubr.msk.f32.vlgmr.msra.gmra.mxu0 %vm438_vm3, %v13659_v8  ;;  %v4330_v28 = vunpack.c.h.bf16 %v4288_v26 }
 0x684   :  { %4770 = vmatprep.subr.mxu1 %v4272_v29  ;;  %4841 = vmatprep.subr.mxu0 %v4274_v31  ;;  %v4327_v29 = vunpack.c.l.bf16 %v4287_v25  ;;  %v4329_v31 = vunpack.c.l.bf16 %v4288_v26 }
 0x685   :  { %4771 = vmatpush1.msra.mxu1 %v4271_v32  ;;  %4842 = vmatpush1.msra.mxu0 %v4273_v39  ;;  %v4279_v32 = vld [vmem:[%s14914_s11] sm:$0xff]  ;;  %v4280_v39 = vld [vmem:[%s14914_s11 + $0x8] sm:$0xff] }
 0x686   :  { %4772 = vmatprep.subr.mxu1 %v4256_v35  ;;  %4843 = vmatprep.subr.mxu0 %v4258_v36  ;;  %v4312_v33 = vunpack.c.h.bf16 %v4279_v32  ;;  %v4314_v34 = vunpack.c.h.bf16 %v4280_v39  ;;  %v4311_v35 = vunpack.c.l.bf16 %v4279_v32  ;;  %v4313_v36 = vunpack.c.l.bf16 %v4280_v39 }
 0x687   :  { %4773 = vmatpush1.msra.mxu1 %v4255_v37  ;;  %4844 = vmatpush1.msra.mxu0 %v4257_v38  ;;  %v13764_v37 = vld [vmem:[%s14914_s11 + $0xd0] sm:$0xff]  ;;  %v13769_v38 = vld [vmem:[%s14914_s11 + $0xd8] sm:$0xff] }
 0x688   :  { %4774 = vmatprep.subr.mxu1 %v4240_v42  ;;  %4845 = vmatprep.subr.mxu0 %v4242_v43  ;;  %v4364_v40 = vunpack.c.h.bf16 %v13764_v37  ;;  %v4366_v41 = vunpack.c.h.bf16 %v13769_v38  ;;  %v4379_v42 = vlaneseq }
 0x689   :  { %4775 = vmatpush1.msra.mxu1 %v4239_v44  ;;  %4846 = vmatpush1.msra.mxu0 %v4241_v45 }
 0x68a   :  { %4776 = vmatprep.subr.mxu1 %v4224_v46  ;;  %4847 = vmatprep.subr.mxu0 %v4226_v47  ;;  %v4380_v43 = vshrl.u32 %v4379_v42, 7  ;;  %v4375_v46 = vld [vmem:[%s14913_s10] sm:$0xff] }
 0x68b   :  { %4777 = vmatpush1.msra.mxu1 %v4223_v48  ;;  %4810 = vmatprep.mubr.f32.mxu1 %v12947_v2 }
 0x68c   :  { %4848 = vmatpush1.msra.mxu0 %v4225_v51  ;;  %4881 = vmatprep.mubr.f32.mxu0 %v12947_v2  ;;  %v13773_v44 = vsub.s32 0, %v4380_v43  ;;  %v13775_v45 = vsub.s32 2, %v4380_v43  ;;  %v13780_v47 = vsub.s32 1, %v4380_v43  ;;  %v13782_v48 = vsub.s32 3, %v4380_v43 }
 0x68d   :  { %11715 = vmatmul.mubr.msk.f32.vlgmr.msra.gmra.mxu1 %vm438_vm3, %v13659_v8  ;;  %11716 = vmatmul.mubr.msk.f32.vlgmr.msra.gmra.mxu0 %vm438_vm3, %v13659_v8  ;;  %v13790_v0 = vsub.s32 7, %v4380_v43 }
 0x68e   :  { %4912 = vmatprep.subr.mxu1 %v4276_v54  ;;  %4983 = vmatprep.subr.mxu0 %v4278_v55  ;;  %v4382_v49 = vrot.slane %v4375_v46, %v13773_v44  ;;  %v4390_v50 = vrot.slane %v4375_v46, %v13775_v45  ;;  %v4386_v53 = vrot.slane %v4375_v46, %v13780_v47 }
 0x68f   :  { %4913 = vmatpush1.msra.mxu1 %v4275_v56  ;;  %4984 = vmatpush1.msra.mxu0 %v4277_v57  ;;  %v4394_v54 = vrot.slane %v4375_v46, %v13782_v48 }
 0x690   :  { %4914 = vmatprep.subr.mxu1 %v4260_v60  ;;  %4985 = vmatprep.subr.mxu0 %v4262_v61 }
 0x691   :  { %4915 = vmatpush1.msra.mxu1 %v4259_v62  ;;  %4986 = vmatpush1.msra.mxu0 %v4261_v63  ;;  %v13788_v63 = vsub.s32 5, %v4380_v43 }
 0x692   :  { %4916 = vmatprep.subr.mxu1 %v4244_v3  ;;  %4987 = vmatprep.subr.mxu0 %v4246_v9  ;;  %v13792_v3 = vsub.s32 4, %v4380_v43 }
 0x693   :  { %4917 = vmatpush1.msra.mxu1 %v4243_v4  ;;  %4988 = vmatpush1.msra.mxu0 %v4245_v5  ;;  %v13794_v4 = vsub.s32 6, %v4380_v43 }
 0x694   :  { %4918 = vmatprep.subr.mxu1 %v4228_v6  ;;  %4989 = vmatprep.subr.mxu0 %v4230_v7  ;;  %v4402_v7 = vrot.slane %v4375_v46, %v13788_v63 }
 0x695   :  { %4919 = vmatpush1.msra.mxu1 %v4227_v11  ;;  %4952 = vmatprep.mubr.f32.mxu1 %v12947_v2  ;;  %v4410_v11 = vrot.slane %v4375_v46, %v13790_v0 }
 0x696   :  { %4990 = vmatpush1.msra.mxu0 %v4229_v12  ;;  %5023 = vmatprep.mubr.f32.mxu0 %v12947_v2  ;;  %v4398_v12 = vrot.slane %v4375_v46, %v13792_v3 }
 0x697   :  { %11717 = vmatmul.mubr.msk.f32.vlgmr.msra.gmra.mxu1 %vm438_vm3, %v13659_v8  ;;  %11718 = vmatmul.mubr.msk.f32.vlgmr.msra.gmra.mxu0 %vm438_vm3, %v13659_v8 }
 0x698   :  { %5139 = vmatprep.subr.mxu1 %v4360_v15  ;;  %5209 = vmatprep.subr.mxu0 %v4362_v16  ;;  %v4406_v15 = vrot.slane %v4375_v46, %v13794_v4 }
 0x699   :  { %5140 = vmatpush1.xpose.msra.mxu1 %v4359_v19  ;;  %5210 = vmatpush1.xpose.msra.mxu0 %v4361_v20 }
 0x69a   :  { %5141 = vmatprep.subr.mxu1 %v4344_v21  ;;  %5211 = vmatprep.subr.mxu0 %v4346_v22 }
 0x69d   :  { %5142 = vmatpush1.xpose.msra.mxu1 %v4343_v24  ;;  %5212 = vmatpush1.xpose.msra.mxu0 %v4345_v18  ;;  %v13814_v24 = vld [vmem:[%s14913_s10 + $0x8] sm:$0xff] }
 0x69e   :  { %5143 = vmatprep.subr.mxu1 %v4328_v27  ;;  %5213 = vmatprep.subr.mxu0 %v4330_v28  ;;  %v4418_v27 = vrot.slane %v13814_v24, %v13780_v47  ;;  %v4426_v28 = vrot.slane %v13814_v24, %v13782_v48 }
 0x6a1   :  { %5144 = vmatpush1.xpose.msra.mxu1 %v4327_v29  ;;  %5214 = vmatpush1.xpose.msra.mxu0 %v4329_v31 }
 0x6a2   :  { %5145 = vmatprep.subr.mxu1 %v4312_v33  ;;  %5215 = vmatprep.subr.mxu0 %v4314_v34 }
 0x6a5   :  { %5146 = vmatpush1.xpose.msra.mxu1 %v4311_v35  ;;  %5216 = vmatpush1.xpose.msra.mxu0 %v4313_v36  ;;  %v4414_v36 = vrot.slane %v13814_v24, %v13773_v44 }
 0x6a6   :  { %5279 = vmatprep.subr.mxu1 %v4364_v40  ;;  %5349 = vmatprep.subr.mxu0 %v4366_v41  ;;  %v4363_v40 = vunpack.c.l.bf16 %v13764_v37 }
 0x73a   :  { %v4528_v51 = vpop.f32.mrf.mxu1  ;;  %v4599_v52 = vpop.f32.mrf.mxu0 }
 0x73b   :  { %v4529_v55 = vadd.f32 %v4528_v51, %v4382_v49  ;;  %v4600_v56 = vadd.f32 %v4599_v52, %v4390_v50  ;;  %v4297_v49 = vld [vmem:[%s14914_s11 + $0x90] sm:$0xff] }
 0x73c   :  { %v4530_v57 = vpop.f32.mrf.mxu1  ;;  %v4601_v58 = vpop.f32.mrf.mxu0 }
 0x73d   :  { %v5046_v59 = vmul.f32 0.70710677, %v4529_v55  ;;  %v5048_v60 = vmul.f32 0.70710677, %v4600_v56  ;;  %v4531_v61 = vadd.f32 %v4530_v57, %v4386_v53  ;;  %v4602_v62 = vadd.f32 %v4601_v58, %v4394_v54  ;;  %v4298_v53 = vld [vmem:[%s14914_s11 + $0x98] sm:$0xff] }
 0x73e   :  { %v5030_v54 = vmul.f32 0.5, %v4529_v55  ;;  %v5032_v37 = vmul.f32 0.5, %v4600_v56  ;;  %v4365_v58 = vunpack.c.l.bf16 %v13769_v38  ;;  %v4289_v55 = vld [vmem:[%s14914_s11 + $0x50] sm:$0xff] }
 0x73f   :  { %12813 = verf.f32 %v5046_v59  ;;  %v5047_v1 = vmul.f32 0.70710677, %v4531_v61  ;;  %v5049_v9 = vmul.f32 0.70710677, %v4602_v62  ;;  %v5031_v50 = vmul.f32 0.5, %v4531_v61 }
 0x740   :  { %12815 = verf.f32 %v5048_v60  ;;  %v5033_v51 = vmul.f32 0.5, %v4602_v62  ;;  %v4350_v62 = vunpack.c.h.bf16 %v4298_v53 }
 0x741   :  { %12817 = verf.f32 %v5047_v1 }
 0x742   :  { %12819 = verf.f32 %v5049_v9  ;;  %v4348_v9 = vunpack.c.h.bf16 %v4297_v49 }
 0x743   :  { %v4670_v5 = vpop.f32.mrf.mxu1  ;;  %v4741_v6 = vpop.f32.mrf.mxu0 }
 0x744   :  { %v13804_v20 = vadd.f32 %v4670_v5, %v4398_v12  ;;  %v13807_v17 = vadd.f32 %v4741_v6, %v4406_v15  ;;  %v4422_v6 = vrot.slane %v13814_v24, %v13775_v45  ;;  %v4349_v15 = vunpack.c.l.bf16 %v4298_v53 }
 0x745   :  { %v4672_v10 = vpop.f32.mrf.mxu1  ;;  %v4743_v13 = vpop.f32.mrf.mxu0 }
 0x746   :  { %v13800_v16 = vadd.f32 %v4672_v10, %v4402_v7  ;;  %v13802_v19 = vadd.f32 %v4743_v13, %v4410_v11  ;;  %v5050_v22 = vmul.f32 0.70710677, %v13804_v20  ;;  %v5052_v31 = vmul.f32 0.70710677, %v13807_v17  ;;  %v4290_v11 = vld [vmem:[%s14914_s11 + $0x58] sm:$0xff] }
 0x747   :  { %v4434_v7 = vrot.slane %v13814_v24, %v13788_v63  ;;  %v4442_v10 = vrot.slane %v13814_v24, %v13790_v0  ;;  %v4347_v13 = vunpack.c.l.bf16 %v4297_v49 }
 0x748   :  { %v5051_v14 = vmul.f32 0.70710677, %v13800_v16  ;;  %v5053_v21 = vmul.f32 0.70710677, %v13802_v19 }
 0x74a   :  { %12821 = verf.f32 %v5051_v14 }
 0x74b   :  { %12823 = verf.f32 %v5053_v21  ;;  %v5035_v21 = vmul.f32 0.5, %v13800_v16  ;;  %v4282_v16 = vld [vmem:[%s14914_s11 + $0x18] sm:$0xff] }
 0x74c   :  { %v12814_v18 = vpop.eup %12813  ;;  %12825 = verf.f32 %v5050_v22 }
 0x74d   :  { %v4812_v25 = vpop.f32.mrf.mxu1  ;;  %v4883_v26 = vpop.f32.mrf.mxu0  ;;  %v5078_v35 = vadd.f32 1.0, %v12814_v18  ;;  %12827 = verf.f32 %v5052_v31 }
 0x74e   :  { %v12816_v29 = vpop.eup %12815  ;;  %v13854_v22 = vadd.f32 %v4812_v25, %v4414_v36  ;;  %v13856_v31 = vadd.f32 %v4883_v26, %v4422_v6  ;;  %v5037_v25 = vmul.f32 0.5, %v13802_v19  ;;  %v4331_v26 = vunpack.c.l.bf16 %v4289_v55  ;;  %v4307_v19 = vld [vmem:[%s14914_s11 + $0xe0] sm:$0xff] }
 0x74f   :  { %v12818_v32 = vpop.eup %12817  ;;  %v4814_v39 = vpop.f32.mrf.mxu1  ;;  %v5080_v41 = vadd.f32 1.0, %v12816_v29  ;;  %v5094_v5 = vmul.f32 %v5078_v35, %v5030_v54  ;;  %v4332_v29 = vunpack.c.h.bf16 %v4289_v55  ;;  %v5034_v6 = vmul.f32 0.5, %v13804_v20 }
 0x750   :  { %v4885_v33 = vpop.f32.mrf.mxu0  ;;  %v12820_v34 = vpop.eup %12819  ;;  %v13824_v42 = vadd.f32 %v4814_v39, %v4418_v27  ;;  %v5079_v46 = vadd.f32 1.0, %v12818_v32  ;;  %v4334_v32 = vunpack.c.h.bf16 %v4290_v11  ;;  %v4281_v39 = vld [vmem:[%s14914_s11 + $0x10] sm:$0xff]  ;;  %v4430_v20 = vrot.slane %v13814_v24, %v13792_v3 }
 0x751   :  { %v13826_v43 = vadd.f32 %v4885_v33, %v4426_v28  ;;  %v5081_v52 = vadd.f32 1.0, %v12820_v34  ;;  %v5096_v61 = vmul.f32 %v5080_v41, %v5032_v37  ;;  %v5054_v41 = vmul.f32 0.70710677, %v13854_v22  ;;  %v4308_v37 = vld [vmem:[%s14914_s11 + $0xe8] sm:$0xff] }
 0x752   :  { %v5055_v57 = vmul.f32 0.70710677, %v13824_v42  ;;  %v5095_v60 = vmul.f32 %v5079_v46, %v5031_v50  ;;  %v4333_v46 = vunpack.c.l.bf16 %v4290_v11  ;;  %v4316_v49 = vunpack.c.h.bf16 %v4281_v39 }
 0x753   :  { %v5057_v59 = vmul.f32 0.70710677, %v13826_v43  ;;  %v5097_v1 = vmul.f32 %v5081_v52, %v5033_v51  ;;  %v5056_v50 = vmul.f32 0.70710677, %v13856_v31  ;;  %v4318_v52 = vunpack.c.h.bf16 %v4282_v16 }
 0x754   :  { %12829 = verf.f32 %v5055_v57  ;;  %5179 = vmatprep.mubr.f32.mxu1 %v5095_v60  ;;  %v4317_v60 = vunpack.c.l.bf16 %v4282_v16  ;;  %v5036_v11 = vmul.f32 0.5, %v13807_v17  ;;  %v5041_v17 = vmul.f32 0.5, %v13826_v43 }
 0x755   :  { %12831 = verf.f32 %v5057_v59  ;;  %5249 = vmatprep.mubr.f32.mxu0 %v5097_v1  ;;  %5180 = vmatmul.mubr.f32.vlgmr.msra.gmra.mxu1 %v5094_v5  ;;  %v4368_v1 = vunpack.c.h.bf16 %v4307_v19 }
 0x756   :  { %5250 = vmatmul.mubr.f32.vlgmr.msra.gmra.mxu0 %v5096_v61  ;;  %5280 = vmatpush1.xpose.msra.mxu1 %v4363_v40  ;;  %12833 = verf.f32 %v5054_v41  ;;  %v4370_v61 = vunpack.c.h.bf16 %v4308_v37 }
 0x757   :  { %v13842_v38 = vpop.f32.mrf.mxu1  ;;  %v13844_v56 = vpop.f32.mrf.mxu0  ;;  %5350 = vmatpush1.xpose.msra.mxu0 %v4365_v58  ;;  %5281 = vmatprep.subr.mxu1 %v4348_v9  ;;  %v4315_v58 = vunpack.c.l.bf16 %v4281_v39  ;;  %12835 = verf.f32 %v5056_v50  ;;  %v4292_v39 = vld [vmem:[%s14914_s11 + $0x68] sm:$0xff] }
 0x758   :  { %v12822_v12 = vpop.eup %12821  ;;  %5351 = vmatprep.subr.mxu0 %v4350_v62 }
 0x759   :  { %v12824_v14 = vpop.eup %12823  ;;  %v4956_v18 = vpop.f32.mrf.mxu1  ;;  %v5083_v28 = vadd.f32 1.0, %v12822_v12  ;;  %v4367_v12 = vunpack.c.l.bf16 %v4307_v19  ;;  %v4309_v19 = vld [vmem:[%s14914_s11 + $0xf0] sm:$0xff] }
 0x75a   :  { %v5027_v27 = vpop.f32.mrf.mxu0  ;;  %v13861_v33 = vadd.f32 %v4956_v18, %v4434_v7  ;;  %v5085_v35 = vadd.f32 1.0, %v12824_v14  ;;  %5282 = vmatpush1.xpose.msra.mxu1 %v4347_v13  ;;  %v12826_v40 = vpop.eup %12825  ;;  %v4299_v7 = vld [vmem:[%s14914_s11 + $0xa0] sm:$0xff]  ;;  %v4300_v13 = vld [vmem:[%s14914_s11 + $0xa8] sm:$0xff]  ;;  %v5039_v14 = vmul.f32 0.5, %v13824_v42 }
 0x75b   :  { %v5099_v34 = vmul.f32 %v5083_v28, %v5035_v21  ;;  %v13867_v36 = vadd.f32 %v5027_v27, %v4442_v10  ;;  %5352 = vmatpush1.xpose.msra.mxu0 %v4349_v15  ;;  %5283 = vmatprep.subr.mxu1 %v4332_v29  ;;  %v12828_v53 = vpop.eup %12827  ;;  %v5082_v59 = vadd.f32 1.0, %v12826_v40  ;;  %v4369_v21 = vunpack.c.l.bf16 %v4308_v37  ;;  %v4291_v29 = vld [vmem:[%s14914_s11 + $0x60] sm:$0xff] }
 0x75c   :  { %v5101_v51 = vmul.f32 %v5085_v35, %v5037_v25  ;;  %5353 = vmatprep.subr.mxu0 %v4334_v32  ;;  %v5059_v54 = vmul.f32 0.70710677, %v13861_v33  ;;  %v5084_v5 = vadd.f32 1.0, %v12828_v53  ;;  %v4438_v27 = vrot.slane %v13814_v24, %v13794_v4  ;;  %v4283_v40 = vld [vmem:[%s14914_s11 + $0x20] sm:$0xff] }
 0x75d   :  { %5319 = vmatprep.mubr.f32.mxu1 %v5099_v34  ;;  %v5061_v57 = vmul.f32 0.70710677, %v13867_v36  ;;  %v5098_v15 = vmul.f32 %v5082_v59, %v5034_v6  ;;  %v4352_v28 = vunpack.c.h.bf16 %v4299_v7  ;;  %v4354_v32 = vunpack.c.h.bf16 %v4300_v13  ;;  %v4301_v6 = vld [vmem:[%s14914_s11 + $0xb0] sm:$0xff] }
 0x75e   :  { %5389 = vmatprep.mubr.f32.mxu0 %v5101_v51  ;;  %5284 = vmatpush1.xpose.msra.mxu1 %v4331_v26  ;;  %12837 = verf.f32 %v5059_v54  ;;  %v5100_v18 = vmul.f32 %v5084_v5, %v5036_v11  ;;  %v4351_v43 = vunpack.c.l.bf16 %v4299_v7  ;;  %v13900_v35 = vadd.f32 %v13842_v38, %v4430_v20  ;;  %v4284_v38 = vld [vmem:[%s14914_s11 + $0x28] sm:$0xff]  ;;  %v4310_v54 = vld [vmem:[%s14914_s11 + $0xf8] sm:$0xff] }
 0x75f   :  { %5354 = vmatpush1.xpose.msra.mxu0 %v4333_v46  ;;  %5285 = vmatprep.subr.mxu1 %v4316_v49  ;;  %12839 = verf.f32 %v5061_v57  ;;  %v4353_v24 = vunpack.c.l.bf16 %v4300_v13  ;;  %v4336_v16 = vunpack.c.h.bf16 %v4291_v29  ;;  %v13903_v25 = vadd.f32 %v13844_v56, %v4438_v27 }
 0x760   :  { %5355 = vmatprep.subr.mxu0 %v4318_v52  ;;  %v4338_v26 = vunpack.c.h.bf16 %v4292_v39  ;;  %v4335_v41 = vunpack.c.l.bf16 %v4291_v29  ;;  %v5058_v46 = vmul.f32 0.70710677, %v13900_v35  ;;  %v4337_v56 = vunpack.c.l.bf16 %v4292_v39 }
 0x761   :  { %v12830_v9 = vpop.eup %12829  ;;  %v4320_v49 = vunpack.c.h.bf16 %v4283_v40  ;;  %v5060_v51 = vmul.f32 0.70710677, %v13903_v25  ;;  %v4322_v52 = vunpack.c.h.bf16 %v4284_v38  ;;  %v4319_v57 = vunpack.c.l.bf16 %v4283_v40 }
 0x762   :  { %v12832_v62 = vpop.eup %12831  ;;  %v5087_v55 = vadd.f32 1.0, %v12830_v9  ;;  %5286 = vmatpush1.xpose.msra.mxu1 %v4315_v58  ;;  %12841 = verf.f32 %v5058_v46  ;;  %v4374_v5 = vunpack.c.h.bf16 %v4310_v54  ;;  %v4371_v7 = vunpack.c.l.bf16 %v4309_v19 }
 0x763   :  { %v5089_v10 = vadd.f32 1.0, %v12832_v62  ;;  %5356 = vmatpush1.xpose.msra.mxu0 %v4317_v60  ;;  %5419 = vmatprep.subr.mxu1 %v4368_v1  ;;  %v12834_v50 = vpop.eup %12833  ;;  %v4321_v60 = vunpack.c.l.bf16 %v4284_v38  ;;  %v4372_v1 = vunpack.c.h.bf16 %v4309_v19  ;;  %12843 = verf.f32 %v5060_v51 }
 0x764   :  { %5489 = vmatprep.subr.mxu0 %v4370_v61  ;;  %v5103_v42 = vmul.f32 %v5087_v55, %v5039_v14  ;;  %v12836_v53 = vpop.eup %12835  ;;  %v5086_v59 = vadd.f32 1.0, %v12834_v50  ;;  %v5038_v61 = vmul.f32 0.5, %v13854_v22  ;;  %v5040_v55 = vmul.f32 0.5, %v13856_v31  ;;  %v4293_v31 = vld [vmem:[%s14914_s11 + $0x70] sm:$0xff] }
 0x765   :  { %5320 = vmatmul.mubr.f32.vlgmr.msra.gmra.mxu1 %v5098_v15  ;;  %v5105_v34 = vmul.f32 %v5089_v10, %v5041_v17  ;;  %v5088_v9 = vadd.f32 1.0, %v12836_v53  ;;  %v5043_v13 = vmul.f32 0.5, %v13861_v33  ;;  %v4373_v22 = vunpack.c.l.bf16 %v4310_v54  ;;  %v4294_v17 = vld [vmem:[%s14914_s11 + $0x78] sm:$0xff] }
 0x766   :  { %5390 = vmatmul.mubr.f32.vlgmr.msra.gmra.mxu0 %v5100_v18  ;;  %5420 = vmatpush1.xpose.msra.mxu1 %v4367_v12  ;;  %v4302_v12 = vld [vmem:[%s14914_s11 + $0xb8] sm:$0xff]  ;;  %v5102_v10 = vmul.f32 %v5086_v59, %v5038_v61  ;;  %v5045_v14 = vmul.f32 0.5, %v13867_v36  ;;  %v4356_v20 = vunpack.c.h.bf16 %v4301_v6  ;;  %v4355_v27 = vunpack.c.l.bf16 %v4301_v6 }
 0x767   :  { %5459 = vmatprep.mubr.f32.mxu1 %v5103_v42  ;;  %5490 = vmatpush1.xpose.msra.mxu0 %v4369_v21  ;;  %v5104_v15 = vmul.f32 %v5088_v9, %v5040_v55  ;;  %v4358_v18 = vunpack.c.h.bf16 %v4302_v12  ;;  %v4357_v36 = vunpack.c.l.bf16 %v4302_v12  ;;  %v4342_v29 = vunpack.c.h.bf16 %v4294_v17  ;;  %v4285_v42 = vld [vmem:[%s14914_s11 + $0x30] sm:$0xff] }
 0x768   :  { %5529 = vmatprep.mubr.f32.mxu0 %v5105_v34  ;;  %5421 = vmatprep.subr.mxu1 %v4352_v28  ;;  %v4340_v28 = vunpack.c.h.bf16 %v4293_v31  ;;  %v4339_v39 = vunpack.c.l.bf16 %v4293_v31  ;;  %v4341_v34 = vunpack.c.l.bf16 %v4294_v17  ;;  %v4323_v40 = vunpack.c.l.bf16 %v4285_v42 }
 0x769   :  { %5491 = vmatprep.subr.mxu0 %v4354_v32  ;;  %v4286_v32 = vld [vmem:[%s14914_s11 + $0x38] sm:$0xff] }
 0x76a   :  { %5422 = vmatpush1.xpose.msra.mxu1 %v4351_v43  ;;  %v4324_v43 = vunpack.c.h.bf16 %v4285_v42 }
 0x76b   :  { %5492 = vmatpush1.xpose.msra.mxu0 %v4353_v24  ;;  %5423 = vmatprep.subr.mxu1 %v4336_v16  ;;  %v12838_v37 = vpop.eup %12837  ;;  %v4326_v16 = vunpack.c.h.bf16 %v4286_v32 }
 0x76c   :  { %5493 = vmatprep.subr.mxu0 %v4338_v26  ;;  %v12840_v58 = vpop.eup %12839  ;;  %v5091_v62 = vadd.f32 1.0, %v12838_v37 }
 0x76d   :  { %v5093_v11 = vadd.f32 1.0, %v12840_v58  ;;  %v11719_v58 = vld [vmem:[%s14906_s3 + $0x8] ss:$0 sm:$0xff] }
 0x76e   :  { %5424 = vmatpush1.xpose.msra.mxu1 %v4335_v41  ;;  %v5107_v21 = vmul.f32 %v5091_v62, %v5043_v13  ;;  %v4325_v41 = vunpack.c.l.bf16 %v4286_v32  ;;  %v11720_v32 = vld [vmem:[%s14906_s3 + $0x9] ss:$0 sm:$0xff] }
 0x76f   :  { %5494 = vmatpush1.xpose.msra.mxu0 %v4337_v56  ;;  %5425 = vmatprep.subr.mxu1 %v4320_v49  ;;  %v5109_v33 = vmul.f32 %v5093_v11, %v5045_v14  ;;  %v12842_v24 = vpop.eup %12841  ;;  %v5042_v56 = vmul.f32 0.5, %v13900_v35  ;;  %v5044_v49 = vmul.f32 0.5, %v13903_v25 }
 0x770   :  { %5495 = vmatprep.subr.mxu0 %v4322_v52  ;;  %v12844_v26 = vpop.eup %12843  ;;  %v5090_v38 = vadd.f32 1.0, %v12842_v24 }
 0x771   :  { %v5092_v46 = vadd.f32 1.0, %v12844_v26  ;;  %v11725_v26 = vld [vmem:[%s14909_s6 + $0x6c] sm:$0xf] }
 0x772   :  { %5426 = vmatpush1.xpose.msra.mxu1 %v4319_v57  ;;  %v5106_v50 = vmul.f32 %v5090_v38, %v5042_v56  ;;  %v11727_v38 = vld [vmem:[%s14909_s6 + $0x74] sm:$0xf]  ;;  %v11730_v56 = vld [vmem:[%s14909_s6 + $0x80] sm:$0xf] }
 0x773   :  { %5496 = vmatpush1.xpose.msra.mxu0 %v4321_v60  ;;  %5559 = vmatprep.subr.mxu1 %v4372_v1  ;;  %v5108_v51 = vmul.f32 %v5092_v46, %v5044_v49  ;;  %v11729_v46 = vld [vmem:[%s14909_s6 + $0x7c] sm:$0xf]  ;;  %v11731_v49 = vld [vmem:[%s14909_s6 + $0x84] sm:$0xf] }
 0x774   :  { %5629 = vmatprep.subr.mxu0 %v4374_v5 }
 0x775   :  { %5460 = vmatmul.mubr.f32.vlgmr.msra.gmra.mxu1 %v5102_v10 }
 0x776   :  { %5530 = vmatmul.mubr.f32.vlgmr.msra.gmra.mxu0 %v5104_v15  ;;  %5560 = vmatpush1.xpose.msra.mxu1 %v4371_v7 }
 0x777   :  { %5599 = vmatprep.mubr.f32.mxu1 %v5107_v21  ;;  %5630 = vmatpush1.xpose.msra.mxu0 %v4373_v22 }
 0x778   :  { %5669 = vmatprep.mubr.f32.mxu0 %v5109_v33  ;;  %5561 = vmatprep.subr.mxu1 %v4356_v20 }
 0x779   :  { %5631 = vmatprep.subr.mxu0 %v4358_v18 }
 0x77a   :  { %5562 = vmatpush1.xpose.msra.mxu1 %v4355_v27  ;;  %v11722_v27 = vld [vmem:[%s14909_s6 + $0x60] sm:$0xf] }
 0x77b   :  { %5632 = vmatpush1.xpose.msra.mxu0 %v4357_v36  ;;  %5563 = vmatprep.subr.mxu1 %v4340_v28  ;;  %v11723_v36 = vld [vmem:[%s14909_s6 + $0x64] sm:$0xf] }
 0x77c   :  { %5633 = vmatprep.subr.mxu0 %v4342_v29 }
 0x77e   :  { %5564 = vmatpush1.xpose.msra.mxu1 %v4339_v39 }
 0x77f   :  { %5634 = vmatpush1.xpose.msra.mxu0 %v4341_v34  ;;  %5565 = vmatprep.subr.mxu1 %v4324_v43  ;;  %v11721_v34 = vld [vmem:[%s14906_s3 + $0xa] ss:$0 sm:$0xff] }
 0x780   :  { %5635 = vmatprep.subr.mxu0 %v4326_v16  ;;  %v11724_v16 = vld [vmem:[%s14909_s6 + $0x68] sm:$0xf] }
 0x782   :  { %5566 = vmatpush1.xpose.msra.mxu1 %v4323_v40  ;;  %v11726_v40 = vld [vmem:[%s14909_s6 + $0x70] sm:$0xf] }
 0x783   :  { %5636 = vmatpush1.xpose.msra.mxu0 %v4325_v41  ;;  %12492 = vmatprep.subr.mxu1 %v12947_v2  ;;  %v11728_v41 = vld [vmem:[%s14909_s6 + $0x78] sm:$0xf] }
 0x784   :  { %12497 = vmatprep.subr.mxu0 %v12947_v2 }
 0x785   :  { %5600 = vmatmul.mubr.f32.vlgmr.msra.gmra.mxu1 %v5106_v50  ;;  %v11732_v50 = vld [vmem:[%s14909_s6 + $0x88] sm:$0xf] }
 0x786   :  { %5670 = vmatmul.mubr.f32.vlgmr.msra.gmra.mxu0 %v5108_v51  ;;  %12494 = vmatprep.mubr.msk.f32.mxu1 %vm12948_vm1, %v12947_v2  ;;  %v11733_v51 = vld [vmem:[%s14909_s6 + $0x8c] sm:$0xf] }
 0x787   :  { %12499 = vmatprep.mubr.msk.f32.mxu0 %vm12948_vm1, %v12947_v2  ;;  %12493 = vmatpush3.xpose.msk.msra.mxu1 %vm438_vm3, %v11722_v27  ;;  %v11770_v27 = vld [vmem:[%s14910_s7 + $0x18] ss:$0 sm:$0xff] }
 0x788   :  { %12498 = vmatpush3.xpose.msk.msra.mxu0 %vm438_vm3, %v11723_v36  ;;  %12502 = vmatprep.subr.mxu1 %v12947_v2  ;;  %v11771_v36 = vld [vmem:[%s14910_s7 + $0x19] ss:$0 sm:$0xff] }
 0x789   :  { %12507 = vmatprep.subr.mxu0 %v12947_v2 }
 0x815   :  { %v5181_v52 = vpop.f32.mrf.mxu1 }
 0x816   :  { %v5251_v35 = vpop.f32.mrf.mxu0  ;;  %v5182_v59 = vadd.f32 %v11719_v58, %v5181_v52  ;;  %v11734_v52 = vld [vmem:[%s14909_s6 + $0x90] sm:$0xf] }
 0x817   :  { %v5183_v19 = vpop.f32.mrf.mxu1  ;;  %v11742_v58 = vld [vmem:[%s14909_s6 + $0xb0] sm:$0xf] }
 0x818   :  { %v5253_v25 = vpop.f32.mrf.mxu0  ;;  %v5252_v5 = vadd.f32 %v5251_v35, %v5182_v59  ;;  %v11735_v35 = vld [vmem:[%s14909_s6 + $0x94] sm:$0xf]  ;;  %v11736_v19 = vld [vmem:[%s14909_s6 + $0x98] sm:$0xf] }
 0x819   :  { %v11737_v25 = vld [vmem:[%s14909_s6 + $0x9c] sm:$0xf]  ;;  %v11743_v59 = vld [vmem:[%s14909_s6 + $0xb4] sm:$0xf] }
 0x825   :  { %v5321_v53 = vpop.f32.mrf.mxu1 }
 0x826   :  { %v5391_v54 = vpop.f32.mrf.mxu0  ;;  %v5322_v62 = vadd.f32 %v5321_v53, %v5252_v5  ;;  %v11738_v53 = vld [vmem:[%s14909_s6 + $0xa0] sm:$0xf] }
 0x827   :  { %v5323_v37 = vpop.f32.mrf.mxu1 }
 0x828   :  { %v5393_v57 = vpop.f32.mrf.mxu0  ;;  %v5392_v6 = vadd.f32 %v5391_v54, %v5322_v62  ;;  %v11739_v54 = vld [vmem:[%s14909_s6 + $0xa4] sm:$0xf]  ;;  %v11740_v37 = vld [vmem:[%s14909_s6 + $0xa8] sm:$0xf] }
 0x829   :  { %v11741_v57 = vld [vmem:[%s14909_s6 + $0xac] sm:$0xf] }
 0x835   :  { %v5461_v60 = vpop.f32.mrf.mxu1 }
 0x836   :  { %v5531_v1 = vpop.f32.mrf.mxu0  ;;  %v5462_v55 = vadd.f32 %v5461_v60, %v5392_v6  ;;  %v11744_v60 = vld [vmem:[%s14909_s6 + $0xb8] sm:$0xf] }
 0x837   :  { %v5463_v9 = vpop.f32.mrf.mxu1 }
 0x838   :  { %v5533_v61 = vpop.f32.mrf.mxu0  ;;  %v5532_v7 = vadd.f32 %v5531_v1, %v5462_v55  ;;  %v11745_v1 = vld [vmem:[%s14909_s6 + $0xbc] sm:$0xf] }
 0x845   :  { %v5601_v11 = vpop.f32.mrf.mxu1 }
 0x846   :  { %v5602_v12 = vadd.f32 %v5601_v11, %v5532_v7  ;;  %v5671_v10 = vpop.f32.mrf.mxu0 }
 0x847   :  { %v5603_v13 = vpop.f32.mrf.mxu1 }
 0x848   :  { %v5672_v22 = vadd.f32 %v5671_v10, %v5602_v12  ;;  %v5673_v15 = vpop.f32.mrf.mxu0 }
 0x84a   :  { %v5675_v14 = vadd.f32 %v5672_v22, %v13659_v8 }
 0x84c   :  { %v5678_v20 = vsel %vm4134_vm10, %v5675_v14, 0.0 }
 0x84d   :  { %5679 = vadd.xlane.f32.xlu0 %v5678_v20 }
 0x8d6   :  { %v5680_v31 = vpop.xlane.xlu0 %5679 }
 0x8d7   :  { %v5681_v21 = vmul.f32 0.03125, %v5680_v31 }
 0x8d9   :  { %v5682_v18 = vsub.f32 %v5675_v14, %v5681_v21  ;;  %v11778_v21 = vld [vmem:[%s14910_s7 + $0x20] ss:$0 sm:$0xff] }
 0x8db   :  { %v5683_v17 = vmul.f32 %v5682_v18, %v5682_v18 }
 0x8dd   :  { %v5684_v33 = vsel %vm4134_vm10, %v5683_v17, 0.0 }
 0x8de   :  { %5685 = vadd.xlane.f32.xlu1 %v5684_v33 }
 0x967   :  { %v5686_v8 = vpop.xlane.xlu1 %5685 }
 0x968   :  { %v5687_v28 = vmul.f32 0.03125, %v5686_v8 }
 0x96a   :  { %v5688_v29 = vadd.f32 1e-05, %v5687_v28 }
 0x96c   :  { %12845 = vrsqrt.f32 %v5688_v29 }
 0x979   :  { %v12846_v42 = vpop.eup %12845 }
 0x97a   :  { %v5690_v39 = vmul.f32 %v12846_v42, %v5682_v18  ;;  %v11779_v18 = vld [vmem:[%s14910_s7 + $0x21] ss:$0 sm:$0xff] }
 0x97c   :  { %v5695_v43 = vmul.f32 %v11720_v32, %v5690_v39  ;;  %v11780_v32 = vld [vmem:[%s14910_s7 + $0x22] ss:$0 sm:$0xff]  ;;  %v11781_v39 = vld [vmem:[%s14910_s7 + $0x23] ss:$0 sm:$0xff] }
 0x97e   :  { %v13971_v24 = vadd.f32 %v11721_v34, %v5695_v43 }
 0x980   :  { %12495 = vmatmul.mubr.msk.f32.vlgmr.msra.gmra.mxu1 %vm438_vm3, %v13971_v24  ;;  %12500 = vmatmul.mubr.msk.f32.vlgmr.msra.gmra.mxu0 %vm438_vm3, %v13971_v24 }
 0x981   :  { %12503 = vmatpush3.xpose.msk.msra.mxu1 %vm438_vm3, %v11724_v16  ;;  %12508 = vmatpush3.xpose.msk.msra.mxu0 %vm438_vm3, %v11725_v26 }
 0x982   :  { %12504 = vmatprep.mubr.msk.f32.mxu1 %vm12948_vm1, %v12947_v2  ;;  %12509 = vmatprep.mubr.msk.f32.mxu0 %vm12948_vm1, %v12947_v2 }
 0x983   :  { %12512 = vmatprep.subr.mxu1 %v12947_v2  ;;  %12517 = vmatprep.subr.mxu0 %v12947_v2 }
 0x984   :  { %12505 = vmatmul.mubr.msk.f32.vlgmr.msra.gmra.mxu1 %vm438_vm3, %v13971_v24  ;;  %12510 = vmatmul.mubr.msk.f32.vlgmr.msra.gmra.mxu0 %vm438_vm3, %v13971_v24 }
 0x985   :  { %12513 = vmatpush3.xpose.msk.msra.mxu1 %vm438_vm3, %v11726_v40  ;;  %12518 = vmatpush3.xpose.msk.msra.mxu0 %vm438_vm3, %v11727_v38  ;;  %v11772_v40 = vld [vmem:[%s14910_s7 + $0x1a] ss:$0 sm:$0xff]  ;;  %v11773_v38 = vld [vmem:[%s14910_s7 + $0x1b] ss:$0 sm:$0xff] }
 0x986   :  { %12514 = vmatprep.mubr.msk.f32.mxu1 %vm12948_vm1, %v12947_v2  ;;  %12519 = vmatprep.mubr.msk.f32.mxu0 %vm12948_vm1, %v12947_v2 }
 0x987   :  { %12522 = vmatprep.subr.mxu1 %v12947_v2  ;;  %12527 = vmatprep.subr.mxu0 %v12947_v2 }
 0x988   :  { %12515 = vmatmul.mubr.msk.f32.vlgmr.msra.gmra.mxu1 %vm438_vm3, %v13971_v24  ;;  %12520 = vmatmul.mubr.msk.f32.vlgmr.msra.gmra.mxu0 %vm438_vm3, %v13971_v24 }
 0x989   :  { %12523 = vmatpush3.xpose.msk.msra.mxu1 %vm438_vm3, %v11728_v41  ;;  %12528 = vmatpush3.xpose.msk.msra.mxu0 %vm438_vm3, %v11729_v46 }
 0x98a   :  { %12524 = vmatprep.mubr.msk.f32.mxu1 %vm12948_vm1, %v12947_v2  ;;  %12529 = vmatprep.mubr.msk.f32.mxu0 %vm12948_vm1, %v12947_v2 }
 0x98b   :  { %12532 = vmatprep.subr.mxu1 %v12947_v2  ;;  %12537 = vmatprep.subr.mxu0 %v12947_v2 }
 0x98c   :  { %12525 = vmatmul.mubr.msk.f32.vlgmr.msra.gmra.mxu1 %vm438_vm3, %v13971_v24  ;;  %12530 = vmatmul.mubr.msk.f32.vlgmr.msra.gmra.mxu0 %vm438_vm3, %v13971_v24 }
 0x98d   :  { %12533 = vmatpush3.xpose.msk.msra.mxu1 %vm438_vm3, %v11730_v56  ;;  %12538 = vmatpush3.xpose.msk.msra.mxu0 %vm438_vm3, %v11731_v49 }
 0x98e   :  { %12534 = vmatprep.mubr.msk.f32.mxu1 %vm12948_vm1, %v12947_v2  ;;  %12539 = vmatprep.mubr.msk.f32.mxu0 %vm12948_vm1, %v12947_v2 }
 0x98f   :  { %12542 = vmatprep.subr.mxu1 %v12947_v2  ;;  %12547 = vmatprep.subr.mxu0 %v12947_v2 }
 0x990   :  { %12535 = vmatmul.mubr.msk.f32.vlgmr.msra.gmra.mxu1 %vm438_vm3, %v13971_v24  ;;  %12540 = vmatmul.mubr.msk.f32.vlgmr.msra.gmra.mxu0 %vm438_vm3, %v13971_v24 }
 0x991   :  { %12543 = vmatpush3.xpose.msk.msra.mxu1 %vm438_vm3, %v11732_v50  ;;  %12548 = vmatpush3.xpose.msk.msra.mxu0 %vm438_vm3, %v11733_v51  ;;  %v11782_v50 = vld [vmem:[%s14910_s7 + $0x24] ss:$0 sm:$0xff]  ;;  %v11783_v51 = vld [vmem:[%s14910_s7 + $0x25] ss:$0 sm:$0xff] }
 0x992   :  { %12544 = vmatprep.mubr.msk.f32.mxu1 %vm12948_vm1, %v12947_v2  ;;  %12549 = vmatprep.mubr.msk.f32.mxu0 %vm12948_vm1, %v12947_v2 }
 0x993   :  { %12552 = vmatprep.subr.mxu1 %v12947_v2  ;;  %12557 = vmatprep.subr.mxu0 %v12947_v2 }
 0x994   :  { %12545 = vmatmul.mubr.msk.f32.vlgmr.msra.gmra.mxu1 %vm438_vm3, %v13971_v24  ;;  %12550 = vmatmul.mubr.msk.f32.vlgmr.msra.gmra.mxu0 %vm438_vm3, %v13971_v24 }
 0x995   :  { %12553 = vmatpush3.xpose.msk.msra.mxu1 %vm438_vm3, %v11734_v52  ;;  %12558 = vmatpush3.xpose.msk.msra.mxu0 %vm438_vm3, %v11735_v35 }
 0x996   :  { %12554 = vmatprep.mubr.msk.f32.mxu1 %vm12948_vm1, %v12947_v2  ;;  %12559 = vmatprep.mubr.msk.f32.mxu0 %vm12948_vm1, %v12947_v2 }
 0x997   :  { %12562 = vmatprep.subr.mxu1 %v12947_v2  ;;  %12567 = vmatprep.subr.mxu0 %v12947_v2 }
 0x998   :  { %12555 = vmatmul.mubr.msk.f32.vlgmr.msra.gmra.mxu1 %vm438_vm3, %v13971_v24  ;;  %12560 = vmatmul.mubr.msk.f32.vlgmr.msra.gmra.mxu0 %vm438_vm3, %v13971_v24 }
 0x999   :  { %12563 = vmatpush3.xpose.msk.msra.mxu1 %vm438_vm3, %v11736_v19  ;;  %12568 = vmatpush3.xpose.msk.msra.mxu0 %vm438_vm3, %v11737_v25 }
 0x99a   :  { %12564 = vmatprep.mubr.msk.f32.mxu1 %vm12948_vm1, %v12947_v2  ;;  %12569 = vmatprep.mubr.msk.f32.mxu0 %vm12948_vm1, %v12947_v2 }
 0x99b   :  { %12572 = vmatprep.subr.mxu1 %v12947_v2  ;;  %12577 = vmatprep.subr.mxu0 %v12947_v2 }
 0x99c   :  { %12565 = vmatmul.mubr.msk.f32.vlgmr.msra.gmra.mxu1 %vm438_vm3, %v13971_v24  ;;  %12570 = vmatmul.mubr.msk.f32.vlgmr.msra.gmra.mxu0 %vm438_vm3, %v13971_v24 }
 0x99d   :  { %12573 = vmatpush3.xpose.msk.msra.mxu1 %vm438_vm3, %v11738_v53  ;;  %12578 = vmatpush3.xpose.msk.msra.mxu0 %vm438_vm3, %v11739_v54  ;;  %v11774_v53 = vld [vmem:[%s14910_s7 + $0x1c] ss:$0 sm:$0xff]  ;;  %v11775_v54 = vld [vmem:[%s14910_s7 + $0x1d] ss:$0 sm:$0xff] }
 0x99e   :  { %12574 = vmatprep.mubr.msk.f32.mxu1 %vm12948_vm1, %v12947_v2  ;;  %12579 = vmatprep.mubr.msk.f32.mxu0 %vm12948_vm1, %v12947_v2 }
 0x99f   :  { %12582 = vmatprep.subr.mxu1 %v12947_v2  ;;  %12587 = vmatprep.subr.mxu0 %v12947_v2 }
 0x9a0   :  { %12575 = vmatmul.mubr.msk.f32.vlgmr.msra.gmra.mxu1 %vm438_vm3, %v13971_v24  ;;  %12580 = vmatmul.mubr.msk.f32.vlgmr.msra.gmra.mxu0 %vm438_vm3, %v13971_v24 }
 0x9a1   :  { %12583 = vmatpush3.xpose.msk.msra.mxu1 %vm438_vm3, %v11740_v37  ;;  %12588 = vmatpush3.xpose.msk.msra.mxu0 %vm438_vm3, %v11741_v57 }
 0x9a2   :  { %12584 = vmatprep.mubr.msk.f32.mxu1 %vm12948_vm1, %v12947_v2  ;;  %12589 = vmatprep.mubr.msk.f32.mxu0 %vm12948_vm1, %v12947_v2 }
 0x9a3   :  { %12592 = vmatprep.subr.mxu1 %v12947_v2  ;;  %12597 = vmatprep.subr.mxu0 %v12947_v2 }
 0x9a4   :  { %12585 = vmatmul.mubr.msk.f32.vlgmr.msra.gmra.mxu1 %vm438_vm3, %v13971_v24  ;;  %12590 = vmatmul.mubr.msk.f32.vlgmr.msra.gmra.mxu0 %vm438_vm3, %v13971_v24 }
 0x9a5   :  { %12593 = vmatpush3.xpose.msk.msra.mxu1 %vm438_vm3, %v11742_v58  ;;  %12598 = vmatpush3.xpose.msk.msra.mxu0 %vm438_vm3, %v11743_v59 }
 0x9a6   :  { %12594 = vmatprep.mubr.msk.f32.mxu1 %vm12948_vm1, %v12947_v2  ;;  %12599 = vmatprep.mubr.msk.f32.mxu0 %vm12948_vm1, %v12947_v2 }
 0x9a7   :  { %12602 = vmatprep.subr.mxu1 %v12947_v2  ;;  %12607 = vmatprep.subr.mxu0 %v12947_v2 }
 0x9a8   :  { %12595 = vmatmul.mubr.msk.f32.vlgmr.msra.gmra.mxu1 %vm438_vm3, %v13971_v24  ;;  %12600 = vmatmul.mubr.msk.f32.vlgmr.msra.gmra.mxu0 %vm438_vm3, %v13971_v24 }
 0x9a9   :  { %12603 = vmatpush3.xpose.msk.msra.mxu1 %vm438_vm3, %v11744_v60  ;;  %12608 = vmatpush3.xpose.msk.msra.mxu0 %vm438_vm3, %v11745_v1  ;;  %v11784_v60 = vld [vmem:[%s14910_s7 + $0x26] ss:$0 sm:$0xff]  ;;  %v11785_v1 = vld [vmem:[%s14910_s7 + $0x27] ss:$0 sm:$0xff] }
 0x9aa   :  { %12604 = vmatprep.mubr.msk.f32.mxu1 %vm12948_vm1, %v12947_v2  ;;  %12609 = vmatprep.mubr.msk.f32.mxu0 %vm12948_vm1, %v12947_v2 }
 0x9ab   :  { %12612 = vmatprep.subr.mxu1 %v12947_v2  ;;  %12617 = vmatprep.subr.mxu0 %v12947_v2 }
 0x9ac   :  { %12605 = vmatmul.mubr.msk.f32.vlgmr.msra.gmra.mxu1 %vm438_vm3, %v13971_v24  ;;  %12610 = vmatmul.mubr.msk.f32.vlgmr.msra.gmra.mxu0 %vm438_vm3, %v13971_v24 }
 0x9ad   :  { %12614 = vmatprep.mubr.msk.f32.mxu1 %vm12948_vm1, %v12947_v2  ;;  %12619 = vmatprep.mubr.msk.f32.mxu0 %vm12948_vm1, %v12947_v2 }
 0xa40   :  { %v5967_v9 = vpop.f32.mrf.mxu1  ;;  %v6040_v5 = vpop.f32.mrf.mxu0 }
 0xa41   :  { %v5968_v34 = vadd.f32 %v11770_v27, %v5967_v9  ;;  %v6041_v43 = vadd.f32 %v11771_v36, %v6040_v5 }
 0xa42   :  { %v12496_v61 = vpop.f32.mrf.mxu1  ;;  %v12501_v62 = vpop.f32.mrf.mxu0 }
 0xa44   :  { %v6113_v6 = vpop.f32.mrf.mxu1  ;;  %v6186_v55 = vpop.f32.mrf.mxu0 }
 0xa45   :  { %v6114_v52 = vadd.f32 %v11772_v40, %v6113_v6  ;;  %v6187_v35 = vadd.f32 %v11773_v38, %v6186_v55  ;;  %v11776_v6 = vld [vmem:[%s14910_s7 + $0x1e] ss:$0 sm:$0xff]  ;;  %v11777_v55 = vld [vmem:[%s14910_s7 + $0x1f] ss:$0 sm:$0xff] }
 0xa46   :  { %v12506_v7 = vpop.f32.mrf.mxu1  ;;  %v12511_v11 = vpop.f32.mrf.mxu0 }
 0xa48   :  { %v6259_v12 = vpop.f32.mrf.mxu1  ;;  %v6332_v10 = vpop.f32.mrf.mxu0 }
 0xa49   :  { %v6260_v9 = vadd.f32 %v11774_v53, %v6259_v12  ;;  %v6333_v5 = vadd.f32 %v11775_v54, %v6332_v10 }
 0xa4a   :  { %v12516_v13 = vpop.f32.mrf.mxu1  ;;  %v12521_v22 = vpop.f32.mrf.mxu0 }
 0xa4b   :  { %v11786_v13 = vld [vmem:[%s14910_s7 + $0x28] ss:$0 sm:$0xff]  ;;  %v11787_v22 = vld [vmem:[%s14910_s7 + $0x29] ss:$0 sm:$0xff] }
 0xa4c   :  { %v14179_v15 = vpop.f32.mrf.mxu1  ;;  %v14181_v14 = vpop.f32.mrf.mxu0 }
 0xa4e   :  { %v12526_v20 = vpop.f32.mrf.mxu1  ;;  %v12531_v31 = vpop.f32.mrf.mxu0 }
 0xa4f   :  { %v6406_v20 = vadd.f32 %v11776_v6, %v14179_v15  ;;  %v6479_v31 = vadd.f32 %v11777_v55, %v14181_v14 }
 0xa50   :  { %v6551_v17 = vpop.f32.mrf.mxu1  ;;  %v6624_v33 = vpop.f32.mrf.mxu0 }
 0xa51   :  { %v6552_v8 = vadd.f32 %v11778_v21, %v6551_v17  ;;  %v6625_v28 = vadd.f32 %v11779_v18, %v6624_v33 }
 0xa52   :  { %v12536_v29 = vpop.f32.mrf.mxu1  ;;  %v12541_v42 = vpop.f32.mrf.mxu0 }
 0xa53   :  { %12613 = vmatpush3.xpose.msk.msra.mxu1 %vm2194_vm6, %v6552_v8  ;;  %12618 = vmatpush3.xpose.msk.msra.mxu0 %vm2194_vm6, %v6625_v28 }
 0xa54   :  { %v6697_v16 = vpop.f32.mrf.mxu1  ;;  %v6770_v26 = vpop.f32.mrf.mxu0  ;;  %12622 = vmatprep.subr.mxu1 %v12947_v2  ;;  %12627 = vmatprep.subr.mxu0 %v12947_v2 }
 0xa55   :  { %v6698_v41 = vadd.f32 %v11780_v32, %v6697_v16  ;;  %v6771_v46 = vadd.f32 %v11781_v39, %v6770_v26 }
 0xa56   :  { %v12546_v56 = vpop.f32.mrf.mxu1  ;;  %v12551_v49 = vpop.f32.mrf.mxu0  ;;  %12615 = vmatmul.mubr.msk.f32.vlgmr.msra.gmra.mxu1 %vm2194_vm6, %v5968_v34  ;;  %12620 = vmatmul.mubr.msk.f32.vlgmr.msra.gmra.mxu0 %vm2194_vm6, %v6041_v43 }
 0xa57   :  { %12623 = vmatpush3.xpose.msk.msra.mxu1 %vm2194_vm6, %v6698_v41  ;;  %12628 = vmatpush3.xpose.msk.msra.mxu0 %vm2194_vm6, %v6771_v46 }
 0xa58   :  { %v6843_v19 = vpop.f32.mrf.mxu1  ;;  %v6916_v25 = vpop.f32.mrf.mxu0  ;;  %12624 = vmatprep.mubr.msk.f32.mxu1 %vm12948_vm1, %v12947_v2  ;;  %12629 = vmatprep.mubr.msk.f32.mxu0 %vm12948_vm1, %v12947_v2 }
 0xa59   :  { %v6844_v37 = vadd.f32 %v11782_v50, %v6843_v19  ;;  %v6917_v57 = vadd.f32 %v11783_v51, %v6916_v25  ;;  %12632 = vmatprep.subr.mxu1 %v12947_v2  ;;  %12637 = vmatprep.subr.mxu0 %v12947_v2  ;;  %v12923_v50 = vld [vmem:[%s14908_s5] sm:$0x3f] }
 0xa5a   :  { %v12556_v58 = vpop.f32.mrf.mxu1  ;;  %v12561_v59 = vpop.f32.mrf.mxu0  ;;  %12625 = vmatmul.mubr.msk.f32.vlgmr.msra.gmra.mxu1 %vm2194_vm6, %v6114_v52  ;;  %12630 = vmatmul.mubr.msk.f32.vlgmr.msra.gmra.mxu0 %vm2194_vm6, %v6187_v35 }
 0xa5b   :  { %12633 = vmatpush3.xpose.msk.msra.mxu1 %vm2194_vm6, %v6844_v37  ;;  %12638 = vmatpush3.xpose.msk.msra.mxu0 %vm2194_vm6, %v6917_v57 }
 0xa5c   :  { %v6989_v61 = vpop.f32.mrf.mxu1  ;;  %v7062_v62 = vpop.f32.mrf.mxu0  ;;  %12634 = vmatprep.mubr.msk.f32.mxu1 %vm12948_vm1, %v12947_v2  ;;  %12639 = vmatprep.mubr.msk.f32.mxu0 %vm12948_vm1, %v12947_v2 }
 0xa5d   :  { %v6990_v7 = vadd.f32 %v11784_v60, %v6989_v61  ;;  %v7063_v11 = vadd.f32 %v11785_v1, %v7062_v62  ;;  %12642 = vmatprep.subr.mxu1 %v12947_v2  ;;  %12647 = vmatprep.subr.mxu0 %v12947_v2 }
 0xa5e   :  { %v12566_v12 = vpop.f32.mrf.mxu1  ;;  %v12571_v10 = vpop.f32.mrf.mxu0  ;;  %12635 = vmatmul.mubr.msk.f32.vlgmr.msra.gmra.mxu1 %vm2194_vm6, %v6260_v9  ;;  %12640 = vmatmul.mubr.msk.f32.vlgmr.msra.gmra.mxu0 %vm2194_vm6, %v6333_v5 }
 0xa5f   :  { %12643 = vmatpush3.xpose.msk.msra.mxu1 %vm2194_vm6, %v6990_v7  ;;  %12648 = vmatpush3.xpose.msk.msra.mxu0 %vm2194_vm6, %v7063_v11 }
 0xa60   :  { %v7135_v21 = vpop.f32.mrf.mxu1  ;;  %v7208_v18 = vpop.f32.mrf.mxu0  ;;  %12644 = vmatprep.mubr.msk.f32.mxu1 %vm12948_vm1, %v12947_v2  ;;  %12649 = vmatprep.mubr.msk.f32.mxu0 %vm12948_vm1, %v12947_v2 }
 0xa61   :  { %v7136_v17 = vadd.f32 %v11786_v13, %v7135_v21  ;;  %v7209_v33 = vadd.f32 %v11787_v22, %v7208_v18  ;;  %12652 = vmatprep.subr.mxu1 %v12947_v2  ;;  %12657 = vmatprep.subr.mxu0 %v12947_v2 }
 0xa62   :  { %v12576_v27 = vpop.f32.mrf.mxu1  ;;  %v12581_v36 = vpop.f32.mrf.mxu0  ;;  %12645 = vmatmul.mubr.msk.f32.vlgmr.msra.gmra.mxu1 %vm2194_vm6, %v6406_v20  ;;  %12650 = vmatmul.mubr.msk.f32.vlgmr.msra.gmra.mxu0 %vm2194_vm6, %v6479_v31 }
 0xa63   :  { %12653 = vmatpush3.msk.msra.mxu1 %vm2912_vm7, %v7136_v17  ;;  %12658 = vmatpush3.msk.msra.mxu0 %vm2912_vm7, %v7209_v33 }
 0xa64   :  { %v14277_v15 = vpop.f32.mrf.mxu1  ;;  %v14279_v14 = vpop.f32.mrf.mxu0  ;;  %12654 = vmatprep.mubr.msk.f32.mxu1 %vm12948_vm1, %v12947_v2  ;;  %12659 = vmatprep.mubr.msk.f32.mxu0 %vm12948_vm1, %v12947_v2 }
 0xa65   :  { %12662 = vmatprep.subr.mxu1 %v12947_v2  ;;  %12667 = vmatprep.subr.mxu0 %v12947_v2 }
 0xa66   :  { %v12586_v8 = vpop.f32.mrf.mxu1  ;;  %v12591_v28 = vpop.f32.mrf.mxu0 }
 0xa68   :  { %v14287_v29 = vpop.f32.mrf.mxu1  ;;  %v14289_v42 = vpop.f32.mrf.mxu0 }
 0xa6a   :  { %v12596_v32 = vpop.f32.mrf.mxu1  ;;  %v12601_v39 = vpop.f32.mrf.mxu0 }
 0xa6c   :  { %v14291_v34 = vpop.f32.mrf.mxu1  ;;  %v14293_v43 = vpop.f32.mrf.mxu0 }
 0xa6e   :  { %v12606_v16 = vpop.f32.mrf.mxu1  ;;  %v12611_v26 = vpop.f32.mrf.mxu0 }
 0xb16   :  { %v7722_v40 = vpop.f32.mrf.mxu1  ;;  %v7798_v38 = vpop.f32.mrf.mxu0 }
 0xb17   :  { %v8258_v41 = vmul.f32 0.5, %v7722_v40  ;;  %v8259_v46 = vmul.f32 0.5, %v7798_v38 }
 0xb18   :  { %v12616_v56 = vpop.f32.mrf.mxu1  ;;  %v12621_v49 = vpop.f32.mrf.mxu0 }
 0xb19   :  { %v8267_v51 = vadd.f32 %v12923_v50, %v8259_v46  ;;  %v8266_v52 = vadd.f32 %v12923_v50, %v8258_v41 }
 0xb1a   :  { %v7874_v35 = vpop.f32.mrf.mxu1  ;;  %v7950_v19 = vpop.f32.mrf.mxu0 }
 0xb1b   :  { %v8260_v25 = vmul.f32 0.5, %v7874_v35  ;;  %v8261_v53 = vmul.f32 0.5, %v7950_v19  ;;  %v8277_v54 = vsel %vm2819_vm8, %v8267_v51, -inf  ;;  %v8274_v37 = vsel %vm2819_vm8, %v8266_v52, -inf }
 0xb1c   :  { %8278 = vmax.xlane.f32.xlu1 %v8277_v54  ;;  %v12631_v57 = vpop.f32.mrf.mxu0  ;;  %8275 = vmax.xlane.f32.xlu0 %v8274_v37  ;;  %v12626_v58 = vpop.f32.mrf.mxu1 }
 0xb1d   :  { %v8269_v59 = vadd.f32 %v12923_v50, %v8261_v53  ;;  %v8268_v60 = vadd.f32 %v12923_v50, %v8260_v25 }
 0xb1e   :  { %v8026_v1 = vpop.f32.mrf.mxu1  ;;  %v8102_v9 = vpop.f32.mrf.mxu0 }
 0xb1f   :  { %v8262_v5 = vmul.f32 0.5, %v8026_v1  ;;  %v8263_v61 = vmul.f32 0.5, %v8102_v9  ;;  %v8283_v62 = vsel %vm2819_vm8, %v8269_v59, -inf  ;;  %v8280_v6 = vsel %vm2819_vm8, %v8268_v60, -inf }
 0xb20   :  { %8284 = vmax.xlane.f32.xlu1 %v8283_v62  ;;  %v12641_v55 = vpop.f32.mrf.mxu0  ;;  %8281 = vmax.xlane.f32.xlu0 %v8280_v6  ;;  %v12636_v7 = vpop.f32.mrf.mxu1 }
 0xb21   :  { %v8271_v11 = vadd.f32 %v12923_v50, %v8263_v61  ;;  %v8270_v12 = vadd.f32 %v12923_v50, %v8262_v5 }
 0xb22   :  { %v8178_v10 = vpop.f32.mrf.mxu1  ;;  %v8254_v13 = vpop.f32.mrf.mxu0 }
 0xb23   :  { %v8264_v22 = vmul.f32 0.5, %v8178_v10  ;;  %v8265_v20 = vmul.f32 0.5, %v8254_v13  ;;  %v8289_v31 = vsel %vm2819_vm8, %v8271_v11, -inf  ;;  %v8286_v21 = vsel %vm2819_vm8, %v8270_v12, -inf }
 0xb24   :  { %8290 = vmax.xlane.f32.xlu1 %v8289_v31  ;;  %v12651_v18 = vpop.f32.mrf.mxu0  ;;  %8287 = vmax.xlane.f32.xlu0 %v8286_v21  ;;  %v12646_v17 = vpop.f32.mrf.mxu1 }
 0xb25   :  { %v8273_v33 = vadd.f32 %v12923_v50, %v8265_v20  ;;  %v8272_v27 = vadd.f32 %v12923_v50, %v8264_v22 }
 0xb27   :  { %v8295_v36 = vsel %vm2819_vm8, %v8273_v33, -inf  ;;  %v8292_v8 = vsel %vm2819_vm8, %v8272_v27, -inf }
 0xb28   :  { %8296 = vmax.xlane.f32.xlu1 %v8295_v36  ;;  %8293 = vmax.xlane.f32.xlu0 %v8292_v8 }
 0xba5   :  { %v8279_v28 = vpop.xlane.xlu1 %8278  ;;  %v8276_v32 = vpop.xlane.xlu0 %8275 }
 0xba6   :  { %v8299_v39 = vsub.f32 %v8267_v51, %v8279_v28  ;;  %v8298_v16 = vsub.f32 %v8266_v52, %v8276_v32  ;;  %v11789_v32 = vld [vmem:[%s14910_s7 + $0x2b] ss:$0 sm:$0xff] }
 0xba8   :  { %v8308_v26 = vmul.f32 1.442695, %v8299_v39  ;;  %v8306_v40 = vmul.f32 1.442695, %v8298_v16 }
 0xba9   :  { %v8285_v38 = vpop.xlane.xlu1 %8284  ;;  %v8282_v41 = vpop.xlane.xlu0 %8281 }
 0xbaa   :  { %12847 = vpow2.f32 %v8308_v26  ;;  %v8301_v46 = vsub.f32 %v8269_v59, %v8285_v38  ;;  %v8300_v56 = vsub.f32 %v8268_v60, %v8282_v41  ;;  %v11788_v26 = vld [vmem:[%s14910_s7 + $0x2a] ss:$0 sm:$0xff]  ;;  %v7355_v41 = vadd.f32 %v11789_v32, %v14279_v14 }
 0xbab   :  { %12849 = vpow2.f32 %v8306_v40 }
 0xbac   :  { %v8312_v49 = vmul.f32 1.442695, %v8301_v46  ;;  %v8310_v50 = vmul.f32 1.442695, %v8300_v56  ;;  %v7282_v56 = vadd.f32 %v11788_v26, %v14277_v15 }
 0xbad   :  { %v8291_v35 = vpop.xlane.xlu1 %8290  ;;  %v8288_v19 = vpop.xlane.xlu0 %8287 }
 0xbae   :  { %12851 = vpow2.f32 %v8312_v49  ;;  %v8303_v25 = vsub.f32 %v8271_v11, %v8291_v35  ;;  %v8302_v53 = vsub.f32 %v8270_v12, %v8288_v19  ;;  %v11791_v49 = vld [vmem:[%s14910_s7 + $0x2d] ss:$0 sm:$0xff]  ;;  %v11790_v35 = vld [vmem:[%s14910_s7 + $0x2c] ss:$0 sm:$0xff] }
 0xbaf   :  { %12853 = vpow2.f32 %v8310_v50  ;;  %v7501_v14 = vadd.f32 %v11791_v49, %v14289_v42  ;;  %v11792_v42 = vld [vmem:[%s14910_s7 + $0x2e] ss:$0 sm:$0xff] }
 0xbb0   :  { %v8316_v54 = vmul.f32 1.442695, %v8303_v25  ;;  %v8314_v37 = vmul.f32 1.442695, %v8302_v53  ;;  %v7428_v53 = vadd.f32 %v11790_v35, %v14287_v29 }
 0xbb1   :  { %v8297_v51 = vpop.xlane.xlu1 %8296  ;;  %v8294_v52 = vpop.xlane.xlu0 %8293 }
 0xbb2   :  { %12855 = vpow2.f32 %v8316_v54  ;;  %v8305_v57 = vsub.f32 %v8273_v33, %v8297_v51  ;;  %v8304_v58 = vsub.f32 %v8272_v27, %v8294_v52  ;;  %v11793_v54 = vld [vmem:[%s14910_s7 + $0x2f] ss:$0 sm:$0xff] }
 0xbb3   :  { %12857 = vpow2.f32 %v8314_v37  ;;  %v7647_v52 = vadd.f32 %v11793_v54, %v14293_v43 }
 0xbb4   :  { %v8320_v1 = vmul.f32 1.442695, %v8305_v57  ;;  %v8318_v59 = vmul.f32 1.442695, %v8304_v58  ;;  %v7574_v58 = vadd.f32 %v11792_v42, %v14291_v34 }
 0xbb6   :  { %12859 = vpow2.f32 %v8320_v1 }
 0xbb7   :  { %v12848_v60 = vpop.eup %12847  ;;  %12861 = vpow2.f32 %v8318_v59 }
 0xbb8   :  { %v12850_v9 = vpop.eup %12849  ;;  %v8325_v5 = vsel %vm2819_vm8, %v12848_v60, 0.0 }
 0xbb9   :  { %8326 = vadd.xlane.f32.xlu1 %v8325_v5  ;;  %v8322_v61 = vsel %vm2819_vm8, %v12850_v9, 0.0  ;;  %v11877_v5 = vld [vmem:[%s14911_s8 + $0x2c] sm:$0xf] }
 0xbba   :  { %8323 = vadd.xlane.f32.xlu0 %v8322_v61 }
 0xbbb   :  { %v12852_v62 = vpop.eup %12851 }
 0xbbc   :  { %v12854_v6 = vpop.eup %12853  ;;  %v8331_v55 = vsel %vm2819_vm8, %v12852_v62, 0.0 }
 0xbbd   :  { %8332 = vadd.xlane.f32.xlu1 %v8331_v55  ;;  %v8328_v7 = vsel %vm2819_vm8, %v12854_v6, 0.0 }
 0xbbe   :  { %8329 = vadd.xlane.f32.xlu0 %v8328_v7 }
 0xbbf   :  { %v12856_v11 = vpop.eup %12855 }
 0xbc0   :  { %v14310_v12 = vpop.eup %12857  ;;  %v8337_v10 = vsel %vm2819_vm8, %v12856_v11, 0.0 }
 0xbc1   :  { %8338 = vadd.xlane.f32.xlu1 %v8337_v10  ;;  %v8334_v13 = vsel %vm2819_vm8, %v14310_v12, 0.0  ;;  %v11878_v10 = vld [vmem:[%s14911_s8 + $0x30] sm:$0xf] }
 0xbc2   :  { %8335 = vadd.xlane.f32.xlu0 %v8334_v13 }
 0xbc3   :  { %v14315_v22 = vpop.eup %12859 }
 0xbc4   :  { %v14317_v20 = vpop.eup %12861  ;;  %v8343_v31 = vsel %vm2819_vm8, %v14315_v22, 0.0 }
 0xbc5   :  { %8344 = vadd.xlane.f32.xlu1 %v8343_v31  ;;  %v8340_v21 = vsel %vm2819_vm8, %v14317_v20, 0.0  ;;  %v11881_v31 = vld [vmem:[%s14911_s8 + $0x3c] sm:$0xf] }
 0xbc6   :  { %8341 = vadd.xlane.f32.xlu0 %v8340_v21 }
 0xc42   :  { %v8327_v18 = vpop.xlane.xlu1 %8326 }
 0xc43   :  { %12863 = vrcp.f32 %v8327_v18  ;;  %v8324_v17 = vpop.xlane.xlu0 %8323  ;;  %v11880_v18 = vld [vmem:[%s14911_s8 + $0x38] sm:$0xf] }
 0xc44   :  { %12865 = vrcp.f32 %v8324_v17 }
 0xc46   :  { %v8333_v33 = vpop.xlane.xlu1 %8332 }
 0xc47   :  { %12867 = vrcp.f32 %v8333_v33  ;;  %v8330_v27 = vpop.xlane.xlu0 %8329 }
 0xc48   :  { %12869 = vrcp.f32 %v8330_v27 }
 0xc4a   :  { %v8339_v36 = vpop.xlane.xlu1 %8338 }
 0xc4b   :  { %12871 = vrcp.f32 %v8339_v36  ;;  %v8336_v8 = vpop.xlane.xlu0 %8335 }
 0xc4c   :  { %12873 = vrcp.f32 %v8336_v8 }
 0xc4e   :  { %v8345_v28 = vpop.xlane.xlu1 %8344 }
 0xc4f   :  { %12875 = vrcp.f32 %v8345_v28  ;;  %v8342_v39 = vpop.xlane.xlu0 %8341 }
 0xc50   :  { %v12864_v16 = vpop.eup %12863  ;;  %12877 = vrcp.f32 %v8342_v39 }
 0xc51   :  { %v12866_v40 = vpop.eup %12865  ;;  %v8349_v38 = vmul.f32 %v12864_v16, %v12848_v60  ;;  %v11874_v60 = vld [vmem:[%s14911_s8 + $0x20] sm:$0xf] }
 0xc52   :  { %v8347_v46 = vmul.f32 %v12866_v40, %v12850_v9  ;;  %v11875_v9 = vld [vmem:[%s14911_s8 + $0x24] sm:$0xf] }
 0xc53   :  { %12660 = vmatmul.mubr.msk.f32.vlgmr.msra.gmra.mxu0 %vm2908_vm9, %v8349_v38 }
 0xc54   :  { %v12868_v50 = vpop.eup %12867  ;;  %12655 = vmatmul.mubr.msk.f32.vlgmr.msra.gmra.mxu1 %vm2908_vm9, %v8347_v46  ;;  %12668 = vmatpush3.msk.msra.mxu0 %vm2912_vm7, %v7355_v41 }
 0xc55   :  { %v12870_v19 = vpop.eup %12869  ;;  %12663 = vmatpush3.msk.msra.mxu1 %vm2912_vm7, %v7282_v56  ;;  %12664 = vmatprep.mubr.msk.f32.mxu1 %vm12948_vm1, %v12947_v2  ;;  %v8353_v15 = vmul.f32 %v12868_v50, %v12852_v62  ;;  %v11876_v62 = vld [vmem:[%s14911_s8 + $0x28] sm:$0xf] }
 0xc56   :  { %12669 = vmatprep.mubr.msk.f32.mxu0 %vm12948_vm1, %v12947_v2  ;;  %12672 = vmatprep.subr.mxu1 %v12947_v2  ;;  %v8351_v25 = vmul.f32 %v12870_v19, %v12854_v6 }
 0xc57   :  { %12677 = vmatprep.subr.mxu0 %v12947_v2  ;;  %12670 = vmatmul.mubr.msk.f32.vlgmr.msra.gmra.mxu0 %vm2908_vm9, %v8353_v15 }
 0xc58   :  { %v12872_v37 = vpop.eup %12871  ;;  %12665 = vmatmul.mubr.msk.f32.vlgmr.msra.gmra.mxu1 %vm2908_vm9, %v8351_v25  ;;  %12678 = vmatpush3.msk.msra.mxu0 %vm2912_vm7, %v7501_v14 }
 0xc59   :  { %v12874_v51 = vpop.eup %12873  ;;  %12673 = vmatpush3.msk.msra.mxu1 %vm2912_vm7, %v7428_v53  ;;  %12674 = vmatprep.mubr.msk.f32.mxu1 %vm12948_vm1, %v12947_v2  ;;  %v8357_v29 = vmul.f32 %v12872_v37, %v12856_v11  ;;  %v11879_v11 = vld [vmem:[%s14911_s8 + $0x34] sm:$0xf] }
 0xc5a   :  { %12679 = vmatprep.mubr.msk.f32.mxu0 %vm12948_vm1, %v12947_v2  ;;  %12682 = vmatprep.subr.mxu1 %v12947_v2  ;;  %v8355_v57 = vmul.f32 %v12874_v51, %v14310_v12 }
 0xc5b   :  { %12687 = vmatprep.subr.mxu0 %v12947_v2  ;;  %12680 = vmatmul.mubr.msk.f32.vlgmr.msra.gmra.mxu0 %vm2908_vm9, %v8357_v29 }
 0xc5c   :  { %v12876_v1 = vpop.eup %12875  ;;  %12675 = vmatmul.mubr.msk.f32.vlgmr.msra.gmra.mxu1 %vm2908_vm9, %v8355_v57  ;;  %12688 = vmatpush3.msk.msra.mxu0 %vm2912_vm7, %v7647_v52 }
 0xc5d   :  { %v12878_v59 = vpop.eup %12877  ;;  %12683 = vmatpush3.msk.msra.mxu1 %vm2912_vm7, %v7574_v58  ;;  %12684 = vmatprep.mubr.msk.f32.mxu1 %vm12948_vm1, %v12947_v2  ;;  %v8361_v43 = vmul.f32 %v12876_v1, %v14315_v22 }
 0xc5e   :  { %12689 = vmatprep.mubr.msk.f32.mxu0 %vm12948_vm1, %v12947_v2  ;;  %v8359_v34 = vmul.f32 %v12878_v59, %v14317_v20  ;;  %12692 = vmatprep.subr.mxu1 %v12947_v2 }
 0xc5f   :  { %12690 = vmatmul.mubr.msk.f32.vlgmr.msra.gmra.mxu0 %vm2908_vm9, %v8361_v43  ;;  %12697 = vmatprep.subr.mxu0 %v12947_v2 }
 0xc60   :  { %12685 = vmatmul.mubr.msk.f32.vlgmr.msra.gmra.mxu1 %vm2908_vm9, %v8359_v34  ;;  %12699 = vmatprep.mubr.msk.f32.mxu0 %vm12948_vm1, %v12947_v2 }
 0xc61   :  { %12693 = vmatpush3.msk.msra.mxu1 %vm243_vm5, %v11874_v60  ;;  %12694 = vmatprep.mubr.msk.f32.mxu1 %vm12948_vm1, %v12947_v2 }
 0xc62   :  { %12702 = vmatprep.subr.mxu1 %v12947_v2  ;;  %12698 = vmatpush3.msk.msra.mxu0 %vm243_vm5, %v11875_v9 }
 0xc63   :  { %12707 = vmatprep.subr.mxu0 %v12947_v2 }
 0xd13   :  { %v8510_v61 = vpop.f32.mrf.mxu0 }
 0xd14   :  { %v8434_v6 = vpop.f32.mrf.mxu1  ;;  %12700 = vmatmul.mubr.msk.f32.vlgmr.msra.gmra.mxu0 %vm2194_vm6, %v8510_v61 }
 0xd15   :  { %12695 = vmatmul.mubr.msk.f32.vlgmr.msra.gmra.mxu1 %vm2194_vm6, %v8434_v6  ;;  %v12661_v55 = vpop.f32.mrf.mxu0  ;;  %12708 = vmatpush3.msk.msra.mxu0 %vm243_vm5, %v11877_v5  ;;  %v11898_v5 = vld [vmem:[%s14906_s3 + $0xb] ss:$0 sm:$0xff] }
 0xd16   :  { %v12656_v7 = vpop.f32.mrf.mxu1  ;;  %12703 = vmatpush3.msk.msra.mxu1 %vm243_vm5, %v11876_v62  ;;  %12704 = vmatprep.mubr.msk.f32.mxu1 %vm12948_vm1, %v12947_v2 }
 0xd17   :  { %v8662_v12 = vpop.f32.mrf.mxu0  ;;  %12709 = vmatprep.mubr.msk.f32.mxu0 %vm12948_vm1, %v12947_v2  ;;  %12712 = vmatprep.subr.mxu1 %v12947_v2 }
 0xd18   :  { %v8586_v13 = vpop.f32.mrf.mxu1  ;;  %12710 = vmatmul.mubr.msk.f32.vlgmr.msra.gmra.mxu0 %vm2194_vm6, %v8662_v12  ;;  %12717 = vmatprep.subr.mxu0 %v12947_v2 }
 0xd19   :  { %12705 = vmatmul.mubr.msk.f32.vlgmr.msra.gmra.mxu1 %vm2194_vm6, %v8586_v13  ;;  %v12671_v22 = vpop.f32.mrf.mxu0  ;;  %12718 = vmatpush3.msk.msra.mxu0 %vm243_vm5, %v11879_v11 }
 0xd1a   :  { %v12666_v20 = vpop.f32.mrf.mxu1  ;;  %12713 = vmatpush3.msk.msra.mxu1 %vm243_vm5, %v11878_v10  ;;  %12714 = vmatprep.mubr.msk.f32.mxu1 %vm12948_vm1, %v12947_v2  ;;  %v11925_v22 = vld [vmem:[%s14912_s9 + $0x1c0] sm:$0xff] }
 0xd1b   :  { %v8814_v21 = vpop.f32.mrf.mxu0  ;;  %12719 = vmatprep.mubr.msk.f32.mxu0 %vm12948_vm1, %v12947_v2  ;;  %12722 = vmatprep.subr.mxu1 %v12947_v2  ;;  %v11926_v20 = vld [vmem:[%s14912_s9 + $0x1c8] sm:$0xff] }
 0xd1c   :  { %v8738_v17 = vpop.f32.mrf.mxu1  ;;  %12720 = vmatmul.mubr.msk.f32.vlgmr.msra.gmra.mxu0 %vm2194_vm6, %v8814_v21  ;;  %12727 = vmatprep.subr.mxu0 %v12947_v2  ;;  %v9715_v21 = vunpack.c.l.bf16 %v11925_v22 }
 0xd1d   :  { %12715 = vmatmul.mubr.msk.f32.vlgmr.msra.gmra.mxu1 %vm2194_vm6, %v8738_v17  ;;  %v12681_v33 = vpop.f32.mrf.mxu0  ;;  %12728 = vmatpush3.msk.msra.mxu0 %vm243_vm5, %v11881_v31  ;;  %v9716_v31 = vunpack.c.h.bf16 %v11925_v22  ;;  %v11917_v17 = vld [vmem:[%s14912_s9 + $0x180] sm:$0xff] }
 0xd1e   :  { %v12676_v27 = vpop.f32.mrf.mxu1  ;;  %12723 = vmatpush3.msk.msra.mxu1 %vm243_vm5, %v11880_v18  ;;  %12724 = vmatprep.mubr.msk.f32.mxu1 %vm12948_vm1, %v12947_v2  ;;  %v9717_v18 = vunpack.c.l.bf16 %v11926_v20  ;;  %v11918_v33 = vld [vmem:[%s14912_s9 + $0x188] sm:$0xff] }
 0xd1f   :  { %v8966_v36 = vpop.f32.mrf.mxu0  ;;  %12729 = vmatprep.mubr.msk.f32.mxu0 %vm12948_vm1, %v12947_v2  ;;  %9940 = vmatprep.subr.mxu1 %v9716_v31  ;;  %v9700_v27 = vunpack.c.h.bf16 %v11917_v17 }
 0xd20   :  { %v8890_v8 = vpop.f32.mrf.mxu1  ;;  %12730 = vmatmul.mubr.msk.f32.vlgmr.msra.gmra.mxu0 %vm2194_vm6, %v8966_v36  ;;  %v9702_v36 = vunpack.c.h.bf16 %v11918_v33 }
 0xd21   :  { %12725 = vmatmul.mubr.msk.f32.vlgmr.msra.gmra.mxu1 %vm2194_vm6, %v8890_v8  ;;  %v12691_v28 = vpop.f32.mrf.mxu0  ;;  %10051 = vmatprep.mubr.f32.mxu0 %v12947_v2  ;;  %v9699_v8 = vunpack.c.l.bf16 %v11917_v17  ;;  %v11921_v17 = vld [vmem:[%s14912_s9 + $0x1a0] sm:$0xff] }
 0xd22   :  { %v12686_v32 = vpop.f32.mrf.mxu1  ;;  %9980 = vmatprep.mubr.f32.mxu1 %v12947_v2  ;;  %9941 = vmatpush1.msra.mxu1 %v9715_v21  ;;  %v9701_v28 = vunpack.c.l.bf16 %v11918_v33  ;;  %v11930_v21 = vld [vmem:[%s14912_s9 + $0x1e8] sm:$0xff] }
 0xd23   :  { %v11909_v32 = vld [vmem:[%s14912_s9 + $0x140] sm:$0xff]  ;;  %9942 = vmatprep.subr.mxu1 %v9700_v27  ;;  %v11922_v33 = vld [vmem:[%s14912_s9 + $0x1a8] sm:$0xff] }
 0xd24   :  { %9943 = vmatpush1.msra.mxu1 %v9699_v8 }
 0xdd4   :  { %v9127_v39 = vpop.f32.mrf.mxu0 }
 0xdd5   :  { %v9051_v16 = vpop.f32.mrf.mxu1  ;;  %v9588_v40 = vsel %vm4134_vm10, %v9127_v39, 0.0  ;;  %v11910_v39 = vld [vmem:[%s14912_s9 + $0x148] sm:$0xff] }
 0xdd6   :  { %v9587_v26 = vsel %vm4134_vm10, %v9051_v16, 0.0  ;;  %v12701_v38 = vpop.f32.mrf.mxu0  ;;  %v9684_v16 = vunpack.c.h.bf16 %v11909_v32 }
 0xdd7   :  { %v12696_v41 = vpop.f32.mrf.mxu1  ;;  %v9589_v56 = vadd.f32 %v9588_v40, %v9587_v26  ;;  %v9686_v26 = vunpack.c.h.bf16 %v11910_v39  ;;  %v9683_v40 = vunpack.c.l.bf16 %v11909_v32  ;;  %v9685_v38 = vunpack.c.l.bf16 %v11910_v39  ;;  %v11913_v32 = vld [vmem:[%s14912_s9 + $0x160] sm:$0xff]  ;;  %v11914_v39 = vld [vmem:[%s14912_s9 + $0x168] sm:$0xff] }
 0xdd8   :  { %v9279_v46 = vpop.f32.mrf.mxu0  ;;  %v11901_v41 = vld [vmem:[%s14912_s9 + $0x100] sm:$0xff]  ;;  %9944 = vmatprep.subr.mxu1 %v9684_v16  ;;  %v9708_v16 = vunpack.c.h.bf16 %v11921_v17 }
 0xdd9   :  { %v9203_v49 = vpop.f32.mrf.mxu1  ;;  %v9592_v14 = vsel %vm4134_vm10, %v9279_v46, 0.0  ;;  %v11902_v46 = vld [vmem:[%s14912_s9 + $0x108] sm:$0xff]  ;;  %9945 = vmatpush1.msra.mxu1 %v9683_v40  ;;  %v9707_v40 = vunpack.c.l.bf16 %v11921_v17  ;;  %v11949_v17 = vld [vmem:[%s14914_s11 + $0x180] sm:$0xff] }
 0xdda   :  { %v9590_v50 = vsel %vm4134_vm10, %v9203_v49, 0.0  ;;  %v12711_v35 = vpop.f32.mrf.mxu0  ;;  %v9668_v49 = vunpack.c.h.bf16 %v11901_v41 }
 0xddb   :  { %v9591_v19 = vadd.f32 %v9590_v50, %v9589_v56  ;;  %v12706_v15 = vpop.f32.mrf.mxu1  ;;  %v9667_v56 = vunpack.c.l.bf16 %v11901_v41  ;;  %v9669_v50 = vunpack.c.l.bf16 %v11902_v46  ;;  %v9670_v35 = vunpack.c.h.bf16 %v11902_v46  ;;  %v11905_v41 = vld [vmem:[%s14912_s9 + $0x120] sm:$0xff]  ;;  %v11906_v46 = vld [vmem:[%s14912_s9 + $0x128] sm:$0xff] }
 0xddc   :  { %v9431_v25 = vpop.f32.mrf.mxu0  ;;  %v11928_v15 = vld [vmem:[%s14912_s9 + $0x1d8] sm:$0xff]  ;;  %9946 = vmatprep.subr.mxu1 %v9668_v49  ;;  %v9694_v49 = vunpack.c.h.bf16 %v11914_v39 }
 0xddd   :  { %v9593_v53 = vadd.f32 %v9592_v14, %v9591_v19  ;;  %v9355_v54 = vpop.f32.mrf.mxu1  ;;  %v9596_v52 = vsel %vm4134_vm10, %v9431_v25, 0.0  ;;  %v11927_v19 = vld [vmem:[%s14912_s9 + $0x1d0] sm:$0xff]  ;;  %v9722_v25 = vunpack.c.h.bf16 %v11928_v15  ;;  %9947 = vmatpush1.msra.mxu1 %v9667_v56  ;;  %v9692_v56 = vunpack.c.h.bf16 %v11913_v32 }
 0xdde   :  { %v9594_v37 = vsel %vm4134_vm10, %v9355_v54, 0.0  ;;  %v12721_v42 = vpop.f32.mrf.mxu0  ;;  %v9720_v14 = vunpack.c.h.bf16 %v11927_v19 }
 0xddf   :  { %v9595_v51 = vadd.f32 %v9594_v37, %v9593_v53  ;;  %v12716_v29 = vpop.f32.mrf.mxu1 }
 0xde0   :  { %v9583_v57 = vpop.f32.mrf.mxu0  ;;  %10082 = vmatprep.subr.mxu1 %v9720_v14  ;;  %v9675_v14 = vunpack.c.l.bf16 %v11905_v41 }
 0xde1   :  { %v9597_v58 = vadd.f32 %v9596_v52, %v9595_v51  ;;  %v9507_v1 = vpop.f32.mrf.mxu1  ;;  %v9600_v9 = vsel %vm4134_vm10, %v9583_v57, 0.0  ;;  %v11899_v51 = vld [vmem:[%s14906_s3 + $0xc] ss:$0 sm:$0xff]  ;;  %v11900_v52 = vld [vmem:[%s14906_s3 + $0xd] ss:$0 sm:$0xff]  ;;  %v11919_v57 = vld [vmem:[%s14912_s9 + $0x190] sm:$0xff] }
 0xde2   :  { %v9598_v59 = vsel %vm4134_vm10, %v9507_v1, 0.0  ;;  %v12731_v43 = vpop.f32.mrf.mxu0 }
 0xde3   :  { %v9599_v34 = vadd.f32 %v9598_v59, %v9597_v58  ;;  %v12726_v60 = vpop.f32.mrf.mxu1  ;;  %v11920_v58 = vld [vmem:[%s14912_s9 + $0x198] sm:$0xff]  ;;  %v9719_v59 = vunpack.c.l.bf16 %v11927_v19  ;;  %v9721_v43 = vunpack.c.l.bf16 %v11928_v15  ;;  %v9676_v19 = vunpack.c.h.bf16 %v11905_v41  ;;  %v11933_v41 = vld [vmem:[%s14914_s11 + $0x100] sm:$0xff] }
 0xde4   :  { %v11912_v60 = vld [vmem:[%s14912_s9 + $0x158] sm:$0xff]  ;;  %v9678_v15 = vunpack.c.h.bf16 %v11906_v46 }
 0xde5   :  { %v9601_v61 = vadd.f32 %v9600_v9, %v9599_v34  ;;  %v11911_v34 = vld [vmem:[%s14912_s9 + $0x150] sm:$0xff] }
 0xde7   :  { %v9607_v62 = vadd.f32 %v11898_v5, %v9601_v61  ;;  %v9704_v5 = vunpack.c.h.bf16 %v11919_v57  ;;  %v9706_v61 = vunpack.c.h.bf16 %v11920_v58 }
 0xde9   :  { %v9608_v6 = vadd.f32 %v9607_v62, %v13971_v24  ;;  %v9718_v24 = vunpack.c.h.bf16 %v11926_v20  ;;  %v9703_v62 = vunpack.c.l.bf16 %v11919_v57 }
 0xdeb   :  { %v9611_v55 = vsel %vm4134_vm10, %v9608_v6, 0.0  ;;  %10011 = vmatprep.subr.mxu0 %v9718_v24  ;;  %v11929_v24 = vld [vmem:[%s14912_s9 + $0x1e0] sm:$0xff] }
 0xdec   :  { %9612 = vadd.xlane.f32.xlu0 %v9611_v55  ;;  %10012 = vmatpush1.msra.mxu0 %v9717_v18  ;;  %v11903_v55 = vld [vmem:[%s14912_s9 + $0x110] sm:$0xff]  ;;  %v9724_v27 = vunpack.c.h.bf16 %v11929_v24  ;;  %v9723_v8 = vunpack.c.l.bf16 %v11929_v24 }
 0xded   :  { %10013 = vmatprep.subr.mxu0 %v9702_v36  ;;  %v9672_v22 = vunpack.c.h.bf16 %v11903_v55  ;;  %v9671_v31 = vunpack.c.l.bf16 %v11903_v55  ;;  %v9726_v36 = vunpack.c.h.bf16 %v11930_v21 }
 0xdee   :  { %10014 = vmatpush1.msra.mxu0 %v9701_v28  ;;  %v9725_v28 = vunpack.c.l.bf16 %v11930_v21 }
 0xdef   :  { %10015 = vmatprep.subr.mxu0 %v9686_v26  ;;  %v9710_v26 = vunpack.c.h.bf16 %v11922_v33 }
 0xdf0   :  { %10016 = vmatpush1.msra.mxu0 %v9685_v38  ;;  %v9709_v38 = vunpack.c.l.bf16 %v11922_v33  ;;  %v11950_v33 = vld [vmem:[%s14914_s11 + $0x188] sm:$0xff] }
 0xdf1   :  { %10017 = vmatprep.subr.mxu0 %v9670_v35  ;;  %v9693_v35 = vunpack.c.l.bf16 %v11914_v39  ;;  %v11942_v39 = vld [vmem:[%s14914_s11 + $0x148] sm:$0xff] }
 0xdf2   :  { %10018 = vmatpush1.msra.mxu0 %v9669_v50  ;;  %v9691_v50 = vunpack.c.l.bf16 %v11913_v32  ;;  %v11941_v32 = vld [vmem:[%s14914_s11 + $0x140] sm:$0xff] }
 0xdf3   :  { %10153 = vmatprep.subr.mxu0 %v9722_v25  ;;  %v11931_v25 = vld [vmem:[%s14912_s9 + $0x1f0] sm:$0xff] }
 0xe75   :  { %v9613_v7 = vpop.xlane.xlu0 %9612 }
 0xe76   :  { %v9614_v11 = vmul.f32 0.03125, %v9613_v7  ;;  %v11904_v7 = vld [vmem:[%s14912_s9 + $0x118] sm:$0xff] }
 0xe77   :  { %v9674_v20 = vunpack.c.h.bf16 %v11904_v7  ;;  %v9673_v18 = vunpack.c.l.bf16 %v11904_v7 }
 0xe78   :  { %v9615_v12 = vsub.f32 %v9608_v6, %v9614_v11  ;;  %v9705_v6 = vunpack.c.l.bf16 %v11920_v58  ;;  %v9688_v11 = vunpack.c.h.bf16 %v11911_v34  ;;  %v11915_v58 = vld [vmem:[%s14912_s9 + $0x170] sm:$0xff] }
 0xe79   :  { %v9695_v55 = vunpack.c.l.bf16 %v11915_v58 }
 0xe7a   :  { %v9616_v10 = vmul.f32 %v9615_v12, %v9615_v12 }
 0xe7c   :  { %v9617_v13 = vsel %vm4134_vm10, %v9616_v10, 0.0  ;;  %v9687_v10 = vunpack.c.l.bf16 %v11911_v34 }
 0xe7d   :  { %9618 = vadd.xlane.f32.xlu1 %v9617_v13  ;;  %v9689_v13 = vunpack.c.l.bf16 %v11912_v60 }
 0xf06   :  { %v9619_v53 = vpop.xlane.xlu1 %9618 }
 0xf07   :  { %v9620_v54 = vmul.f32 0.03125, %v9619_v53  ;;  %v11932_v53 = vld [vmem:[%s14912_s9 + $0x1f8] sm:$0xff] }
 0xf08   :  { %v9729_v57 = vunpack.c.l.bf16 %v11932_v53 }
 0xf09   :  { %v9621_v37 = vadd.f32 1e-05, %v9620_v54  ;;  %v9677_v54 = vunpack.c.l.bf16 %v11906_v46  ;;  %v11934_v46 = vld [vmem:[%s14914_s11 + $0x108] sm:$0xff] }
 0xf0b   :  { %12879 = vrsqrt.f32 %v9621_v37  ;;  %v11923_v37 = vld [vmem:[%s14912_s9 + $0x1b0] sm:$0xff] }
 0xf0c   :  { %v9711_v34 = vunpack.c.l.bf16 %v11923_v37 }
 0xf18   :  { %v12880_v42 = vpop.eup %12879 }
 0xf19   :  { %v9623_v29 = vmul.f32 %v12880_v42, %v9615_v12  ;;  %v9690_v12 = vunpack.c.h.bf16 %v11912_v60  ;;  %v11924_v42 = vld [vmem:[%s14912_s9 + $0x1b8] sm:$0xff] }
 0xf1a   :  { %v9713_v60 = vunpack.c.l.bf16 %v11924_v42 }
 0xf1b   :  { %v9628_v1 = vmul.f32 %v11899_v51, %v9623_v29  ;;  %v9728_v51 = vunpack.c.h.bf16 %v11931_v25  ;;  %v9730_v29 = vunpack.c.h.bf16 %v11932_v53  ;;  %v11965_v53 = vld [vmem:[%s14913_s10 + $0x10] sm:$0xff] }
 0xf1d   :  { %v14508_v9 = vadd.f32 %v11900_v52, %v9628_v1  ;;  %v9727_v52 = vunpack.c.l.bf16 %v11931_v25  ;;  %v11916_v1 = vld [vmem:[%s14912_s9 + $0x178] sm:$0xff] }
 0xf1e   :  { %v9697_v7 = vunpack.c.l.bf16 %v11916_v1 }
 0xf1f   :  { %11967 = vmatmul.mubr.msk.f32.vlgmr.msra.gmra.mxu1 %vm438_vm3, %v14508_v9  ;;  %11968 = vmatmul.mubr.msk.f32.vlgmr.msra.gmra.mxu0 %vm438_vm3, %v14508_v9 }
 0xf20   :  { %10083 = vmatpush1.msra.mxu1 %v9719_v59  ;;  %10154 = vmatpush1.msra.mxu0 %v9721_v43  ;;  %v9712_v59 = vunpack.c.h.bf16 %v11923_v37  ;;  %v9714_v43 = vunpack.c.h.bf16 %v11924_v42  ;;  %v9844_v37 = vrot.slane %v11965_v53, %v13775_v45 }
 0xf21   :  { %10084 = vmatprep.subr.mxu1 %v9704_v5  ;;  %10155 = vmatprep.subr.mxu0 %v9706_v61  ;;  %v11907_v5 = vld [vmem:[%s14912_s9 + $0x130] sm:$0xff]  ;;  %v11908_v61 = vld [vmem:[%s14912_s9 + $0x138] sm:$0xff] }
 0xf22   :  { %10085 = vmatpush1.msra.mxu1 %v9703_v62  ;;  %10156 = vmatpush1.msra.mxu0 %v9705_v6  ;;  %v9696_v62 = vunpack.c.h.bf16 %v11915_v58  ;;  %v9698_v6 = vunpack.c.h.bf16 %v11916_v1 }
 0xf23   :  { %10086 = vmatprep.subr.mxu1 %v9688_v11  ;;  %10157 = vmatprep.subr.mxu0 %v9690_v12  ;;  %v9680_v11 = vunpack.c.h.bf16 %v11907_v5  ;;  %v9682_v12 = vunpack.c.h.bf16 %v11908_v61 }
 0xf24   :  { %10087 = vmatpush1.msra.mxu1 %v9687_v10  ;;  %10158 = vmatpush1.msra.mxu0 %v9689_v13  ;;  %v9679_v10 = vunpack.c.l.bf16 %v11907_v5  ;;  %v9681_v13 = vunpack.c.l.bf16 %v11908_v61 }
 0xf25   :  { %10088 = vmatprep.subr.mxu1 %v9672_v22  ;;  %10159 = vmatprep.subr.mxu0 %v9674_v20  ;;  %v11957_v22 = vld [vmem:[%s14914_s11 + $0x1c0] sm:$0xff]  ;;  %v11958_v20 = vld [vmem:[%s14914_s11 + $0x1c8] sm:$0xff] }
 0xf26   :  { %10089 = vmatpush1.msra.mxu1 %v9671_v31  ;;  %10122 = vmatprep.mubr.f32.mxu1 %v12947_v2  ;;  %v9813_v31 = vunpack.c.h.bf16 %v11957_v22  ;;  %v9815_v24 = vunpack.c.h.bf16 %v11958_v20  ;;  %v9812_v21 = vunpack.c.l.bf16 %v11957_v22  ;;  %v9860_v22 = vrot.slane %v11965_v53, %v13794_v4 }
 0xf27   :  { %10160 = vmatpush1.msra.mxu0 %v9673_v18  ;;  %10193 = vmatprep.mubr.f32.mxu0 %v12947_v2  ;;  %v9814_v18 = vunpack.c.l.bf16 %v11958_v20 }
 0xf28   :  { %11969 = vmatmul.mubr.msk.f32.vlgmr.msra.gmra.mxu1 %vm438_vm3, %v14508_v9  ;;  %11970 = vmatmul.mubr.msk.f32.vlgmr.msra.gmra.mxu0 %vm438_vm3, %v14508_v9 }
 0xf29   :  { %10224 = vmatprep.subr.mxu1 %v9724_v27  ;;  %10295 = vmatprep.subr.mxu0 %v9726_v36  ;;  %v9797_v27 = vunpack.c.h.bf16 %v11949_v17  ;;  %v9799_v36 = vunpack.c.h.bf16 %v11950_v33 }
 0xf2a   :  { %10225 = vmatpush1.msra.mxu1 %v9723_v8  ;;  %10296 = vmatpush1.msra.mxu0 %v9725_v28  ;;  %v9796_v8 = vunpack.c.l.bf16 %v11949_v17  ;;  %v9798_v28 = vunpack.c.l.bf16 %v11950_v33 }
 0xf2b   :  { %10226 = vmatprep.subr.mxu1 %v9708_v16  ;;  %10297 = vmatprep.subr.mxu0 %v9710_v26  ;;  %v9781_v16 = vunpack.c.h.bf16 %v11941_v32  ;;  %v9783_v26 = vunpack.c.h.bf16 %v11942_v39 }
 0xf2c   :  { %10227 = vmatpush1.msra.mxu1 %v9707_v40  ;;  %10298 = vmatpush1.msra.mxu0 %v9709_v38  ;;  %v9780_v40 = vunpack.c.l.bf16 %v11941_v32  ;;  %v9782_v38 = vunpack.c.l.bf16 %v11942_v39 }
 0xf2d   :  { %10228 = vmatprep.subr.mxu1 %v9692_v56  ;;  %10299 = vmatprep.subr.mxu0 %v9694_v49  ;;  %v9765_v56 = vunpack.c.h.bf16 %v11933_v41  ;;  %v9767_v49 = vunpack.c.h.bf16 %v11934_v46 }
 0xf2e   :  { %10229 = vmatpush1.msra.mxu1 %v9691_v50  ;;  %10300 = vmatpush1.msra.mxu0 %v9693_v35  ;;  %v9764_v50 = vunpack.c.l.bf16 %v11933_v41  ;;  %v9766_v35 = vunpack.c.l.bf16 %v11934_v46 }
 0xf2f   :  { %10230 = vmatprep.subr.mxu1 %v9676_v19  ;;  %10301 = vmatprep.subr.mxu0 %v9678_v15  ;;  %v14613_v19 = vld [vmem:[%s14914_s11 + $0x1d0] sm:$0xff]  ;;  %v14618_v15 = vld [vmem:[%s14914_s11 + $0x1d8] sm:$0xff] }
 0xf30   :  { %10231 = vmatpush1.msra.mxu1 %v9675_v14  ;;  %10264 = vmatprep.mubr.f32.mxu1 %v12947_v2  ;;  %v9817_v14 = vunpack.c.h.bf16 %v14613_v19  ;;  %v9819_v25 = vunpack.c.h.bf16 %v14618_v15 }
 0xf31   :  { %10302 = vmatpush1.msra.mxu0 %v9677_v54  ;;  %10335 = vmatprep.mubr.f32.mxu0 %v12947_v2  ;;  %v9836_v54 = vrot.slane %v11965_v53, %v13773_v44 }
 0xf32   :  { %11971 = vmatmul.mubr.msk.f32.vlgmr.msra.gmra.mxu1 %vm438_vm3, %v14508_v9  ;;  %11972 = vmatmul.mubr.msk.f32.vlgmr.msra.gmra.mxu0 %vm438_vm3, %v14508_v9 }
 0xf33   :  { %10366 = vmatprep.subr.mxu1 %v9728_v51  ;;  %10437 = vmatprep.subr.mxu0 %v9730_v29  ;;  %v9840_v29 = vrot.slane %v11965_v53, %v13780_v47 }
 0xf34   :  { %10367 = vmatpush1.msra.mxu1 %v9727_v52  ;;  %10438 = vmatpush1.msra.mxu0 %v9729_v57  ;;  %v9848_v52 = vrot.slane %v11965_v53, %v13782_v48 }
 0xf35   :  { %10368 = vmatprep.subr.mxu1 %v9712_v59  ;;  %10439 = vmatprep.subr.mxu0 %v9714_v43 }
 0xf36   :  { %10369 = vmatpush1.msra.mxu1 %v9711_v34  ;;  %10440 = vmatpush1.msra.mxu0 %v9713_v60 }
 0xf37   :  { %10370 = vmatprep.subr.mxu1 %v9696_v62  ;;  %10441 = vmatprep.subr.mxu0 %v9698_v6 }
 0xf38   :  { %10371 = vmatpush1.msra.mxu1 %v9695_v55  ;;  %10442 = vmatpush1.msra.mxu0 %v9697_v7  ;;  %v9856_v7 = vrot.slane %v11965_v53, %v13788_v63 }
 0xf39   :  { %10372 = vmatprep.subr.mxu1 %v9680_v11  ;;  %10443 = vmatprep.subr.mxu0 %v9682_v12  ;;  %v9864_v11 = vrot.slane %v11965_v53, %v13790_v0  ;;  %v9852_v12 = vrot.slane %v11965_v53, %v13792_v3 }
 0xf3a   :  { %10373 = vmatpush1.msra.mxu1 %v9679_v10  ;;  %10406 = vmatprep.mubr.f32.mxu1 %v12947_v2 }
 0xf3b   :  { %10444 = vmatpush1.msra.mxu0 %v9681_v13  ;;  %10477 = vmatprep.mubr.f32.mxu0 %v12947_v2 }
 0xf3c   :  { %11973 = vmatmul.mubr.msk.f32.vlgmr.msra.gmra.mxu1 %vm438_vm3, %v14508_v9  ;;  %11974 = vmatmul.mubr.msk.f32.vlgmr.msra.gmra.mxu0 %vm438_vm3, %v14508_v9 }
 0xf3d   :  { %10593 = vmatprep.subr.mxu1 %v9813_v31  ;;  %10663 = vmatprep.subr.mxu0 %v9815_v24 }
 0xf3e   :  { %10594 = vmatpush1.xpose.msra.mxu1 %v9812_v21  ;;  %10664 = vmatpush1.xpose.msra.mxu0 %v9814_v18 }
 0xf3f   :  { %10595 = vmatprep.subr.mxu1 %v9797_v27  ;;  %10665 = vmatprep.subr.mxu0 %v9799_v36  ;;  %v14647_v27 = vld [vmem:[%s14913_s10 + $0x18] sm:$0xff] }
 0xf40   :  { %v9872_v32 = vrot.slane %v14647_v27, %v13780_v47  ;;  %v9880_v39 = vrot.slane %v14647_v27, %v13782_v48 }
 0xf42   :  { %10596 = vmatpush1.xpose.msra.mxu1 %v9796_v8  ;;  %10666 = vmatpush1.xpose.msra.mxu0 %v9798_v28 }
 0xf43   :  { %10597 = vmatprep.subr.mxu1 %v9781_v16  ;;  %10667 = vmatprep.subr.mxu0 %v9783_v26 }
 0xf46   :  { %10598 = vmatpush1.xpose.msra.mxu1 %v9780_v40  ;;  %10668 = vmatpush1.xpose.msra.mxu0 %v9782_v38 }
 0xf47   :  { %10599 = vmatprep.subr.mxu1 %v9765_v56  ;;  %10669 = vmatprep.subr.mxu0 %v9767_v49  ;;  %v9868_v49 = vrot.slane %v14647_v27, %v13773_v44  ;;  %v11952_v44 = vld [vmem:[%s14914_s11 + $0x198] sm:$0xff] }
 0xf4a   :  { %10600 = vmatpush1.xpose.msra.mxu1 %v9764_v50  ;;  %10670 = vmatpush1.xpose.msra.mxu0 %v9766_v35  ;;  %v9816_v50 = vunpack.c.l.bf16 %v14613_v19 }
 0xf4b   :  { %10733 = vmatprep.subr.mxu1 %v9817_v14  ;;  %10803 = vmatprep.subr.mxu0 %v9819_v25  ;;  %v11951_v25 = vld [vmem:[%s14914_s11 + $0x190] sm:$0xff] }
 0xfdf   :  { %v9982_v42 = vpop.f32.mrf.mxu1  ;;  %v10053_v51 = vpop.f32.mrf.mxu0 }
 0xfe0   :  { %v9983_v57 = vadd.f32 %v9982_v42, %v9836_v54  ;;  %v10054_v58 = vadd.f32 %v10053_v51, %v9844_v37 }
 0xfe1   :  { %v9984_v1 = vpop.f32.mrf.mxu1  ;;  %v10055_v59 = vpop.f32.mrf.mxu0 }
 0xfe2   :  { %v10500_v43 = vmul.f32 0.70710677, %v9983_v57  ;;  %v10502_v34 = vmul.f32 0.70710677, %v10054_v58  ;;  %v9985_v60 = vadd.f32 %v9984_v1, %v9840_v29  ;;  %v10056_v5 = vadd.f32 %v10055_v59, %v9848_v52 }
 0xfe3   :  { %v10484_v42 = vmul.f32 0.5, %v9983_v57  ;;  %v10486_v19 = vmul.f32 0.5, %v10054_v58  ;;  %v9818_v29 = vunpack.c.l.bf16 %v14618_v15  ;;  %v11943_v57 = vld [vmem:[%s14914_s11 + $0x150] sm:$0xff] }
 0xfe4   :  { %12881 = verf.f32 %v10500_v43  ;;  %v10501_v61 = vmul.f32 0.70710677, %v9985_v60  ;;  %v10503_v62 = vmul.f32 0.70710677, %v10056_v5  ;;  %v10485_v53 = vmul.f32 0.5, %v9985_v60 }
 0xfe5   :  { %12883 = verf.f32 %v10502_v34  ;;  %v10487_v54 = vmul.f32 0.5, %v10056_v5  ;;  %v9801_v43 = vunpack.c.h.bf16 %v11951_v25  ;;  %v9803_v5 = vunpack.c.h.bf16 %v11952_v44 }
 0xfe6   :  { %12885 = verf.f32 %v10501_v61  ;;  %v9876_v61 = vrot.slane %v14647_v27, %v13775_v45  ;;  %v11944_v45 = vld [vmem:[%s14914_s11 + $0x158] sm:$0xff] }
 0xfe7   :  { %12887 = verf.f32 %v10503_v62  ;;  %v9888_v62 = vrot.slane %v14647_v27, %v13788_v63 }
 0xfe8   :  { %v10124_v6 = vpop.f32.mrf.mxu1  ;;  %v10195_v55 = vpop.f32.mrf.mxu0 }
 0xfe9   :  { %v14637_v24 = vadd.f32 %v10124_v6, %v9852_v12  ;;  %v14640_v18 = vadd.f32 %v10195_v55, %v9860_v22  ;;  %v9896_v55 = vrot.slane %v14647_v27, %v13790_v0  ;;  %v11935_v0 = vld [vmem:[%s14914_s11 + $0x110] sm:$0xff] }
 0xfea   :  { %v10126_v10 = vpop.f32.mrf.mxu1  ;;  %v10197_v13 = vpop.f32.mrf.mxu0 }
 0xfeb   :  { %v14633_v20 = vadd.f32 %v10126_v10, %v9856_v7  ;;  %v14635_v31 = vadd.f32 %v10197_v13, %v9864_v11  ;;  %v10504_v33 = vmul.f32 0.70710677, %v14637_v24  ;;  %v10506_v26 = vmul.f32 0.70710677, %v14640_v18 }
 0xfec   :  { %v9800_v7 = vunpack.c.l.bf16 %v11951_v25  ;;  %v9802_v11 = vunpack.c.l.bf16 %v11952_v44  ;;  %v11962_v25 = vld [vmem:[%s14914_s11 + $0x1e8] sm:$0xff] }
 0xfed   :  { %v10505_v21 = vmul.f32 0.70710677, %v14633_v20  ;;  %v10507_v17 = vmul.f32 0.70710677, %v14635_v31  ;;  %v10489_v10 = vmul.f32 0.5, %v14633_v20  ;;  %v11936_v20 = vld [vmem:[%s14914_s11 + $0x118] sm:$0xff] }
 0xfee   :  { %v9770_v44 = vunpack.c.l.bf16 %v11936_v20 }
 0xfef   :  { %12889 = verf.f32 %v10505_v21 }
 0xff0   :  { %12891 = verf.f32 %v10507_v17  ;;  %v9785_v17 = vunpack.c.h.bf16 %v11943_v57 }
 0xff1   :  { %v12882_v36 = vpop.eup %12881  ;;  %12893 = verf.f32 %v10504_v33 }
 0xff2   :  { %v10266_v8 = vpop.f32.mrf.mxu1  ;;  %v10337_v28 = vpop.f32.mrf.mxu0  ;;  %v10532_v56 = vadd.f32 1.0, %v12882_v36  ;;  %12895 = verf.f32 %v10506_v26  ;;  %v9787_v36 = vunpack.c.h.bf16 %v11944_v45 }
 0xff3   :  { %v12884_v16 = vpop.eup %12883  ;;  %v14687_v13 = vadd.f32 %v10266_v8, %v9868_v49  ;;  %v14689_v33 = vadd.f32 %v10337_v28, %v9876_v61  ;;  %v10491_v8 = vmul.f32 0.5, %v14635_v31  ;;  %v9784_v28 = vunpack.c.l.bf16 %v11943_v57  ;;  %v11961_v31 = vld [vmem:[%s14914_s11 + $0x1e0] sm:$0xff]  ;;  %v11954_v61 = vld [vmem:[%s14914_s11 + $0x1a8] sm:$0xff] }
 0xff4   :  { %v12886_v40 = vpop.eup %12885  ;;  %v10268_v38 = vpop.f32.mrf.mxu1  ;;  %v10534_v35 = vadd.f32 1.0, %v12884_v16  ;;  %v10548_v34 = vmul.f32 %v10532_v56, %v10484_v42  ;;  %v9821_v42 = vunpack.c.h.bf16 %v11961_v31 }
 0xff5   :  { %v10339_v41 = vpop.f32.mrf.mxu0  ;;  %v12888_v46 = vpop.eup %12887  ;;  %v14657_v14 = vadd.f32 %v10268_v38, %v9872_v32  ;;  %v10533_v48 = vadd.f32 1.0, %v12886_v40  ;;  %v10508_v38 = vmul.f32 0.70710677, %v14687_v13  ;;  %v10510_v56 = vmul.f32 0.70710677, %v14689_v33 }
 0xff6   :  { %v14659_v47 = vadd.f32 %v10339_v41, %v9880_v39  ;;  %v10535_v37 = vadd.f32 1.0, %v12888_v46  ;;  %v10550_v60 = vmul.f32 %v10534_v35, %v10486_v19  ;;  %v9786_v41 = vunpack.c.l.bf16 %v11944_v45 }
 0xff7   :  { %v10509_v51 = vmul.f32 0.70710677, %v14657_v14  ;;  %v10549_v1 = vmul.f32 %v10533_v48, %v10485_v53  ;;  %v9769_v46 = vunpack.c.h.bf16 %v11935_v0  ;;  %v9822_v45 = vunpack.c.l.bf16 %v11962_v25 }
 0xff8   :  { %v10511_v52 = vmul.f32 0.70710677, %v14659_v47  ;;  %v10551_v59 = vmul.f32 %v10535_v37, %v10487_v54  ;;  %v9768_v54 = vunpack.c.l.bf16 %v11935_v0 }
 0xff9   :  { %12897 = verf.f32 %v10509_v51  ;;  %10633 = vmatprep.mubr.f32.mxu1 %v10549_v1  ;;  %v10488_v1 = vmul.f32 0.5, %v14637_v24  ;;  %v9884_v24 = vrot.slane %v14647_v27, %v13792_v3  ;;  %v11946_v3 = vld [vmem:[%s14914_s11 + $0x168] sm:$0xff] }
 0xffa   :  { %12899 = verf.f32 %v10511_v52  ;;  %10703 = vmatprep.mubr.f32.mxu0 %v10551_v59  ;;  %10634 = vmatmul.mubr.f32.vlgmr.msra.gmra.mxu1 %v10548_v34  ;;  %v10490_v34 = vmul.f32 0.5, %v14640_v18  ;;  %v10495_v18 = vmul.f32 0.5, %v14659_v47 }
 0xffb   :  { %10704 = vmatmul.mubr.f32.vlgmr.msra.gmra.mxu0 %v10550_v60  ;;  %10734 = vmatpush1.xpose.msra.mxu1 %v9816_v50  ;;  %v9771_v50 = vunpack.c.h.bf16 %v11936_v20  ;;  %12901 = verf.f32 %v10508_v38  ;;  %v9820_v60 = vunpack.c.l.bf16 %v11961_v31  ;;  %v11964_v38 = vld [vmem:[%s14914_s11 + $0x1f8] sm:$0xff] }
 0xffc   :  { %v14675_v15 = vpop.f32.mrf.mxu1  ;;  %v14677_v58 = vpop.f32.mrf.mxu0  ;;  %10804 = vmatpush1.xpose.msra.mxu0 %v9818_v29  ;;  %10735 = vmatprep.subr.mxu1 %v9801_v43  ;;  %12903 = verf.f32 %v10510_v56  ;;  %v9823_v29 = vunpack.c.h.bf16 %v11962_v25  ;;  %v11953_v43 = vld [vmem:[%s14914_s11 + $0x1a0] sm:$0xff]  ;;  %v10492_v25 = vmul.f32 0.5, %v14687_v13  ;;  %v9826_v13 = vunpack.c.l.bf16 %v11964_v38 }
 0xffd   :  { %v12890_v6 = vpop.eup %12889  ;;  %10805 = vmatprep.subr.mxu0 %v9803_v5  ;;  %v9804_v47 = vunpack.c.l.bf16 %v11953_v43 }
 0xffe   :  { %v12892_v12 = vpop.eup %12891  ;;  %v10410_v63 = vpop.f32.mrf.mxu1  ;;  %v10537_v21 = vadd.f32 1.0, %v12890_v6 }
 0xfff   :  { %v10481_v22 = vpop.f32.mrf.mxu0  ;;  %v14694_v32 = vadd.f32 %v10410_v63, %v9888_v62  ;;  %v10539_v16 = vadd.f32 1.0, %v12892_v12  ;;  %10736 = vmatpush1.xpose.msra.mxu1 %v9800_v7  ;;  %v12894_v40 = vpop.eup %12893  ;;  %v10493_v62 = vmul.f32 0.5, %v14657_v14  ;;  %v9805_v7 = vunpack.c.h.bf16 %v11953_v43 }
0x1000   :  { %v10553_v39 = vmul.f32 %v10537_v21, %v10489_v10  ;;  %v14700_v26 = vadd.f32 %v10481_v22, %v9896_v55  ;;  %10806 = vmatpush1.xpose.msra.mxu0 %v9802_v11  ;;  %10737 = vmatprep.subr.mxu1 %v9785_v17  ;;  %v12896_v35 = vpop.eup %12895  ;;  %v10536_v37 = vadd.f32 1.0, %v12894_v40  ;;  %v9892_v55 = vrot.slane %v14647_v27, %v13794_v4  ;;  %v11945_v11 = vld [vmem:[%s14914_s11 + $0x160] sm:$0xff] }
0x1001   :  { %v10555_v49 = vmul.f32 %v10539_v16, %v10491_v8  ;;  %10807 = vmatprep.subr.mxu0 %v9787_v36  ;;  %v10513_v48 = vmul.f32 0.70710677, %v14694_v32  ;;  %v10538_v51 = vadd.f32 1.0, %v12896_v35  ;;  %v9807_v12 = vunpack.c.h.bf16 %v11954_v61  ;;  %v11937_v17 = vld [vmem:[%s14914_s11 + $0x120] sm:$0xff] }
0x1002   :  { %10773 = vmatprep.mubr.f32.mxu1 %v10553_v39  ;;  %v10515_v53 = vmul.f32 0.70710677, %v14700_v26  ;;  %v10552_v57 = vmul.f32 %v10536_v37, %v10488_v1  ;;  %v14733_v63 = vadd.f32 %v14675_v15, %v9884_v24  ;;  %v9806_v4 = vunpack.c.l.bf16 %v11954_v61  ;;  %v11938_v15 = vld [vmem:[%s14914_s11 + $0x128] sm:$0xff]  ;;  %v11940_v24 = vld [vmem:[%s14914_s11 + $0x138] sm:$0xff] }
0x1003   :  { %10843 = vmatprep.mubr.f32.mxu0 %v10555_v49  ;;  %10738 = vmatpush1.xpose.msra.mxu1 %v9784_v28  ;;  %12905 = verf.f32 %v10513_v48  ;;  %v10554_v6 = vmul.f32 %v10538_v51, %v10490_v34  ;;  %v9789_v27 = vunpack.c.h.bf16 %v11945_v11  ;;  %v14736_v22 = vadd.f32 %v14677_v58, %v9892_v55  ;;  %v11963_v28 = vld [vmem:[%s14914_s11 + $0x1f0] sm:$0xff] }
0x1004   :  { %10808 = vmatpush1.xpose.msra.mxu0 %v9786_v41  ;;  %10739 = vmatprep.subr.mxu1 %v9769_v46  ;;  %12907 = verf.f32 %v10515_v53  ;;  %v9791_v21 = vunpack.c.h.bf16 %v11946_v3  ;;  %v9788_v36 = vunpack.c.l.bf16 %v11945_v11  ;;  %v10512_v0 = vmul.f32 0.70710677, %v14733_v63 }
0x1005   :  { %10809 = vmatprep.subr.mxu0 %v9771_v50  ;;  %v9790_v58 = vunpack.c.l.bf16 %v11946_v3  ;;  %v9773_v39 = vunpack.c.h.bf16 %v11937_v17  ;;  %v10514_v20 = vmul.f32 0.70710677, %v14736_v22  ;;  %v9775_v8 = vunpack.c.h.bf16 %v11938_v15 }
0x1006   :  { %v12898_v19 = vpop.eup %12897  ;;  %v9772_v46 = vunpack.c.l.bf16 %v11937_v17  ;;  %12909 = verf.f32 %v10512_v0  ;;  %v9774_v50 = vunpack.c.l.bf16 %v11938_v15  ;;  %v9825_v31 = vunpack.c.h.bf16 %v11963_v28  ;;  %v11192_v15 = vld [vmem:[%s14907_s4 + $0x88] sm:$0xff]  ;;  %v11190_v0 = vld [vmem:[%s14907_s4 + $0x78] sm:$0xff] }
0x1007   :  { %v12900_v52 = vpop.eup %12899  ;;  %v10541_v59 = vadd.f32 1.0, %v12898_v19  ;;  %10740 = vmatpush1.xpose.msra.mxu1 %v9768_v54  ;;  %12911 = verf.f32 %v10514_v20  ;;  %v9827_v48 = vunpack.c.h.bf16 %v11964_v38  ;;  %v11955_v54 = vld [vmem:[%s14914_s11 + $0x1b0] sm:$0xff]  ;;  %v10494_v37 = vmul.f32 0.5, %v14689_v33  ;;  %v11956_v19 = vld [vmem:[%s14914_s11 + $0x1b8] sm:$0xff]  ;;  %v12924_v20 = vld [vmem:[%s14903_s0] sm:$0x3] }
0x1008   :  { %v10543_v5 = vadd.f32 1.0, %v12900_v52  ;;  %10810 = vmatpush1.xpose.msra.mxu0 %v9770_v44  ;;  %10873 = vmatprep.subr.mxu1 %v9821_v42  ;;  %v12902_v16 = vpop.eup %12901  ;;  %v9824_v44 = vunpack.c.l.bf16 %v11963_v28  ;;  %v10499_v1 = vmul.f32 0.5, %v14700_v26  ;;  %v11947_v33 = vld [vmem:[%s14914_s11 + $0x170] sm:$0xff]  ;;  %v9811_v34 = vunpack.c.h.bf16 %v11956_v19 }
0x1009   :  { %10943 = vmatprep.subr.mxu0 %v9823_v29  ;;  %v10557_v14 = vmul.f32 %v10541_v59, %v10493_v62  ;;  %v12904_v40 = vpop.eup %12903  ;;  %v10540_v49 = vadd.f32 1.0, %v12902_v16  ;;  %v10497_v29 = vmul.f32 0.5, %v14694_v32  ;;  %v9809_v59 = vunpack.c.h.bf16 %v11955_v54  ;;  %v11939_v62 = vld [vmem:[%s14914_s11 + $0x130] sm:$0xff]  ;;  %v11346_v16 = vld [vmem:[%s14907_s4 + $0xc8] sm:$0xff] }
0x100a   :  { %10774 = vmatmul.mubr.f32.vlgmr.msra.gmra.mxu1 %v10552_v57  ;;  %v10559_v10 = vmul.f32 %v10543_v5, %v10495_v18  ;;  %v10542_v35 = vadd.f32 1.0, %v12904_v40  ;;  %v9808_v5 = vunpack.c.l.bf16 %v11955_v54  ;;  %v9810_v26 = vunpack.c.l.bf16 %v11956_v19  ;;  %v11343_v28 = vld [vmem:[%s14907_s4 + $0xb0] sm:$0xff] }
0x100b   :  { %10844 = vmatmul.mubr.f32.vlgmr.msra.gmra.mxu0 %v10554_v6  ;;  %10874 = vmatpush1.xpose.msra.mxu1 %v9820_v60  ;;  %v10556_v51 = vmul.f32 %v10540_v49, %v10492_v25  ;;  %v11948_v60 = vld [vmem:[%s14914_s11 + $0x178] sm:$0xff]  ;;  %v9793_v61 = vunpack.c.h.bf16 %v11947_v33  ;;  %v9777_v18 = vunpack.c.h.bf16 %v11939_v62  ;;  %v9778_v3 = vunpack.c.l.bf16 %v11940_v24  ;;  %s11573_s11 = sshll.u32 %s12949_s22, 4  ;;  %s11574_s11 = int_to_ptr.vmem [resolvable:$true] %s11573_s11 }
0x100c   :  { %10913 = vmatprep.mubr.f32.mxu1 %v10557_v14  ;;  %10944 = vmatpush1.xpose.msra.mxu0 %v9822_v45  ;;  %v10558_v52 = vmul.f32 %v10542_v35, %v10494_v37  ;;  %v9795_v57 = vunpack.c.h.bf16 %v11948_v60  ;;  %v9792_v45 = vunpack.c.l.bf16 %v11947_v33  ;;  %v9794_v6 = vunpack.c.l.bf16 %v11948_v60  ;;  %v11975_v35 = vld [vmem:[%s14906_s3 + $0xe] ss:$0 sm:$0xff]  ;;  %s12925_s23 = scalar_lea.vmem %s11574_s11, 32  ;;  %p12930_p1 = scmp.lt.s32.totalorder %s11574_s11, %s11574_s11 }
0x100d   :  { %10983 = vmatprep.mubr.f32.mxu0 %v10559_v10  ;;  %10875 = vmatprep.subr.mxu1 %v9805_v7  ;;  %v9779_v7 = vunpack.c.h.bf16 %v11940_v24  ;;  %v9776_v14 = vunpack.c.l.bf16 %v11939_v62  ;;  %v11983_v62 = vld [vmem:[%s14906_s3 + $0x13] ss:$0 sm:$0xff]  ;;  %p12926_p0 = scmp.ne.s32.totalorder %s11574_s11, %s12925_s23  ;;  %p12931_p2 = scmp.lt.s32.totalorder %s12925_s23, %s12925_s23 }
0x100e   :  { %10945 = vmatprep.subr.mxu0 %v9807_v12 }
0x100f   :  { %10876 = vmatpush1.xpose.msra.mxu1 %v9804_v47  ;;  %v10496_v47 = vmul.f32 0.5, %v14733_v63  ;;  %v11195_v63 = vld [vmem:[%s14907_s4 + $0xa0] sm:$0xff]  ;;  %p12932_p3 = por %p12931_p2, %p12930_p1 }
0x1010   :  { %10946 = vmatpush1.xpose.msra.mxu0 %v9806_v4  ;;  %10877 = vmatprep.subr.mxu1 %v9789_v27  ;;  %v12906_v41 = vpop.eup %12905  ;;  %v10498_v4 = vmul.f32 0.5, %v14736_v22  ;;  %v11191_v22 = vld [vmem:[%s14907_s4 + $0x80] sm:$0xff] }
0x1011   :  { %10947 = vmatprep.subr.mxu0 %v9791_v21  ;;  %v12908_v56 = vpop.eup %12907  ;;  %v10545_v53 = vadd.f32 1.0, %v12906_v41  ;;  %v11196_v21 = vld [vmem:[%s14907_s4 + $0xa8] sm:$0xff]  ;;  %p12933_p4 = pnand %p12932_p3, %p12926_p0 }
0x1012   :  { %v10547_v42 = vadd.f32 1.0, %v12908_v56 }
0x1013   :  { %10878 = vmatpush1.xpose.msra.mxu1 %v9788_v36  ;;  %v10561_v43 = vmul.f32 %v10545_v53, %v10497_v29  ;;  %v12910_v55 = vpop.eup %12909  ;;  %v11194_v36 = vld [vmem:[%s14907_s4 + $0x98] sm:$0xff] }
0x1014   :  { %10948 = vmatpush1.xpose.msra.mxu0 %v9790_v58  ;;  %10879 = vmatprep.subr.mxu1 %v9773_v39  ;;  %v10563_v32 = vmul.f32 %v10547_v42, %v10499_v1  ;;  %v12912_v11 = vpop.eup %12911  ;;  %v10544_v12 = vadd.f32 1.0, %v12910_v55  ;;  %v11193_v58 = vld [vmem:[%s14907_s4 + $0x90] sm:$0xff] }
0x1015   :  { %10949 = vmatprep.subr.mxu0 %v9775_v8  ;;  %v10546_v10 = vadd.f32 1.0, %v12912_v11  ;;  %v11189_v39 = vld [vmem:[%s14907_s4 + $0x70] sm:$0xff]  ;;  %v11345_v8 = vld [vmem:[%s14907_s4 + $0xc0] sm:$0xff] }
0x1016   :  { %v10560_v27 = vmul.f32 %v10544_v12, %v10496_v47 }
0x1017   :  { %10880 = vmatpush1.xpose.msra.mxu1 %v9772_v46  ;;  %v10562_v17 = vmul.f32 %v10546_v10, %v10498_v4 }
0x1018   :  { %10950 = vmatpush1.xpose.msra.mxu0 %v9774_v50  ;;  %11013 = vmatprep.subr.mxu1 %v9825_v31 }
0x1019   :  { %11083 = vmatprep.subr.mxu0 %v9827_v48 }
0x101a   :  { %10914 = vmatmul.mubr.f32.vlgmr.msra.gmra.mxu1 %v10556_v51 }
0x101b   :  { %10984 = vmatmul.mubr.f32.vlgmr.msra.gmra.mxu0 %v10558_v52  ;;  %11014 = vmatpush1.xpose.msra.mxu1 %v9824_v44 }
0x101c   :  { %11053 = vmatprep.mubr.f32.mxu1 %v10561_v43  ;;  %11084 = vmatpush1.xpose.msra.mxu0 %v9826_v13 }
0x101d   :  { %11123 = vmatprep.mubr.f32.mxu0 %v10563_v32  ;;  %11015 = vmatprep.subr.mxu1 %v9809_v59 }
0x101e   :  { %11085 = vmatprep.subr.mxu0 %v9811_v34 }
0x101f   :  { %11016 = vmatpush1.xpose.msra.mxu1 %v9808_v5 }
0x1020   :  { %11086 = vmatpush1.xpose.msra.mxu0 %v9810_v26  ;;  %11017 = vmatprep.subr.mxu1 %v9793_v61 }
0x1021   :  { %11087 = vmatprep.subr.mxu0 %v9795_v57 }
0x1023   :  { %11018 = vmatpush1.xpose.msra.mxu1 %v9792_v45 }
0x1024   :  { %11088 = vmatpush1.xpose.msra.mxu0 %v9794_v6  ;;  %11019 = vmatprep.subr.mxu1 %v9777_v18 }
0x1025   :  { %11089 = vmatprep.subr.mxu0 %v9779_v7 }
0x1027   :  { %11020 = vmatpush1.xpose.msra.mxu1 %v9776_v14 }
0x1028   :  { %11090 = vmatpush1.xpose.msra.mxu0 %v9778_v3  ;;  %12732 = vmatprep.subr.mxu1 %v12947_v2 }
0x1029   :  { %12743 = vmatprep.subr.mxu0 %v12947_v2 }
0x102a   :  { %11054 = vmatmul.mubr.f32.vlgmr.msra.gmra.mxu1 %v10560_v27  ;;  %v11461_v27 = vld [vmem:[%s14907_s4 + $0xe8] sm:$0xff] }
0x102b   :  { %11124 = vmatmul.mubr.f32.vlgmr.msra.gmra.mxu0 %v10562_v17  ;;  %12733 = vmatpush3.msra.mxu1 %v11196_v21  ;;  %v11460_v21 = vld [vmem:[%s14907_s4 + $0xe0] sm:$0xff]  ;;  %v11459_v17 = vld [vmem:[%s14907_s4 + $0xd8] sm:$0xff] }
0x102c   :  { %12744 = vmatpush3.msra.mxu0 %v11192_v15  ;;  %12734 = vmatprep.subr.mxu1 %v12947_v2  ;;  %v11458_v15 = vld [vmem:[%s14907_s4 + $0xd0] sm:$0xff] }
0x102d   :  { %12745 = vmatprep.subr.mxu0 %v12947_v2  ;;  %12735 = vmatpush3.msra.mxu1 %v11195_v63 }
0x102e   :  { %12746 = vmatpush3.msra.mxu0 %v11191_v22  ;;  %12736 = vmatprep.subr.mxu1 %v12947_v2 }
0x102f   :  { %12747 = vmatprep.subr.mxu0 %v12947_v2  ;;  %12737 = vmatpush3.msra.mxu1 %v11194_v36 }
0x1030   :  { %12748 = vmatpush3.msra.mxu0 %v11190_v0  ;;  %12738 = vmatprep.subr.mxu1 %v12947_v2 }
0x1031   :  { %12749 = vmatprep.subr.mxu0 %v12947_v2  ;;  %12739 = vmatpush3.msra.mxu1 %v11193_v58 }
0x1032   :  { %12740 = vmatprep.mubr.msk.f32.mxu1 %vm12948_vm1, %v12947_v2  ;;  %12750 = vmatpush3.msra.mxu0 %v11189_v39 }
0x1033   :  { %12751 = vmatprep.mubr.msk.f32.mxu0 %vm12948_vm1, %v12947_v2  ;;  %12741 = vmatmul.mubr.msk.f32.vlgmr.msra.gmra.mxu1 %vm438_vm3, %v13118_v30  ;;  %v11344_v30 = vld [vmem:[%s14907_s4 + $0xb8] sm:$0xff] }
0x1034   :  { %12752 = vmatmul.mubr.msk.f32.vlgmr.msra.gmra.mxu0 %vm438_vm3, %v12924_v20  ;;  %12754 = vmatprep.subr.mxu1 %v12947_v2 }
0x1035   :  { %12755 = vmatpush3.msra.mxu1 %v11346_v16  ;;  %12762 = vmatprep.mubr.msk.f32.mxu1 %vm12948_vm1, %v12947_v2  ;;  %v11976_v16 = vld [vmem:[%s14906_s3 + $0xf] ss:$0 sm:$0xff] }
0x1036   :  { %12756 = vmatprep.subr.mxu1 %v12947_v2  ;;  %12765 = vmatprep.subr.mxu0 %v12947_v2 }
0x1037   :  { %12757 = vmatpush3.msra.mxu1 %v11345_v8  ;;  %12773 = vmatprep.mubr.msk.f32.mxu0 %vm12948_vm1, %v12947_v2 }
0x1038   :  { %12758 = vmatprep.subr.mxu1 %v12947_v2  ;;  %12766 = vmatpush3.msra.mxu0 %v11461_v27  ;;  %v11989_v27 = vld [vmem:[%s14906_s3 + $0x18] ss:$0 sm:$0xff] }
0x1039   :  { %12759 = vmatpush3.msra.mxu1 %v11344_v30  ;;  %12767 = vmatprep.subr.mxu0 %v12947_v2  ;;  %v11977_v30 = vld [vmem:[%s14906_s3 + $0x10] ss:$0 sm:$0xff] }
0x103a   :  { %12760 = vmatprep.subr.mxu1 %v12947_v2  ;;  %12768 = vmatpush3.msra.mxu0 %v11460_v21 }
0x103b   :  { %12761 = vmatpush3.msra.mxu1 %v11343_v28  ;;  %12769 = vmatprep.subr.mxu0 %v12947_v2 }
0x103c   :  { %12763 = vmatmul.mubr.msk.f32.vlgmr.msra.gmra.mxu1 %vm438_vm3, %v13106_v23  ;;  %12770 = vmatpush3.msra.mxu0 %v11459_v17 }
0x103d   :  { %12771 = vmatprep.subr.mxu0 %v12947_v2 }
0x103e   :  { %12772 = vmatpush3.msra.mxu0 %v11458_v15 }
0x10ba   :  { %v10635_v40 = vpop.f32.mrf.mxu1 }
0x10bb   :  { %v10705_v38 = vpop.f32.mrf.mxu0  ;;  %v10636_v48 = vadd.f32 %v11975_v35, %v10635_v40 }
0x10bc   :  { %v10637_v41 = vpop.f32.mrf.mxu1 }
0x10bd   :  { %v10707_v46 = vpop.f32.mrf.mxu0  ;;  %v10706_v37 = vadd.f32 %v10705_v38, %v10636_v48  ;;  %v11984_v41 = vld [vmem:[%s14906_s3 + $0x14] ss:$0 sm:$0xff] }
0x10ca   :  { %v10775_v56 = vpop.f32.mrf.mxu1 }
0x10cb   :  { %v10845_v49 = vpop.f32.mrf.mxu0  ;;  %v10776_v42 = vadd.f32 %v10775_v56, %v10706_v37  ;;  %v11985_v56 = vld [vmem:[%s14906_s3 + $0x15] ss:$0 sm:$0xff] }
0x10cc   :  { %v10777_v50 = vpop.f32.mrf.mxu1 }
0x10cd   :  { %v10847_v31 = vpop.f32.mrf.mxu0  ;;  %v10846_v23 = vadd.f32 %v10845_v49, %v10776_v42 }
0x10da   :  { %v10915_v25 = vpop.f32.mrf.mxu1 }
0x10db   :  { %v10985_v53 = vpop.f32.mrf.mxu0  ;;  %v10916_v19 = vadd.f32 %v10915_v25, %v10846_v23 }
0x10dc   :  { %v10917_v54 = vpop.f32.mrf.mxu1 }
0x10dd   :  { %v10987_v44 = vpop.f32.mrf.mxu0  ;;  %v10986_v51 = vadd.f32 %v10985_v53, %v10916_v19 }
0x10ea   :  { %v11055_v29 = vpop.f32.mrf.mxu1 }
0x10eb   :  { %v11056_v13 = vadd.f32 %v11055_v29, %v10986_v51  ;;  %v11125_v52 = vpop.f32.mrf.mxu0 }
0x10ec   :  { %v11057_v1 = vpop.f32.mrf.mxu1 }
0x10ed   :  { %v11126_v59 = vadd.f32 %v11125_v52, %v11056_v13  ;;  %v11127_v33 = vpop.f32.mrf.mxu0 }
0x10ef   :  { %v11129_v43 = vadd.f32 %v11126_v59, %v14508_v9  ;;  %v11978_v59 = vld [vmem:[%s14906_s3 + $0x11] ss:$0 sm:$0xff] }
0x10f1   :  { %v11132_v34 = vsel %vm4134_vm10, %v11129_v43, 0.0 }
0x10f2   :  { %11133 = vadd.xlane.f32.xlu1 %v11132_v34 }
0x10f3   :  { %v11266_v60 = vpop.f32.mrf.mxu1 }
0x10f4   :  { %v11339_v32 = vpop.f32.mrf.mxu0 }
0x10f5   :  { %v12742_v5 = vpop.f32.mrf.mxu1  ;;  %v11340_v61 = vadd.f32 %v11339_v32, %v11266_v60 }
0x10f6   :  { %v12753_v26 = vpop.f32.mrf.mxu0 }
0x10fc   :  { %v11416_v57 = vpop.f32.mrf.mxu1 }
0x10fd   :  { %v11420_v24 = vadd.f32 %v11416_v57, %v11340_v61  ;;  %v11986_v61 = vld [vmem:[%s14906_s3 + $0x16] ss:$0 sm:$0xff] }
0x10fe   :  { %v12764_v45 = vpop.f32.mrf.mxu1 }
0x10ff   :  { %v11426_v6 = vadd.f32 %v11983_v62, %v11420_v24 }
0x1101   :  { %v11430_v18 = vsel %vm11429_vm11, %v11426_v6, 0.0 }
0x1102   :  { %11431 = vadd.xlane.f32.xlu0 %v11430_v18 }
0x117b   :  { %v11134_v9 = vpop.xlane.xlu1 %11133 }
0x117c   :  { %v11135_v55 = vmul.f32 0.03125, %v11134_v9 }
0x117e   :  { %v11136_v7 = vsub.f32 %v11129_v43, %v11135_v55  ;;  %v11979_v43 = vld [vmem:[%s14906_s3 + $0x12] ss:$0 sm:$0xff] }
0x1180   :  { %v11137_v11 = vmul.f32 %v11136_v7, %v11136_v7 }
0x1182   :  { %v11138_v14 = vsel %vm4134_vm10, %v11137_v11, 0.0 }
0x1183   :  { %11139 = vadd.xlane.f32.xlu1 %v11138_v14 }
0x118b   :  { %v11432_v12 = vpop.xlane.xlu0 %11431 }
0x118c   :  { %v11433_v3 = vmul.f32 0.03125, %v11432_v12 }
0x118e   :  { %v11434_v10 = vsub.f32 %v11426_v6, %v11433_v3 }
0x1190   :  { %v11435_v47 = vmul.f32 %v11434_v10, %v11434_v10 }
0x1192   :  { %v11436_v4 = vsel %vm11429_vm11, %v11435_v47, 0.0  ;;  %v11988_v47 = vld [vmem:[%s14906_s3 + $0x17] ss:$0 sm:$0xff] }
0x1193   :  { %11437 = vadd.xlane.f32.xlu0 %v11436_v4 }
0x120c   :  { %v11140_v63 = vpop.xlane.xlu1 %11139 }
0x120d   :  { %v11141_v22 = vmul.f32 0.03125, %v11140_v63 }
0x120f   :  { %v11142_v36 = vadd.f32 1e-05, %v11141_v22 }
0x1211   :  { %12913 = vrsqrt.f32 %v11142_v36 }
0x121c   :  { %v11438_v0 = vpop.xlane.xlu0 %11437 }
0x121d   :  { %v11439_v58 = vmul.f32 0.03125, %v11438_v0 }
0x121e   :  { %v12914_v39 = vpop.eup %12913 }
0x121f   :  { %v11440_v20 = vadd.f32 1e-05, %v11439_v58  ;;  %v11144_v8 = vmul.f32 %v12914_v39, %v11136_v7 }
0x1221   :  { %12915 = vrsqrt.f32 %v11440_v20  ;;  %v11149_v2 = vmul.f32 %v11976_v16, %v11144_v8 }
0x1223   :  { %v11154_v28 = vadd.f32 %v11977_v30, %v11149_v2 }
0x1225   :  { %v11157_v40 = vsel %vm4134_vm10, %v11154_v28, 0.0 }
0x1226   :  { %11158 = vadd.xlane.f32.xlu0 %v11157_v40 }
0x122e   :  { %v12916_v38 = vpop.eup %12915 }
0x122f   :  { %v11442_v46 = vmul.f32 %v12916_v38, %v11434_v10 }
0x1231   :  { %v11447_v49 = vmul.f32 %v11984_v41, %v11442_v46 }
0x1233   :  { %v11452_v50 = vadd.f32 %v11985_v56, %v11447_v49 }
0x1235   :  { %v11454_v31 = vmul.f32 0.70710677, %v11452_v50  ;;  %v11453_v48 = vmul.f32 0.5, %v11452_v50 }
0x1237   :  { %12917 = verf.f32 %v11454_v31 }
0x1244   :  { %v12918_v35 = vpop.eup %12917 }
0x1245   :  { %v11456_v25 = vadd.f32 1.0, %v12918_v35 }
0x1247   :  { %v11457_v53 = vmul.f32 %v11456_v25, %v11453_v48 }
0x1249   :  { %12774 = vmatmul.mubr.msk.f32.vlgmr.msra.gmra.mxu0 %vm438_vm3, %v11457_v53 }
0x12af   :  { %v11159_v54 = vpop.xlane.xlu0 %11158 }
0x12b0   :  { %v11160_v37 = vmul.f32 0.03125, %v11159_v54 }
0x12b2   :  { %v11161_v44 = vsub.f32 %v11154_v28, %v11160_v37 }
0x12b4   :  { %v11162_v42 = vmul.f32 %v11161_v44, %v11161_v44 }
0x12b6   :  { %v11163_v23 = vsel %vm4134_vm10, %v11162_v42, 0.0 }
0x12b7   :  { %11164 = vadd.xlane.f32.xlu1 %v11163_v23 }
0x1309   :  { %v11536_v19 = vpop.f32.mrf.mxu0 }
0x130a   :  { %v11537_v62 = vadd.f32 %v11986_v61, %v11536_v19 }
0x130b   :  { %v12775_v51 = vpop.f32.mrf.mxu0 }
0x1340   :  { %v11165_v29 = vpop.xlane.xlu1 %11164 }
0x1341   :  { %v11166_v13 = vmul.f32 0.03125, %v11165_v29 }
0x1343   :  { %v11167_v52 = vadd.f32 1e-05, %v11166_v13 }
0x1345   :  { %12919 = vrsqrt.f32 %v11167_v52 }
0x1352   :  { %v12920_v1 = vpop.eup %12919 }
0x1353   :  { %v11169_v33 = vmul.f32 %v12920_v1, %v11161_v44 }
0x1355   :  { %v11174_v34 = vmul.f32 %v11978_v59, %v11169_v33 }
0x1357   :  { %v11179_v60 = vadd.f32 %v11979_v43, %v11174_v34 }
0x1359   :  { %v11181_v32 = vrot.slane %v11179_v60, 2  ;;  %v11184_v26 = vrot.slane %v11179_v60, 4 }
0x135b   :  { %v11183_v5 = vadd.f32 %v11181_v32, %v11179_v60 }
0x135d   :  { %v11186_v57 = vadd.f32 %v11184_v26, %v11183_v5 }
0x135f   :  { %v11188_v24 = vmul.f32 0.33333334, %v11186_v57 }
0x1361   :  { %v11540_v45 = vadd.f32 %v11537_v62, %v11188_v24 }
0x1363   :  { %v11543_v6 = vsel %vm11429_vm11, %v11540_v45, 0.0 }
0x1364   :  { %11544 = vadd.xlane.f32.xlu0 %v11543_v6 }
0x13ed   :  { %v11545_v18 = vpop.xlane.xlu0 %11544 }
0x13ee   :  { %v11546_v9 = vmul.f32 0.03125, %v11545_v18 }
0x13f0   :  { %v11547_v55 = vsub.f32 %v11540_v45, %v11546_v9 }
0x13f2   :  { %v11548_v7 = vmul.f32 %v11547_v55, %v11547_v55 }
0x13f4   :  { %v11549_v11 = vsel %vm11429_vm11, %v11548_v7, 0.0 }
0x13f5   :  { %11550 = vadd.xlane.f32.xlu1 %v11549_v11 }
0x147e   :  { %v11551_v14 = vpop.xlane.xlu1 %11550 }
0x147f   :  { %v11552_v12 = vmul.f32 0.03125, %v11551_v14 }
0x1481   :  { %v11553_v3 = vadd.f32 1e-05, %v11552_v12 }
0x1483   :  { %12921 = vrsqrt.f32 %v11553_v3 }
0x1490   :  { %v12922_v10 = vpop.eup %12921 }
0x1491   :  { %v11555_v4 = vmul.f32 %v12922_v10, %v11547_v55 }
0x1493   :  { %v11560_v21 = vmul.f32 %v11988_v47, %v11555_v4 }
0x1495   :  { %v11565_v17 = vadd.f32 %v11989_v27, %v11560_v21 }
0x1497   :  { %11566 = vst.msk [vmem:[#allocation2] sm:$0x3] %vm11429_vm11, %v11565_v17 }
0x1498   :  { %12936 = shalt.err (!%p12933_p4)
}
0x1499   :  { %11576 = dma.vmem_to_hbm [thread:$0]  %s11574_s11, 32, %s14915_s12, [#allocation3]  }
0x149a   :  { %12945 = dma.done.wait [#allocation3], 32  }
0x149b   :  { %12946 = vsyncadd [#allocation3], 4294967264 }
0x149c   :  { %11580 = vsyncpa [#allocation3], 1 }

</bundles_post_ra>
